<compile_context>
chip_gen: v7x
topology: tpu7x:2x2x1
jax: 0.10.0
libtpu: 0.0.40
codegen_flags: <defaults>
</compile_context>

<pallas_src>
import math

import jax
import jax.numpy as jnp
from jax.experimental import pallas as pl
from jax.experimental.pallas import tpu as pltpu

# ----------------------------- configuration --------------------------------
D_MODEL = 32
N_HEAD = 4
D_HEAD = D_MODEL // N_HEAD
D_FF = 64
NUM_ENC_LAYERS = 2
NUM_DEC_LAYERS = 2
OBJ_HIDDEN = 48
OCR_HIDDEN = 40
ENC_VOCAB = 96          # config.new_token_embedding_size (encoder.shared)
TGT_VOCAB = 64          # tgt_vocab_size
REL_NUM_BUCKETS = 32
REL_MAX_DISTANCE = 128
LN_EPS_T5 = 1e-6
LN_EPS = 1e-5
NEG_INF = -1e9

_BF16 = jnp.bfloat16
_F32 = jnp.float32


# ------------------------- in-kernel helper functions ------------------------
def _rms(x, g):
    """T5LayerNorm: x * rsqrt(mean(x^2) + eps) * g (no mean subtraction)."""
    var = jnp.mean(x * x, axis=-1, keepdims=True)
    return x * jax.lax.rsqrt(var + LN_EPS_T5) * g


def _layernorm(x, g, b):
    mu = jnp.mean(x, axis=-1, keepdims=True)
    var = jnp.mean((x - mu) * (x - mu), axis=-1, keepdims=True)
    return (x - mu) * jax.lax.rsqrt(var + LN_EPS) * g + b


def _split_heads(x):
    # (L, D_MODEL) -> (H, L, D_HEAD): lane slices stacked on a new leading axis.
    return jnp.stack([x[:, h * D_HEAD:(h + 1) * D_HEAD] for h in range(N_HEAD)],
                     axis=0)


def _mha(q, k, v, bias, scale):
    """Batched-head attention: ONE score matmul, ONE softmax, ONE P.V matmul.

    bias broadcasts against (H, Lq, Lk): (H,Lq,Lk), (Lq,Lk) or (1,Lk) all work.
    """
    qh = _split_heads(q).astype(_BF16)                       # (H, Lq, Dh)
    kh = _split_heads(k).astype(_BF16)                       # (H, Lk, Dh)
    vh = _split_heads(v).astype(_BF16)                       # (H, Lk, Dh)
    s = jnp.einsum('hqd,hkd->hqk', qh, kh, preferred_element_type=_F32)
    s = s * scale + bias
    m = jnp.max(s, axis=-1, keepdims=True)
    p = jnp.exp(s - m)
    p = p * pl.reciprocal(jnp.sum(p, axis=-1, keepdims=True), approx=True)
    o = jnp.einsum('hqk,hkd->hqd', p.astype(_BF16), vh,
                   preferred_element_type=_F32)              # (H, Lq, Dh)
    return jnp.concatenate([o[h] for h in range(N_HEAD)], axis=-1)  # (Lq, D)


# --------------------------- weight slab packing ------------------------------
def _weight_specs():
    specs = [("obj_wf", OBJ_HIDDEN, D_MODEL), ("obj_wb", 4, D_MODEL),
             ("ocr_wf", OCR_HIDDEN, D_MODEL), ("ocr_wb", 4, D_MODEL)]
    for l in range(NUM_ENC_LAYERS):
        specs += [(f"enc{l}_wqkv", D_MODEL, 3 * D_MODEL),
                  (f"enc{l}_wo", D_MODEL, D_MODEL),
                  (f"enc{l}_wi", D_MODEL, D_FF),
                  (f"enc{l}_wff", D_FF, D_MODEL)]
    for l in range(NUM_DEC_LAYERS):
        specs += [(f"dec{l}_wsqkv", D_MODEL, 3 * D_MODEL),
                  (f"dec{l}_wso", D_MODEL, D_MODEL),
                  (f"dec{l}_wcq", D_MODEL, D_MODEL),
                  (f"dec{l}_wckv", D_MODEL, 2 * D_MODEL),
                  (f"dec{l}_wco", D_MODEL, D_MODEL),
                  (f"dec{l}_wf1", D_MODEL, D_FF),
                  (f"dec{l}_wf2", D_FF, D_MODEL)]
    specs += [("lm_w", D_MODEL, TGT_VOCAB)]
    return specs


def _vec_specs():
    # (name, width, init_value)   init 1.0 => LayerNorm gain, 0.0 => bias
    specs = [("obj_bf", D_MODEL, 0.0), ("obj_bb", D_MODEL, 0.0), ("obj_g", D_MODEL, 1.0),
             ("ocr_bf", D_MODEL, 0.0), ("ocr_bb", D_MODEL, 0.0), ("ocr_g", D_MODEL, 1.0)]
    for l in range(NUM_ENC_LAYERS):
        specs += [(f"enc{l}_ln1", D_MODEL, 1.0), (f"enc{l}_ln2", D_MODEL, 1.0)]
    specs += [("final_ln", D_MODEL, 1.0)]
    for l in range(NUM_DEC_LAYERS):
        specs += [(f"dec{l}_bsqkv", 3 * D_MODEL, 0.0), (f"dec{l}_bso", D_MODEL, 0.0),
                  (f"dec{l}_ln1g", D_MODEL, 1.0), (f"dec{l}_ln1b", D_MODEL, 0.0),
                  (f"dec{l}_bcq", D_MODEL, 0.0), (f"dec{l}_bckv", 2 * D_MODEL, 0.0),
                  (f"dec{l}_bco", D_MODEL, 0.0), (f"dec{l}_ln2g", D_MODEL, 1.0),
                  (f"dec{l}_ln2b", D_MODEL, 0.0), (f"dec{l}_bf1", D_FF, 0.0),
                  (f"dec{l}_bf2", D_MODEL, 0.0), (f"dec{l}_ln3g", D_MODEL, 1.0),
                  (f"dec{l}_ln3b", D_MODEL, 0.0)]
    specs += [("lm_b", TGT_VOCAB, 0.0)]
    return specs


def _round_up(n, m):
    return ((n + m - 1) // m) * m


def _build_w_offsets():
    offs, off = {}, 0
    for name, r, c in _weight_specs():
        offs[name] = (off, r, c)
        off += _round_up(r, 16)      # keep every weight block bf16-sublane aligned
    return offs, off


def _build_v_offsets():
    specs = _vec_specs()
    offs = {name: (i, c) for i, (name, c, _) in enumerate(specs)}
    return offs, _round_up(len(specs), 8)


SLAB_W = 3 * D_MODEL                 # widest packed row (96 lanes)
W_OFFS, W_ROWS = _build_w_offsets()
V_OFFS, V_ROWS = _build_v_offsets()


# ------------------------------ fused Pallas kernel --------------------------
def _build_kernel(LQ, LOCR, LOBJ, S, Ld):
    dec_scale = 1.0 / math.sqrt(D_HEAD)

    def kernel(tok_ref, ocr_coord_ref, ocr_feat_ref, obj_coord_ref, obj_feat_ref,
               tgt_ref, emask_ref, lmask_ref, relb_ref, causal_ref,
               w_ref, v_ref, out_ref, xbuf):

        def gw(name):                                   # bf16 matmul weight slice
            o, r, c = W_OFFS[name]
            return w_ref[o:o + r, :c]

        def gv(name):                                   # f32 (1, c) gain/bias row
            o, c = V_OFFS[name]
            return v_ref[o:o + 1, :c]

        def mm(a, name):                                # MXU: bf16 x bf16 -> f32
            return jnp.dot(a.astype(_BF16), gw(name), preferred_element_type=_F32)

        def modal(tok, coord, feat, pfx):
            # NOTE: the PyTorch module applies the SAME T5LayerNorm instance to
            # both projections, so one shared gain per modality matches the spec.
            g = gv(pfx + "_g")
            pf = mm(feat, pfx + "_wf") + gv(pfx + "_bf")
            pb = mm(coord, pfx + "_wb") + gv(pfx + "_bb")
            return _rms(pf, g) + _rms(pb, g) + tok

        # ---- multi-modal input assembly: rows = [question | ocr | obj] ------
        xbuf[0:LQ, :] = tok_ref[0:LQ, :]
        xbuf[LQ:LQ + LOCR, :] = modal(tok_ref[LQ:LQ + LOCR, :],
                                      ocr_coord_ref[...], ocr_feat_ref[...], "ocr")
        xbuf[LQ + LOCR:S, :] = modal(tok_ref[LQ + LOCR:S, :],
                                     obj_coord_ref[...], obj_feat_ref[...], "obj")
        x = xbuf[...]                                   # (S, D) f32

        key_bias = (1.0 - emask_ref[...]) * NEG_INF     # (1, S): -1e9 on padded keys
        enc_bias = relb_ref[...] + key_bias             # (H, S, S)

        # ---- T5 encoder (pre-LN, no 1/sqrt(d) scaling, relative pos bias) ---
        for l in range(NUM_ENC_LAYERS):
            n = _rms(x, gv(f"enc{l}_ln1"))
            qkv = mm(n, f"enc{l}_wqkv")                 # (S, 3D) fused QKV
            a = _mha(qkv[:, :D_MODEL], qkv[:, D_MODEL:2 * D_MODEL],
                     qkv[:, 2 * D_MODEL:], enc_bias, 1.0)
            x = x + mm(a, f"enc{l}_wo")
            n = _rms(x, gv(f"enc{l}_ln2"))
            x = x + mm(jax.nn.relu(mm(n, f"enc{l}_wi")), f"enc{l}_wff")
        mem = _rms(x, gv("final_ln"))                   # (S, D) encoder output

        # ---- decoder (post-LN) + lm_head -------------------------------------
        # TODO(synk): BaseDecoder is an external class; a standard post-LN
        # transformer decoder (self-attn + cross-attn + ReLU FFN) is implemented.
        # NOTE: causal + padding terms may sum to -2e9 before exp; fine in f32.
        self_bias = causal_ref[...] + (1.0 - lmask_ref[...]) * NEG_INF   # (Ld, Ld)
        y = tgt_ref[...]                                                  # (Ld, D)
        for l in range(NUM_DEC_LAYERS):
            qkv = mm(y, f"dec{l}_wsqkv") + gv(f"dec{l}_bsqkv")
            a = _mha(qkv[:, :D_MODEL], qkv[:, D_MODEL:2 * D_MODEL],
                     qkv[:, 2 * D_MODEL:], self_bias, dec_scale)
            y = _layernorm(y + mm(a, f"dec{l}_wso") + gv(f"dec{l}_bso"),
                           gv(f"dec{l}_ln1g"), gv(f"dec{l}_ln1b"))
            q = mm(y, f"dec{l}_wcq") + gv(f"dec{l}_bcq")
            kv = mm(mem, f"dec{l}_wckv") + gv(f"dec{l}_bckv")             # (S, 2D)
            a = _mha(q, kv[:, :D_MODEL], kv[:, D_MODEL:], key_bias, dec_scale)
            y = _layernorm(y + mm(a, f"dec{l}_wco") + gv(f"dec{l}_bco"),
                           gv(f"dec{l}_ln2g"), gv(f"dec{l}_ln2b"))
            h1 = jax.nn.relu(mm(y, f"dec{l}_wf1") + gv(f"dec{l}_bf1"))
            y = _layernorm(y + mm(h1, f"dec{l}_wf2") + gv(f"dec{l}_bf2"),
                           gv(f"dec{l}_ln3g"), gv(f"dec{l}_ln3b"))
        out_ref[...] = mm(y, "lm_w") + gv("lm_b")        # fused lm_head

    return kernel


def _idx_b3(b):
    return (b, 0, 0)


def _idx_c2(b):
    return (0, 0)


def _idx_c3(b):
    return (0, 0, 0)


def fused_forward(w_slab, v_slab, tok_emb, ocr_coord, ocr_feat, obj_coord, obj_feat,
                  tgt_emb, enc_mask, label_mask, rel_bias, causal):
    """One pallas_call: modal proj -> encoder -> decoder -> logits, grid=(B,)."""
    B, S, _ = tok_emb.shape
    LOCR = ocr_coord.shape[1]
    LOBJ = obj_coord.shape[1]
    LQ = S - LOCR - LOBJ
    Ld = tgt_emb.shape[1]

    in_specs = [
        pl.BlockSpec((None, S, D_MODEL), _idx_b3),           # token embeddings
        pl.BlockSpec((None, LOCR, 4), _idx_b3),              # ocr bbox
        pl.BlockSpec((None, LOCR, OCR_HIDDEN), _idx_b3),     # ocr features
        pl.BlockSpec((None, LOBJ, 4), _idx_b3),              # obj bbox
        pl.BlockSpec((None, LOBJ, OBJ_HIDDEN), _idx_b3),     # obj features
        pl.BlockSpec((None, Ld, D_MODEL), _idx_b3),          # tgt emb (+PE)
        pl.BlockSpec((None, 1, S), _idx_b3),                 # encoder padding mask
        pl.BlockSpec((None, 1, Ld), _idx_b3),                # label padding mask
        pl.BlockSpec((N_HEAD, S, S), _idx_c3),               # relative bias (const)
        pl.BlockSpec((Ld, Ld), _idx_c2),                     # causal mask (const)
        pl.BlockSpec((W_ROWS, SLAB_W), _idx_c2),             # bf16 weight slab (const)
        pl.BlockSpec((V_ROWS, SLAB_W), _idx_c2),             # f32 gain/bias slab (const)
    ]
    return pl.pallas_call(
        _build_kernel(LQ, LOCR, LOBJ, S, Ld),
        out_shape=jax.ShapeDtypeStruct((B, Ld, TGT_VOCAB), _F32),
        grid=(B,),
        in_specs=in_specs,
        out_specs=pl.BlockSpec((None, Ld, TGT_VOCAB), _idx_b3),
        scratch_shapes=[pltpu.VMEM((S, D_MODEL), _F32)],
        compiler_params=pltpu.CompilerParams(dimension_semantics=("parallel",)),
    )(tok_emb, ocr_coord, ocr_feat, obj_coord, obj_feat, tgt_emb,
      enc_mask, label_mask, rel_bias, causal, w_slab, v_slab)


# ------------------------------ plain-JAX glue --------------------------------
def sinusoidal_pe(L, D):
    pos = jnp.arange(L, dtype=_F32)[:, None]
    den = jnp.exp(-jnp.arange(0, D, 2, dtype=_F32) * (math.log(10000.0) / D))
    pe = jnp.zeros((L, D), _F32)
    pe = pe.at[:, 0::2].set(jnp.sin(pos * den))
    pe = pe.at[:, 1::2].set(jnp.cos(pos * den))
    return pe


def _relative_position_bucket(rel_pos, num_buckets=REL_NUM_BUCKETS,
                              max_distance=REL_MAX_DISTANCE):
    num_buckets = num_buckets // 2
    ret = (rel_pos > 0).astype(jnp.int32) * num_buckets
    n = jnp.abs(rel_pos)
    max_exact = num_buckets // 2
    is_small = n < max_exact
    val_large = max_exact + (
        jnp.log(jnp.maximum(n, 1).astype(_F32) / max_exact)
        / math.log(max_distance / max_exact) * (num_buckets - max_exact)
    ).astype(jnp.int32)
    val_large = jnp.minimum(val_large, num_buckets - 1)
    return ret + jnp.where(is_small, n, val_large)


def rel1d_bias(rel_emb, S):
    # TODO(synk): SCPRelativePositionBias (spatial 2D half of
    # RelativePositionBiasAggregated) is an external, undefined class; only the
    # T5-style 1D relative-bucket bias is reproduced (mask added in-kernel).
    pos = jnp.arange(S)
    buckets = _relative_position_bucket(pos[None, :] - pos[:, None])
    return jnp.transpose(rel_emb[buckets], (2, 0, 1)).astype(_F32)    # (H, S, S)


# --------------------------------- forward ------------------------------------
def forward(params, input_ids, src_attention_mask, label_ids, label_attention_mask,
            tokenized_ocr, ocr_attention_mask, ocr_coordinates, ocr_features,
            tokenized_obj, obj_attention_mask, obj_coordinates, obj_features,
            max_ocr, max_ques):
    del max_ocr, max_ques     # only used by the un-reproduced SCP spatial bias
    B, LQ = input_ids.shape
    Ld = label_ids.shape[1]
    S = LQ + tokenized_ocr.shape[1] + tokenized_obj.shape[1]

    # TODO(synk): embedding gathers kept in plain JAX (no clean Pallas gather here).
    all_ids = jnp.concatenate([input_ids, tokenized_ocr, tokenized_obj], axis=1)
    tok_emb = params["shared_emb"][all_ids]                            # (B, S, D)
    tgt_emb = (params["tgt_emb"][label_ids] * math.sqrt(D_MODEL)       # TokenEmbedding
               + sinusoidal_pe(Ld, D_MODEL)[None])                     # eval: no dropout

    in_mask = jnp.concatenate([src_attention_mask, ocr_attention_mask,
                               obj_attention_mask], axis=1).astype(_F32)   # (B, S)
    rel_bias = rel1d_bias(params["rel_emb"], S)                        # (H, S, S)
    causal = jnp.where(jnp.arange(Ld)[:, None] >= jnp.arange(Ld)[None, :],
                       0.0, NEG_INF).astype(_F32)                      # (Ld, Ld)

    return fused_forward(params["w_slab"], params["v_slab"],
                         tok_emb.astype(_F32),
                         ocr_coordinates.astype(_F32), ocr_features.astype(_F32),
                         obj_coordinates.astype(_F32), obj_features.astype(_F32),
                         tgt_emb.astype(_F32),
                         in_mask[:, None, :],
                         label_attention_mask.astype(_F32)[:, None, :],
                         rel_bias, causal)


# ------------------------------ parameter init --------------------------------
def init_params(key):
    # TODO(synk): T5 encoder.shared / all weights are synthetic (no pretrained load).
    k_shared, k_tgt, k_rel, k_w = jax.random.split(key, 4)

    w_slab = jnp.zeros((W_ROWS, SLAB_W), _F32)
    for i, (name, r, c) in enumerate(_weight_specs()):
        o, _, _ = W_OFFS[name]
        w_slab = w_slab.at[o:o + r, :c].set(
            jax.random.normal(jax.random.fold_in(k_w, i), (r, c), _F32) * 0.02)

    v_slab = jnp.zeros((V_ROWS, SLAB_W), _F32)
    for name, c, init in _vec_specs():
        o, _ = V_OFFS[name]
        if init != 0.0:
            v_slab = v_slab.at[o, :c].set(init)

    return {
        "shared_emb": jax.random.normal(k_shared, (ENC_VOCAB, D_MODEL), _F32) * 0.02,
        "tgt_emb": jax.random.normal(k_tgt, (TGT_VOCAB, D_MODEL), _F32) * 0.02,
        "rel_emb": jax.random.normal(k_rel, (REL_NUM_BUCKETS, N_HEAD), _F32) * 0.02,
        "w_slab": w_slab.astype(_BF16),   # MXU operands stored bf16 once
        "v_slab": v_slab,                 # LN gains / biases stay f32
    }


# ---------------------------------- main ---------------------------------------
if __name__ == "__main__":
    params = init_params(jax.random.PRNGKey(1))

    key = jax.random.PRNGKey(0)
    ks = jax.random.split(key, 12)
    B, LQ, LOCR, LOBJ, LLAB = 2, 8, 6, 6, 8

    input_ids = jax.random.randint(ks[0], (B, LQ), 0, ENC_VOCAB)
    src_attention_mask = jnp.ones((B, LQ), _F32).at[1, -2:].set(0.0)
    label_ids = jax.random.randint(ks[1], (B, LLAB), 0, TGT_VOCAB)
    label_attention_mask = jnp.ones((B, LLAB), _F32).at[0, -1].set(0.0)

    tokenized_ocr = jax.random.randint(ks[2], (B, LOCR), 0, ENC_VOCAB)
    ocr_attention_mask = jnp.ones((B, LOCR), _F32).at[1, -1].set(0.0)
    ocr_coordinates = jax.random.uniform(ks[3], (B, LOCR, 4), _F32)
    ocr_features = jax.random.normal(ks[4], (B, LOCR, OCR_HIDDEN), _F32)

    tokenized_obj = jax.random.randint(ks[5], (B, LOBJ), 0, ENC_VOCAB)
    obj_attention_mask = jnp.ones((B, LOBJ), _F32)
    obj_coordinates = jax.random.uniform(ks[6], (B, LOBJ, 4), _F32)
    obj_features = jax.random.normal(ks[7], (B, LOBJ, OBJ_HIDDEN), _F32)

    fwd = jax.jit(forward)
    logits = fwd(params, input_ids, src_attention_mask, label_ids,
                 label_attention_mask, tokenized_ocr, ocr_attention_mask,
                 ocr_coordinates, ocr_features, tokenized_obj,
                 obj_attention_mask, obj_coordinates, obj_features,
                 max_ocr=LOCR, max_ques=LQ)
    jax.block_until_ready(logits)
    assert logits.shape == (B, LLAB, TGT_VOCAB), logits.shape
    assert bool(jnp.all(jnp.isfinite(logits)))
    print("KERNEL_OK")
</pallas_src>

<mosaic_0001>
module attributes {stable_mosaic.version = 11 : i64} {
  func.func @kernel(%arg0: i32, %arg1: memref<1x20x32xf32, #tpu.memory_space<vmem>>, %arg2: memref<1x6x4xf32, #tpu.memory_space<vmem>>, %arg3: memref<1x6x40xf32, #tpu.memory_space<vmem>>, %arg4: memref<1x6x4xf32, #tpu.memory_space<vmem>>, %arg5: memref<1x6x48xf32, #tpu.memory_space<vmem>>, %arg6: memref<1x8x32xf32, #tpu.memory_space<vmem>>, %arg7: memref<1x1x20xf32, #tpu.memory_space<vmem>>, %arg8: memref<1x1x8xf32, #tpu.memory_space<vmem>>, %arg9: memref<4x20x20xf32, #tpu.memory_space<vmem>>, %arg10: memref<8x8xf32, #tpu.memory_space<vmem>>, %arg11: memref<992x96xbf16, #tpu.memory_space<vmem>>, %arg12: memref<40x96xf32, #tpu.memory_space<vmem>>, %arg13: memref<1x8x64xf32, #tpu.memory_space<vmem>>, %arg14: memref<20x32xf32, #tpu.memory_space<vmem>>) attributes {dimension_semantics = [#tpu.dimension_semantics<parallel>], iteration_bounds = array<i64: 2>, scalar_prefetch = 0 : i64, scratch_operands = 1 : i64, tpu.core_type = #tpu.core_type<tc>, window_params = [{transform_indices = @transform_0, window_bounds = array<i64: 1, 20, 32>}, {transform_indices = @transform_1, window_bounds = array<i64: 1, 6, 4>}, {transform_indices = @transform_2, window_bounds = array<i64: 1, 6, 40>}, {transform_indices = @transform_3, window_bounds = array<i64: 1, 6, 4>}, {transform_indices = @transform_4, window_bounds = array<i64: 1, 6, 48>}, {transform_indices = @transform_5, window_bounds = array<i64: 1, 8, 32>}, {transform_indices = @transform_6, window_bounds = array<i64: 1, 1, 20>}, {transform_indices = @transform_7, window_bounds = array<i64: 1, 1, 8>}, {pipeline_mode = #tpu.pipeline_mode<synchronous>, transform_indices = @transform_8, window_bounds = array<i64: 4, 20, 20>}, {pipeline_mode = #tpu.pipeline_mode<synchronous>, transform_indices = @transform_9, window_bounds = array<i64: 8, 8>}, {pipeline_mode = #tpu.pipeline_mode<synchronous>, transform_indices = @transform_10, window_bounds = array<i64: 992, 96>}, {pipeline_mode = #tpu.pipeline_mode<synchronous>, transform_indices = @transform_11, window_bounds = array<i64: 40, 96>}, {transform_indices = @transform_12, window_bounds = array<i64: 1, 8, 64>}]} {
    %c0 = arith.constant 0 : index
    %c0_0 = arith.constant 0 : index
    %c0_1 = arith.constant 0 : index
    %0 = vector.load %arg1[%c0, %c0_0, %c0_1] : memref<1x20x32xf32, #tpu.memory_space<vmem>>, vector<1x8x32xf32>
    %1 = vector.shape_cast %0 : vector<1x8x32xf32> to vector<8x32xf32>
    %c0_2 = arith.constant 0 : index
    %c0_3 = arith.constant 0 : index
    %2 = vector.load %arg14[%c0_2, %c0_3] : memref<20x32xf32, #tpu.memory_space<vmem>>, vector<8x32xf32>
    tpu.vector_store %arg14[%c0_2, %c0_3], %1 {strides = array<i32>} : memref<20x32xf32, #tpu.memory_space<vmem>>, vector<8x32xf32>,
    %c0_4 = arith.constant 0 : index
    %c8 = arith.constant 8 : index
    %c0_5 = arith.constant 0 : index
    %3 = vector.load %arg1[%c0_4, %c8, %c0_5] : memref<1x20x32xf32, #tpu.memory_space<vmem>>, vector<1x6x32xf32>
    %4 = vector.shape_cast %3 : vector<1x6x32xf32> to vector<6x32xf32>
    %c0_6 = arith.constant 0 : index
    %c0_7 = arith.constant 0 : index
    %c0_8 = arith.constant 0 : index
    %5 = vector.load %arg2[%c0_6, %c0_7, %c0_8] : memref<1x6x4xf32, #tpu.memory_space<vmem>>, vector<1x6x4xf32>
    %6 = vector.shape_cast %5 : vector<1x6x4xf32> to vector<6x4xf32>
    %c0_9 = arith.constant 0 : index
    %c0_10 = arith.constant 0 : index
    %c0_11 = arith.constant 0 : index
    %7 = vector.load %arg3[%c0_9, %c0_10, %c0_11] : memref<1x6x40xf32, #tpu.memory_space<vmem>>, vector<1x6x40xf32>
    %8 = vector.shape_cast %7 : vector<1x6x40xf32> to vector<6x40xf32>
    %c5 = arith.constant 5 : index
    %c0_12 = arith.constant 0 : index
    %9 = vector.load %arg12[%c5, %c0_12] : memref<40x96xf32, #tpu.memory_space<vmem>>, vector<1x32xf32>
    %10 = arith.truncf %8 : vector<6x40xf32> to vector<6x40xbf16>
    %c64 = arith.constant 64 : index
    %c0_13 = arith.constant 0 : index
    %11 = vector.load %arg11[%c64, %c0_13] : memref<992x96xbf16, #tpu.memory_space<vmem>>, vector<40x32xbf16>
    %cst = arith.constant dense<0.000000e+00> : vector<6x32xf32>
    %12 = tpu.matmul %10, %11, %cst {dimension_numbers = #tpu.dot_dimension_numbers<[1], [0], [0], [1], [0, 0, 1, 1], [], []>} : vector<6x40xbf16>, vector<40x32xbf16>, vector<6x32xf32> -> vector<6x32xf32>
    %c3 = arith.constant 3 : index
    %c0_14 = arith.constant 0 : index
    %13 = vector.load %arg12[%c3, %c0_14] : memref<40x96xf32, #tpu.memory_space<vmem>>, vector<1x32xf32>
    %14 = vector.broadcast %13 : vector<1x32xf32> to vector<6x32xf32>
    %15 = arith.addf %12, %14 : vector<6x32xf32>
    %16 = arith.truncf %6 : vector<6x4xf32> to vector<6x4xbf16>
    %c112 = arith.constant 112 : index
    %c0_15 = arith.constant 0 : index
    %17 = vector.load %arg11[%c112, %c0_15] : memref<992x96xbf16, #tpu.memory_space<vmem>>, vector<4x32xbf16>
    %cst_16 = arith.constant dense<0.000000e+00> : vector<6x32xf32>
    %18 = tpu.matmul %16, %17, %cst_16 {dimension_numbers = #tpu.dot_dimension_numbers<[1], [0], [0], [1], [0, 0, 1, 1], [], []>} : vector<6x4xbf16>, vector<4x32xbf16>, vector<6x32xf32> -> vector<6x32xf32>
    %c4 = arith.constant 4 : index
    %c0_17 = arith.constant 0 : index
    %19 = vector.load %arg12[%c4, %c0_17] : memref<40x96xf32, #tpu.memory_space<vmem>>, vector<1x32xf32>
    %20 = vector.broadcast %19 : vector<1x32xf32> to vector<6x32xf32>
    %21 = arith.addf %18, %20 : vector<6x32xf32>
    %22 = arith.mulf %15, %15 : vector<6x32xf32>
    %cst_18 = arith.constant dense<0.000000e+00> : vector<6xf32>
    %23 = vector.multi_reduction <add>, %22, %cst_18 [1] : vector<6x32xf32> to vector<6xf32>
    %24 = vector.shape_cast %23 : vector<6xf32> to vector<6x1xf32>
    %cst_19 = arith.constant 3.200000e+01 : f32
    %25 = vector.broadcast %cst_19 : f32 to vector<6x1xf32>
    %26 = arith.divf %24, %25 : vector<6x1xf32>
    %cst_20 = arith.constant 9.99999997E-7 : f32
    %27 = vector.broadcast %cst_20 : f32 to vector<6x1xf32>
    %28 = arith.addf %26, %27 : vector<6x1xf32>
    %29 = math.rsqrt %28 : vector<6x1xf32>
    %30 = vector.broadcast %29 : vector<6x1xf32> to vector<6x32xf32>
    %31 = arith.mulf %15, %30 : vector<6x32xf32>
    %32 = vector.broadcast %9 : vector<1x32xf32> to vector<6x32xf32>
    %33 = arith.mulf %31, %32 : vector<6x32xf32>
    %34 = arith.mulf %21, %21 : vector<6x32xf32>
    %cst_21 = arith.constant dense<0.000000e+00> : vector<6xf32>
    %35 = vector.multi_reduction <add>, %34, %cst_21 [1] : vector<6x32xf32> to vector<6xf32>
    %36 = vector.shape_cast %35 : vector<6xf32> to vector<6x1xf32>
    %cst_22 = arith.constant 3.200000e+01 : f32
    %37 = vector.broadcast %cst_22 : f32 to vector<6x1xf32>
    %38 = arith.divf %36, %37 : vector<6x1xf32>
    %cst_23 = arith.constant 9.99999997E-7 : f32
    %39 = vector.broadcast %cst_23 : f32 to vector<6x1xf32>
    %40 = arith.addf %38, %39 : vector<6x1xf32>
    %41 = math.rsqrt %40 : vector<6x1xf32>
    %42 = vector.broadcast %41 : vector<6x1xf32> to vector<6x32xf32>
    %43 = arith.mulf %21, %42 : vector<6x32xf32>
    %44 = vector.broadcast %9 : vector<1x32xf32> to vector<6x32xf32>
    %45 = arith.mulf %43, %44 : vector<6x32xf32>
    %46 = arith.addf %33, %45 : vector<6x32xf32>
    %47 = arith.addf %46, %4 : vector<6x32xf32>
    %c8_24 = arith.constant 8 : index
    %c0_25 = arith.constant 0 : index
    %48 = vector.load %arg14[%c8_24, %c0_25] : memref<20x32xf32, #tpu.memory_space<vmem>>, vector<6x32xf32>
    tpu.vector_store %arg14[%c8_24, %c0_25], %47 {strides = array<i32>} : memref<20x32xf32, #tpu.memory_space<vmem>>, vector<6x32xf32>,
    %c0_26 = arith.constant 0 : index
    %c14 = arith.constant 14 : index
    %c0_27 = arith.constant 0 : index
    %49 = vector.load %arg1[%c0_26, %c14, %c0_27] : memref<1x20x32xf32, #tpu.memory_space<vmem>>, vector<1x6x32xf32>
    %50 = vector.shape_cast %49 : vector<1x6x32xf32> to vector<6x32xf32>
    %c0_28 = arith.constant 0 : index
    %c0_29 = arith.constant 0 : index
    %c0_30 = arith.constant 0 : index
    %51 = vector.load %arg4[%c0_28, %c0_29, %c0_30] : memref<1x6x4xf32, #tpu.memory_space<vmem>>, vector<1x6x4xf32>
    %52 = vector.shape_cast %51 : vector<1x6x4xf32> to vector<6x4xf32>
    %c0_31 = arith.constant 0 : index
    %c0_32 = arith.constant 0 : index
    %c0_33 = arith.constant 0 : index
    %53 = vector.load %arg5[%c0_31, %c0_32, %c0_33] : memref<1x6x48xf32, #tpu.memory_space<vmem>>, vector<1x6x48xf32>
    %54 = vector.shape_cast %53 : vector<1x6x48xf32> to vector<6x48xf32>
    %c2 = arith.constant 2 : index
    %c0_34 = arith.constant 0 : index
    %55 = vector.load %arg12[%c2, %c0_34] : memref<40x96xf32, #tpu.memory_space<vmem>>, vector<1x32xf32>
    %56 = arith.truncf %54 : vector<6x48xf32> to vector<6x48xbf16>
    %c0_35 = arith.constant 0 : index
    %c0_36 = arith.constant 0 : index
    %57 = vector.load %arg11[%c0_35, %c0_36] : memref<992x96xbf16, #tpu.memory_space<vmem>>, vector<48x32xbf16>
    %cst_37 = arith.constant dense<0.000000e+00> : vector<6x32xf32>
    %58 = tpu.matmul %56, %57, %cst_37 {dimension_numbers = #tpu.dot_dimension_numbers<[1], [0], [0], [1], [0, 0, 1, 1], [], []>} : vector<6x48xbf16>, vector<48x32xbf16>, vector<6x32xf32> -> vector<6x32xf32>
    %c0_38 = arith.constant 0 : index
    %c0_39 = arith.constant 0 : index
    %59 = vector.load %arg12[%c0_38, %c0_39] : memref<40x96xf32, #tpu.memory_space<vmem>>, vector<1x32xf32>
    %60 = vector.broadcast %59 : vector<1x32xf32> to vector<6x32xf32>
    %61 = arith.addf %58, %60 : vector<6x32xf32>
    %62 = arith.truncf %52 : vector<6x4xf32> to vector<6x4xbf16>
    %c48 = arith.constant 48 : index
    %c0_40 = arith.constant 0 : index
    %63 = vector.load %arg11[%c48, %c0_40] : memref<992x96xbf16, #tpu.memory_space<vmem>>, vector<4x32xbf16>
    %cst_41 = arith.constant dense<0.000000e+00> : vector<6x32xf32>
    %64 = tpu.matmul %62, %63, %cst_41 {dimension_numbers = #tpu.dot_dimension_numbers<[1], [0], [0], [1], [0, 0, 1, 1], [], []>} : vector<6x4xbf16>, vector<4x32xbf16>, vector<6x32xf32> -> vector<6x32xf32>
    %c1 = arith.constant 1 : index
    %c0_42 = arith.constant 0 : index
    %65 = vector.load %arg12[%c1, %c0_42] : memref<40x96xf32, #tpu.memory_space<vmem>>, vector<1x32xf32>
    %66 = vector.broadcast %65 : vector<1x32xf32> to vector<6x32xf32>
    %67 = arith.addf %64, %66 : vector<6x32xf32>
    %68 = arith.mulf %61, %61 : vector<6x32xf32>
    %cst_43 = arith.constant dense<0.000000e+00> : vector<6xf32>
    %69 = vector.multi_reduction <add>, %68, %cst_43 [1] : vector<6x32xf32> to vector<6xf32>
    %70 = vector.shape_cast %69 : vector<6xf32> to vector<6x1xf32>
    %cst_44 = arith.constant 3.200000e+01 : f32
    %71 = vector.broadcast %cst_44 : f32 to vector<6x1xf32>
    %72 = arith.divf %70, %71 : vector<6x1xf32>
    %cst_45 = arith.constant 9.99999997E-7 : f32
    %73 = vector.broadcast %cst_45 : f32 to vector<6x1xf32>
    %74 = arith.addf %72, %73 : vector<6x1xf32>
    %75 = math.rsqrt %74 : vector<6x1xf32>
    %76 = vector.broadcast %75 : vector<6x1xf32> to vector<6x32xf32>
    %77 = arith.mulf %61, %76 : vector<6x32xf32>
    %78 = vector.broadcast %55 : vector<1x32xf32> to vector<6x32xf32>
    %79 = arith.mulf %77, %78 : vector<6x32xf32>
    %80 = arith.mulf %67, %67 : vector<6x32xf32>
    %cst_46 = arith.constant dense<0.000000e+00> : vector<6xf32>
    %81 = vector.multi_reduction <add>, %80, %cst_46 [1] : vector<6x32xf32> to vector<6xf32>
    %82 = vector.shape_cast %81 : vector<6xf32> to vector<6x1xf32>
    %cst_47 = arith.constant 3.200000e+01 : f32
    %83 = vector.broadcast %cst_47 : f32 to vector<6x1xf32>
    %84 = arith.divf %82, %83 : vector<6x1xf32>
    %cst_48 = arith.constant 9.99999997E-7 : f32
    %85 = vector.broadcast %cst_48 : f32 to vector<6x1xf32>
    %86 = arith.addf %84, %85 : vector<6x1xf32>
    %87 = math.rsqrt %86 : vector<6x1xf32>
    %88 = vector.broadcast %87 : vector<6x1xf32> to vector<6x32xf32>
    %89 = arith.mulf %67, %88 : vector<6x32xf32>
    %90 = vector.broadcast %55 : vector<1x32xf32> to vector<6x32xf32>
    %91 = arith.mulf %89, %90 : vector<6x32xf32>
    %92 = arith.addf %79, %91 : vector<6x32xf32>
    %93 = arith.addf %92, %50 : vector<6x32xf32>
    %c14_49 = arith.constant 14 : index
    %c0_50 = arith.constant 0 : index
    %94 = vector.load %arg14[%c14_49, %c0_50] : memref<20x32xf32, #tpu.memory_space<vmem>>, vector<6x32xf32>
    tpu.vector_store %arg14[%c14_49, %c0_50], %93 {strides = array<i32>} : memref<20x32xf32, #tpu.memory_space<vmem>>, vector<6x32xf32>,
    %c0_51 = arith.constant 0 : index
    %c0_52 = arith.constant 0 : index
    %95 = vector.load %arg14[%c0_51, %c0_52] : memref<20x32xf32, #tpu.memory_space<vmem>>, vector<20x32xf32>
    %c0_53 = arith.constant 0 : index
    %c0_54 = arith.constant 0 : index
    %c0_55 = arith.constant 0 : index
    %96 = vector.load %arg7[%c0_53, %c0_54, %c0_55] : memref<1x1x20xf32, #tpu.memory_space<vmem>>, vector<1x1x20xf32>
    %97 = vector.shape_cast %96 : vector<1x1x20xf32> to vector<1x20xf32>
    %cst_56 = arith.constant 1.000000e+00 : f32
    %98 = vector.broadcast %cst_56 : f32 to vector<1x20xf32>
    %99 = arith.subf %98, %97 : vector<1x20xf32>
    %cst_57 = arith.constant -1.000000e+09 : f32
    %100 = vector.broadcast %cst_57 : f32 to vector<1x20xf32>
    %101 = arith.mulf %99, %100 : vector<1x20xf32>
    %c0_58 = arith.constant 0 : index
    %c0_59 = arith.constant 0 : index
    %c0_60 = arith.constant 0 : index
    %102 = vector.load %arg9[%c0_58, %c0_59, %c0_60] : memref<4x20x20xf32, #tpu.memory_space<vmem>>, vector<4x20x20xf32>
    %103 = vector.shape_cast %101 : vector<1x20xf32> to vector<1x1x20xf32>
    %104 = vector.broadcast %103 : vector<1x1x20xf32> to vector<4x20x20xf32>
    %105 = arith.addf %102, %104 : vector<4x20x20xf32>
    %c6 = arith.constant 6 : index
    %c0_61 = arith.constant 0 : index
    %106 = vector.load %arg12[%c6, %c0_61] : memref<40x96xf32, #tpu.memory_space<vmem>>, vector<1x32xf32>
    %107 = arith.mulf %95, %95 : vector<20x32xf32>
    %cst_62 = arith.constant dense<0.000000e+00> : vector<20xf32>
    %108 = vector.multi_reduction <add>, %107, %cst_62 [1] : vector<20x32xf32> to vector<20xf32>
    %109 = vector.shape_cast %108 : vector<20xf32> to vector<20x1xf32>
    %cst_63 = arith.constant 3.200000e+01 : f32
    %110 = vector.broadcast %cst_63 : f32 to vector<20x1xf32>
    %111 = arith.divf %109, %110 : vector<20x1xf32>
    %cst_64 = arith.constant 9.99999997E-7 : f32
    %112 = vector.broadcast %cst_64 : f32 to vector<20x1xf32>
    %113 = arith.addf %111, %112 : vector<20x1xf32>
    %114 = math.rsqrt %113 : vector<20x1xf32>
    %115 = vector.broadcast %114 : vector<20x1xf32> to vector<20x32xf32>
    %116 = arith.mulf %95, %115 : vector<20x32xf32>
    %117 = vector.broadcast %106 : vector<1x32xf32> to vector<20x32xf32>
    %118 = arith.mulf %116, %117 : vector<20x32xf32>
    %119 = arith.truncf %118 : vector<20x32xf32> to vector<20x32xbf16>
    %c128 = arith.constant 128 : index
    %c0_65 = arith.constant 0 : index
    %120 = vector.load %arg11[%c128, %c0_65] : memref<992x96xbf16, #tpu.memory_space<vmem>>, vector<32x96xbf16>
    %cst_66 = arith.constant dense<0.000000e+00> : vector<20x96xf32>
    %121 = tpu.matmul %119, %120, %cst_66 {dimension_numbers = #tpu.dot_dimension_numbers<[1], [0], [0], [1], [0, 0, 1, 1], [], []>} : vector<20x32xbf16>, vector<32x96xbf16>, vector<20x96xf32> -> vector<20x96xf32>
    %122 = vector.extract_strided_slice %121 {offsets = [0, 0], sizes = [20, 32], strides = [1, 1]} : vector<20x96xf32> to vector<20x32xf32>
    %123 = vector.extract_strided_slice %121 {offsets = [0, 32], sizes = [20, 32], strides = [1, 1]} : vector<20x96xf32> to vector<20x32xf32>
    %124 = vector.extract_strided_slice %121 {offsets = [0, 64], sizes = [20, 32], strides = [1, 1]} : vector<20x96xf32> to vector<20x32xf32>
    %125 = vector.extract_strided_slice %122 {offsets = [0, 0], sizes = [20, 8], strides = [1, 1]} : vector<20x32xf32> to vector<20x8xf32>
    %126 = vector.extract_strided_slice %122 {offsets = [0, 8], sizes = [20, 8], strides = [1, 1]} : vector<20x32xf32> to vector<20x8xf32>
    %127 = vector.extract_strided_slice %122 {offsets = [0, 16], sizes = [20, 8], strides = [1, 1]} : vector<20x32xf32> to vector<20x8xf32>
    %128 = vector.extract_strided_slice %122 {offsets = [0, 24], sizes = [20, 8], strides = [1, 1]} : vector<20x32xf32> to vector<20x8xf32>
    %129 = vector.shape_cast %125 : vector<20x8xf32> to vector<1x20x8xf32>
    %130 = vector.shape_cast %126 : vector<20x8xf32> to vector<1x20x8xf32>
    %131 = vector.shape_cast %127 : vector<20x8xf32> to vector<1x20x8xf32>
    %132 = vector.shape_cast %128 : vector<20x8xf32> to vector<1x20x8xf32>
    %133 = tpu.concatenate %129, %130, %131, %132 in 0 : vector<1x20x8xf32>, vector<1x20x8xf32>, vector<1x20x8xf32>, vector<1x20x8xf32> -> vector<4x20x8xf32>
    %134 = arith.truncf %133 : vector<4x20x8xf32> to vector<4x20x8xbf16>
    %135 = vector.extract_strided_slice %123 {offsets = [0, 0], sizes = [20, 8], strides = [1, 1]} : vector<20x32xf32> to vector<20x8xf32>
    %136 = vector.extract_strided_slice %123 {offsets = [0, 8], sizes = [20, 8], strides = [1, 1]} : vector<20x32xf32> to vector<20x8xf32>
    %137 = vector.extract_strided_slice %123 {offsets = [0, 16], sizes = [20, 8], strides = [1, 1]} : vector<20x32xf32> to vector<20x8xf32>
    %138 = vector.extract_strided_slice %123 {offsets = [0, 24], sizes = [20, 8], strides = [1, 1]} : vector<20x32xf32> to vector<20x8xf32>
    %139 = vector.shape_cast %135 : vector<20x8xf32> to vector<1x20x8xf32>
    %140 = vector.shape_cast %136 : vector<20x8xf32> to vector<1x20x8xf32>
    %141 = vector.shape_cast %137 : vector<20x8xf32> to vector<1x20x8xf32>
    %142 = vector.shape_cast %138 : vector<20x8xf32> to vector<1x20x8xf32>
    %143 = tpu.concatenate %139, %140, %141, %142 in 0 : vector<1x20x8xf32>, vector<1x20x8xf32>, vector<1x20x8xf32>, vector<1x20x8xf32> -> vector<4x20x8xf32>
    %144 = arith.truncf %143 : vector<4x20x8xf32> to vector<4x20x8xbf16>
    %145 = vector.extract_strided_slice %124 {offsets = [0, 0], sizes = [20, 8], strides = [1, 1]} : vector<20x32xf32> to vector<20x8xf32>
    %146 = vector.extract_strided_slice %124 {offsets = [0, 8], sizes = [20, 8], strides = [1, 1]} : vector<20x32xf32> to vector<20x8xf32>
    %147 = vector.extract_strided_slice %124 {offsets = [0, 16], sizes = [20, 8], strides = [1, 1]} : vector<20x32xf32> to vector<20x8xf32>
    %148 = vector.extract_strided_slice %124 {offsets = [0, 24], sizes = [20, 8], strides = [1, 1]} : vector<20x32xf32> to vector<20x8xf32>
    %149 = vector.shape_cast %145 : vector<20x8xf32> to vector<1x20x8xf32>
    %150 = vector.shape_cast %146 : vector<20x8xf32> to vector<1x20x8xf32>
    %151 = vector.shape_cast %147 : vector<20x8xf32> to vector<1x20x8xf32>
    %152 = vector.shape_cast %148 : vector<20x8xf32> to vector<1x20x8xf32>
    %153 = tpu.concatenate %149, %150, %151, %152 in 0 : vector<1x20x8xf32>, vector<1x20x8xf32>, vector<1x20x8xf32>, vector<1x20x8xf32> -> vector<4x20x8xf32>
    %154 = arith.truncf %153 : vector<4x20x8xf32> to vector<4x20x8xbf16>
    "tpu.trace_start"() <{level = 10 : i32, message = "hqd,hkd->hqk"}> : () -> ()
    %cst_67 = arith.constant dense<0.000000e+00> : vector<4x20x20xf32>
    %155 = tpu.matmul %134, %144, %cst_67 {dimension_numbers = #tpu.dot_dimension_numbers<[2], [2], [1], [1], [0, 0, 0, 1, 1, 1], [0], [0]>} : vector<4x20x8xbf16>, vector<4x20x8xbf16>, vector<4x20x20xf32> -> vector<4x20x20xf32>
    "tpu.trace_stop"() : () -> ()
    %cst_68 = arith.constant 1.000000e+00 : f32
    %156 = vector.broadcast %cst_68 : f32 to vector<4x20x20xf32>
    %157 = arith.mulf %155, %156 : vector<4x20x20xf32>
    %158 = arith.addf %157, %105 : vector<4x20x20xf32>
    %cst_69 = arith.constant dense<0xFF800000> : vector<4x20xf32>
    %159 = vector.multi_reduction <maximumf>, %158, %cst_69 [2] : vector<4x20x20xf32> to vector<4x20xf32>
    %160 = vector.shape_cast %159 : vector<4x20xf32> to vector<4x20x1xf32>
    %161 = vector.broadcast %160 : vector<4x20x1xf32> to vector<4x20x20xf32>
    %162 = arith.subf %158, %161 : vector<4x20x20xf32>
    %163 = math.exp %162 : vector<4x20x20xf32>
    %cst_70 = arith.constant dense<0.000000e+00> : vector<4x20xf32>
    %164 = vector.multi_reduction <add>, %163, %cst_70 [2] : vector<4x20x20xf32> to vector<4x20xf32>
    %165 = vector.shape_cast %164 : vector<4x20xf32> to vector<4x20x1xf32>
    %166 = tpu.reciprocal %165 {approx = true} : vector<4x20x1xf32> -> vector<4x20x1xf32>
    %167 = vector.broadcast %166 : vector<4x20x1xf32> to vector<4x20x20xf32>
    %168 = arith.mulf %163, %167 : vector<4x20x20xf32>
    %169 = arith.truncf %168 : vector<4x20x20xf32> to vector<4x20x20xbf16>
    "tpu.trace_start"() <{level = 10 : i32, message = "hqk,hkd->hqd"}> : () -> ()
    %cst_71 = arith.constant dense<0.000000e+00> : vector<4x20x8xf32>
    %170 = tpu.matmul %169, %154, %cst_71 {dimension_numbers = #tpu.dot_dimension_numbers<[2], [1], [1], [2], [0, 0, 0, 1, 1, 2], [0], [0]>} : vector<4x20x20xbf16>, vector<4x20x8xbf16>, vector<4x20x8xf32> -> vector<4x20x8xf32>
    "tpu.trace_stop"() : () -> ()
    %171 = vector.extract_strided_slice %170 {offsets = [0, 0, 0], sizes = [1, 20, 8], strides = [1, 1, 1]} : vector<4x20x8xf32> to vector<1x20x8xf32>
    %172 = vector.shape_cast %171 : vector<1x20x8xf32> to vector<20x8xf32>
    %173 = vector.extract_strided_slice %170 {offsets = [1, 0, 0], sizes = [1, 20, 8], strides = [1, 1, 1]} : vector<4x20x8xf32> to vector<1x20x8xf32>
    %174 = vector.shape_cast %173 : vector<1x20x8xf32> to vector<20x8xf32>
    %175 = vector.extract_strided_slice %170 {offsets = [2, 0, 0], sizes = [1, 20, 8], strides = [1, 1, 1]} : vector<4x20x8xf32> to vector<1x20x8xf32>
    %176 = vector.shape_cast %175 : vector<1x20x8xf32> to vector<20x8xf32>
    %177 = vector.extract_strided_slice %170 {offsets = [3, 0, 0], sizes = [1, 20, 8], strides = [1, 1, 1]} : vector<4x20x8xf32> to vector<1x20x8xf32>
    %178 = vector.shape_cast %177 : vector<1x20x8xf32> to vector<20x8xf32>
    %179 = tpu.concatenate %172, %174, %176, %178 in 1 : vector<20x8xf32>, vector<20x8xf32>, vector<20x8xf32>, vector<20x8xf32> -> vector<20x32xf32>
    %180 = arith.truncf %179 : vector<20x32xf32> to vector<20x32xbf16>
    %c160 = arith.constant 160 : index
    %c0_72 = arith.constant 0 : index
    %181 = vector.load %arg11[%c160, %c0_72] : memref<992x96xbf16, #tpu.memory_space<vmem>>, vector<32x32xbf16>
    %cst_73 = arith.constant dense<0.000000e+00> : vector<20x32xf32>
    %182 = tpu.matmul %180, %181, %cst_73 {dimension_numbers = #tpu.dot_dimension_numbers<[1], [0], [0], [1], [0, 0, 1, 1], [], []>} : vector<20x32xbf16>, vector<32x32xbf16>, vector<20x32xf32> -> vector<20x32xf32>
    %183 = arith.addf %95, %182 : vector<20x32xf32>
    %c7 = arith.constant 7 : index
    %c0_74 = arith.constant 0 : index
    %184 = vector.load %arg12[%c7, %c0_74] : memref<40x96xf32, #tpu.memory_space<vmem>>, vector<1x32xf32>
    %185 = arith.mulf %183, %183 : vector<20x32xf32>
    %cst_75 = arith.constant dense<0.000000e+00> : vector<20xf32>
    %186 = vector.multi_reduction <add>, %185, %cst_75 [1] : vector<20x32xf32> to vector<20xf32>
    %187 = vector.shape_cast %186 : vector<20xf32> to vector<20x1xf32>
    %cst_76 = arith.constant 3.200000e+01 : f32
    %188 = vector.broadcast %cst_76 : f32 to vector<20x1xf32>
    %189 = arith.divf %187, %188 : vector<20x1xf32>
    %cst_77 = arith.constant 9.99999997E-7 : f32
    %190 = vector.broadcast %cst_77 : f32 to vector<20x1xf32>
    %191 = arith.addf %189, %190 : vector<20x1xf32>
    %192 = math.rsqrt %191 : vector<20x1xf32>
    %193 = vector.broadcast %192 : vector<20x1xf32> to vector<20x32xf32>
    %194 = arith.mulf %183, %193 : vector<20x32xf32>
    %195 = vector.broadcast %184 : vector<1x32xf32> to vector<20x32xf32>
    %196 = arith.mulf %194, %195 : vector<20x32xf32>
    %197 = arith.truncf %196 : vector<20x32xf32> to vector<20x32xbf16>
    %c192 = arith.constant 192 : index
    %c0_78 = arith.constant 0 : index
    %198 = vector.load %arg11[%c192, %c0_78] : memref<992x96xbf16, #tpu.memory_space<vmem>>, vector<32x64xbf16>
    %cst_79 = arith.constant dense<0.000000e+00> : vector<20x64xf32>
    %199 = tpu.matmul %197, %198, %cst_79 {dimension_numbers = #tpu.dot_dimension_numbers<[1], [0], [0], [1], [0, 0, 1, 1], [], []>} : vector<20x32xbf16>, vector<32x64xbf16>, vector<20x64xf32> -> vector<20x64xf32>
    %cst_80 = arith.constant 0.000000e+00 : f32
    %200 = vector.broadcast %cst_80 : f32 to vector<20x64xf32>
    %201 = arith.maximumf %199, %200 : vector<20x64xf32>
    %202 = arith.truncf %201 : vector<20x64xf32> to vector<20x64xbf16>
    %c224 = arith.constant 224 : index
    %c0_81 = arith.constant 0 : index
    %203 = vector.load %arg11[%c224, %c0_81] : memref<992x96xbf16, #tpu.memory_space<vmem>>, vector<64x32xbf16>
    %cst_82 = arith.constant dense<0.000000e+00> : vector<20x32xf32>
    %204 = tpu.matmul %202, %203, %cst_82 {dimension_numbers = #tpu.dot_dimension_numbers<[1], [0], [0], [1], [0, 0, 1, 1], [], []>} : vector<20x64xbf16>, vector<64x32xbf16>, vector<20x32xf32> -> vector<20x32xf32>
    %205 = arith.addf %183, %204 : vector<20x32xf32>
    %c8_83 = arith.constant 8 : index
    %c0_84 = arith.constant 0 : index
    %206 = vector.load %arg12[%c8_83, %c0_84] : memref<40x96xf32, #tpu.memory_space<vmem>>, vector<1x32xf32>
    %207 = arith.mulf %205, %205 : vector<20x32xf32>
    %cst_85 = arith.constant dense<0.000000e+00> : vector<20xf32>
    %208 = vector.multi_reduction <add>, %207, %cst_85 [1] : vector<20x32xf32> to vector<20xf32>
    %209 = vector.shape_cast %208 : vector<20xf32> to vector<20x1xf32>
    %cst_86 = arith.constant 3.200000e+01 : f32
    %210 = vector.broadcast %cst_86 : f32 to vector<20x1xf32>
    %211 = arith.divf %209, %210 : vector<20x1xf32>
    %cst_87 = arith.constant 9.99999997E-7 : f32
    %212 = vector.broadcast %cst_87 : f32 to vector<20x1xf32>
    %213 = arith.addf %211, %212 : vector<20x1xf32>
    %214 = math.rsqrt %213 : vector<20x1xf32>
    %215 = vector.broadcast %214 : vector<20x1xf32> to vector<20x32xf32>
    %216 = arith.mulf %205, %215 : vector<20x32xf32>
    %217 = vector.broadcast %206 : vector<1x32xf32> to vector<20x32xf32>
    %218 = arith.mulf %216, %217 : vector<20x32xf32>
    %219 = arith.truncf %218 : vector<20x32xf32> to vector<20x32xbf16>
    %c288 = arith.constant 288 : index
    %c0_88 = arith.constant 0 : index
    %220 = vector.load %arg11[%c288, %c0_88] : memref<992x96xbf16, #tpu.memory_space<vmem>>, vector<32x96xbf16>
    %cst_89 = arith.constant dense<0.000000e+00> : vector<20x96xf32>
    %221 = tpu.matmul %219, %220, %cst_89 {dimension_numbers = #tpu.dot_dimension_numbers<[1], [0], [0], [1], [0, 0, 1, 1], [], []>} : vector<20x32xbf16>, vector<32x96xbf16>, vector<20x96xf32> -> vector<20x96xf32>
    %222 = vector.extract_strided_slice %221 {offsets = [0, 0], sizes = [20, 32], strides = [1, 1]} : vector<20x96xf32> to vector<20x32xf32>
    %223 = vector.extract_strided_slice %221 {offsets = [0, 32], sizes = [20, 32], strides = [1, 1]} : vector<20x96xf32> to vector<20x32xf32>
    %224 = vector.extract_strided_slice %221 {offsets = [0, 64], sizes = [20, 32], strides = [1, 1]} : vector<20x96xf32> to vector<20x32xf32>
    %225 = vector.extract_strided_slice %222 {offsets = [0, 0], sizes = [20, 8], strides = [1, 1]} : vector<20x32xf32> to vector<20x8xf32>
    %226 = vector.extract_strided_slice %222 {offsets = [0, 8], sizes = [20, 8], strides = [1, 1]} : vector<20x32xf32> to vector<20x8xf32>
    %227 = vector.extract_strided_slice %222 {offsets = [0, 16], sizes = [20, 8], strides = [1, 1]} : vector<20x32xf32> to vector<20x8xf32>
    %228 = vector.extract_strided_slice %222 {offsets = [0, 24], sizes = [20, 8], strides = [1, 1]} : vector<20x32xf32> to vector<20x8xf32>
    %229 = vector.shape_cast %225 : vector<20x8xf32> to vector<1x20x8xf32>
    %230 = vector.shape_cast %226 : vector<20x8xf32> to vector<1x20x8xf32>
    %231 = vector.shape_cast %227 : vector<20x8xf32> to vector<1x20x8xf32>
    %232 = vector.shape_cast %228 : vector<20x8xf32> to vector<1x20x8xf32>
    %233 = tpu.concatenate %229, %230, %231, %232 in 0 : vector<1x20x8xf32>, vector<1x20x8xf32>, vector<1x20x8xf32>, vector<1x20x8xf32> -> vector<4x20x8xf32>
    %234 = arith.truncf %233 : vector<4x20x8xf32> to vector<4x20x8xbf16>
    %235 = vector.extract_strided_slice %223 {offsets = [0, 0], sizes = [20, 8], strides = [1, 1]} : vector<20x32xf32> to vector<20x8xf32>
    %236 = vector.extract_strided_slice %223 {offsets = [0, 8], sizes = [20, 8], strides = [1, 1]} : vector<20x32xf32> to vector<20x8xf32>
    %237 = vector.extract_strided_slice %223 {offsets = [0, 16], sizes = [20, 8], strides = [1, 1]} : vector<20x32xf32> to vector<20x8xf32>
    %238 = vector.extract_strided_slice %223 {offsets = [0, 24], sizes = [20, 8], strides = [1, 1]} : vector<20x32xf32> to vector<20x8xf32>
    %239 = vector.shape_cast %235 : vector<20x8xf32> to vector<1x20x8xf32>
    %240 = vector.shape_cast %236 : vector<20x8xf32> to vector<1x20x8xf32>
    %241 = vector.shape_cast %237 : vector<20x8xf32> to vector<1x20x8xf32>
    %242 = vector.shape_cast %238 : vector<20x8xf32> to vector<1x20x8xf32>
    %243 = tpu.concatenate %239, %240, %241, %242 in 0 : vector<1x20x8xf32>, vector<1x20x8xf32>, vector<1x20x8xf32>, vector<1x20x8xf32> -> vector<4x20x8xf32>
    %244 = arith.truncf %243 : vector<4x20x8xf32> to vector<4x20x8xbf16>
    %245 = vector.extract_strided_slice %224 {offsets = [0, 0], sizes = [20, 8], strides = [1, 1]} : vector<20x32xf32> to vector<20x8xf32>
    %246 = vector.extract_strided_slice %224 {offsets = [0, 8], sizes = [20, 8], strides = [1, 1]} : vector<20x32xf32> to vector<20x8xf32>
    %247 = vector.extract_strided_slice %224 {offsets = [0, 16], sizes = [20, 8], strides = [1, 1]} : vector<20x32xf32> to vector<20x8xf32>
    %248 = vector.extract_strided_slice %224 {offsets = [0, 24], sizes = [20, 8], strides = [1, 1]} : vector<20x32xf32> to vector<20x8xf32>
    %249 = vector.shape_cast %245 : vector<20x8xf32> to vector<1x20x8xf32>
    %250 = vector.shape_cast %246 : vector<20x8xf32> to vector<1x20x8xf32>
    %251 = vector.shape_cast %247 : vector<20x8xf32> to vector<1x20x8xf32>
    %252 = vector.shape_cast %248 : vector<20x8xf32> to vector<1x20x8xf32>
    %253 = tpu.concatenate %249, %250, %251, %252 in 0 : vector<1x20x8xf32>, vector<1x20x8xf32>, vector<1x20x8xf32>, vector<1x20x8xf32> -> vector<4x20x8xf32>
    %254 = arith.truncf %253 : vector<4x20x8xf32> to vector<4x20x8xbf16>
    "tpu.trace_start"() <{level = 10 : i32, message = "hqd,hkd->hqk"}> : () -> ()
    %cst_90 = arith.constant dense<0.000000e+00> : vector<4x20x20xf32>
    %255 = tpu.matmul %234, %244, %cst_90 {dimension_numbers = #tpu.dot_dimension_numbers<[2], [2], [1], [1], [0, 0, 0, 1, 1, 1], [0], [0]>} : vector<4x20x8xbf16>, vector<4x20x8xbf16>, vector<4x20x20xf32> -> vector<4x20x20xf32>
    "tpu.trace_stop"() : () -> ()
    %cst_91 = arith.constant 1.000000e+00 : f32
    %256 = vector.broadcast %cst_91 : f32 to vector<4x20x20xf32>
    %257 = arith.mulf %255, %256 : vector<4x20x20xf32>
    %258 = arith.addf %257, %105 : vector<4x20x20xf32>
    %cst_92 = arith.constant dense<0xFF800000> : vector<4x20xf32>
    %259 = vector.multi_reduction <maximumf>, %258, %cst_92 [2] : vector<4x20x20xf32> to vector<4x20xf32>
    %260 = vector.shape_cast %259 : vector<4x20xf32> to vector<4x20x1xf32>
    %261 = vector.broadcast %260 : vector<4x20x1xf32> to vector<4x20x20xf32>
    %262 = arith.subf %258, %261 : vector<4x20x20xf32>
    %263 = math.exp %262 : vector<4x20x20xf32>
    %cst_93 = arith.constant dense<0.000000e+00> : vector<4x20xf32>
    %264 = vector.multi_reduction <add>, %263, %cst_93 [2] : vector<4x20x20xf32> to vector<4x20xf32>
    %265 = vector.shape_cast %264 : vector<4x20xf32> to vector<4x20x1xf32>
    %266 = tpu.reciprocal %265 {approx = true} : vector<4x20x1xf32> -> vector<4x20x1xf32>
    %267 = vector.broadcast %266 : vector<4x20x1xf32> to vector<4x20x20xf32>
    %268 = arith.mulf %263, %267 : vector<4x20x20xf32>
    %269 = arith.truncf %268 : vector<4x20x20xf32> to vector<4x20x20xbf16>
    "tpu.trace_start"() <{level = 10 : i32, message = "hqk,hkd->hqd"}> : () -> ()
    %cst_94 = arith.constant dense<0.000000e+00> : vector<4x20x8xf32>
    %270 = tpu.matmul %269, %254, %cst_94 {dimension_numbers = #tpu.dot_dimension_numbers<[2], [1], [1], [2], [0, 0, 0, 1, 1, 2], [0], [0]>} : vector<4x20x20xbf16>, vector<4x20x8xbf16>, vector<4x20x8xf32> -> vector<4x20x8xf32>
    "tpu.trace_stop"() : () -> ()
    %271 = vector.extract_strided_slice %270 {offsets = [0, 0, 0], sizes = [1, 20, 8], strides = [1, 1, 1]} : vector<4x20x8xf32> to vector<1x20x8xf32>
    %272 = vector.shape_cast %271 : vector<1x20x8xf32> to vector<20x8xf32>
    %273 = vector.extract_strided_slice %270 {offsets = [1, 0, 0], sizes = [1, 20, 8], strides = [1, 1, 1]} : vector<4x20x8xf32> to vector<1x20x8xf32>
    %274 = vector.shape_cast %273 : vector<1x20x8xf32> to vector<20x8xf32>
    %275 = vector.extract_strided_slice %270 {offsets = [2, 0, 0], sizes = [1, 20, 8], strides = [1, 1, 1]} : vector<4x20x8xf32> to vector<1x20x8xf32>
    %276 = vector.shape_cast %275 : vector<1x20x8xf32> to vector<20x8xf32>
    %277 = vector.extract_strided_slice %270 {offsets = [3, 0, 0], sizes = [1, 20, 8], strides = [1, 1, 1]} : vector<4x20x8xf32> to vector<1x20x8xf32>
    %278 = vector.shape_cast %277 : vector<1x20x8xf32> to vector<20x8xf32>
    %279 = tpu.concatenate %272, %274, %276, %278 in 1 : vector<20x8xf32>, vector<20x8xf32>, vector<20x8xf32>, vector<20x8xf32> -> vector<20x32xf32>
    %280 = arith.truncf %279 : vector<20x32xf32> to vector<20x32xbf16>
    %c320 = arith.constant 320 : index
    %c0_95 = arith.constant 0 : index
    %281 = vector.load %arg11[%c320, %c0_95] : memref<992x96xbf16, #tpu.memory_space<vmem>>, vector<32x32xbf16>
    %cst_96 = arith.constant dense<0.000000e+00> : vector<20x32xf32>
    %282 = tpu.matmul %280, %281, %cst_96 {dimension_numbers = #tpu.dot_dimension_numbers<[1], [0], [0], [1], [0, 0, 1, 1], [], []>} : vector<20x32xbf16>, vector<32x32xbf16>, vector<20x32xf32> -> vector<20x32xf32>
    %283 = arith.addf %205, %282 : vector<20x32xf32>
    %c9 = arith.constant 9 : index
    %c0_97 = arith.constant 0 : index
    %284 = vector.load %arg12[%c9, %c0_97] : memref<40x96xf32, #tpu.memory_space<vmem>>, vector<1x32xf32>
    %285 = arith.mulf %283, %283 : vector<20x32xf32>
    %cst_98 = arith.constant dense<0.000000e+00> : vector<20xf32>
    %286 = vector.multi_reduction <add>, %285, %cst_98 [1] : vector<20x32xf32> to vector<20xf32>
    %287 = vector.shape_cast %286 : vector<20xf32> to vector<20x1xf32>
    %cst_99 = arith.constant 3.200000e+01 : f32
    %288 = vector.broadcast %cst_99 : f32 to vector<20x1xf32>
    %289 = arith.divf %287, %288 : vector<20x1xf32>
    %cst_100 = arith.constant 9.99999997E-7 : f32
    %290 = vector.broadcast %cst_100 : f32 to vector<20x1xf32>
    %291 = arith.addf %289, %290 : vector<20x1xf32>
    %292 = math.rsqrt %291 : vector<20x1xf32>
    %293 = vector.broadcast %292 : vector<20x1xf32> to vector<20x32xf32>
    %294 = arith.mulf %283, %293 : vector<20x32xf32>
    %295 = vector.broadcast %284 : vector<1x32xf32> to vector<20x32xf32>
    %296 = arith.mulf %294, %295 : vector<20x32xf32>
    %297 = arith.truncf %296 : vector<20x32xf32> to vector<20x32xbf16>
    %c352 = arith.constant 352 : index
    %c0_101 = arith.constant 0 : index
    %298 = vector.load %arg11[%c352, %c0_101] : memref<992x96xbf16, #tpu.memory_space<vmem>>, vector<32x64xbf16>
    %cst_102 = arith.constant dense<0.000000e+00> : vector<20x64xf32>
    %299 = tpu.matmul %297, %298, %cst_102 {dimension_numbers = #tpu.dot_dimension_numbers<[1], [0], [0], [1], [0, 0, 1, 1], [], []>} : vector<20x32xbf16>, vector<32x64xbf16>, vector<20x64xf32> -> vector<20x64xf32>
    %cst_103 = arith.constant 0.000000e+00 : f32
    %300 = vector.broadcast %cst_103 : f32 to vector<20x64xf32>
    %301 = arith.maximumf %299, %300 : vector<20x64xf32>
    %302 = arith.truncf %301 : vector<20x64xf32> to vector<20x64xbf16>
    %c384 = arith.constant 384 : index
    %c0_104 = arith.constant 0 : index
    %303 = vector.load %arg11[%c384, %c0_104] : memref<992x96xbf16, #tpu.memory_space<vmem>>, vector<64x32xbf16>
    %cst_105 = arith.constant dense<0.000000e+00> : vector<20x32xf32>
    %304 = tpu.matmul %302, %303, %cst_105 {dimension_numbers = #tpu.dot_dimension_numbers<[1], [0], [0], [1], [0, 0, 1, 1], [], []>} : vector<20x64xbf16>, vector<64x32xbf16>, vector<20x32xf32> -> vector<20x32xf32>
    %305 = arith.addf %283, %304 : vector<20x32xf32>
    %c10 = arith.constant 10 : index
    %c0_106 = arith.constant 0 : index
    %306 = vector.load %arg12[%c10, %c0_106] : memref<40x96xf32, #tpu.memory_space<vmem>>, vector<1x32xf32>
    %307 = arith.mulf %305, %305 : vector<20x32xf32>
    %cst_107 = arith.constant dense<0.000000e+00> : vector<20xf32>
    %308 = vector.multi_reduction <add>, %307, %cst_107 [1] : vector<20x32xf32> to vector<20xf32>
    %309 = vector.shape_cast %308 : vector<20xf32> to vector<20x1xf32>
    %cst_108 = arith.constant 3.200000e+01 : f32
    %310 = vector.broadcast %cst_108 : f32 to vector<20x1xf32>
    %311 = arith.divf %309, %310 : vector<20x1xf32>
    %cst_109 = arith.constant 9.99999997E-7 : f32
    %312 = vector.broadcast %cst_109 : f32 to vector<20x1xf32>
    %313 = arith.addf %311, %312 : vector<20x1xf32>
    %314 = math.rsqrt %313 : vector<20x1xf32>
    %315 = vector.broadcast %314 : vector<20x1xf32> to vector<20x32xf32>
    %316 = arith.mulf %305, %315 : vector<20x32xf32>
    %317 = vector.broadcast %306 : vector<1x32xf32> to vector<20x32xf32>
    %318 = arith.mulf %316, %317 : vector<20x32xf32>
    %c0_110 = arith.constant 0 : index
    %c0_111 = arith.constant 0 : index
    %319 = vector.load %arg10[%c0_110, %c0_111] : memref<8x8xf32, #tpu.memory_space<vmem>>, vector<8x8xf32>
    %c0_112 = arith.constant 0 : index
    %c0_113 = arith.constant 0 : index
    %c0_114 = arith.constant 0 : index
    %320 = vector.load %arg8[%c0_112, %c0_113, %c0_114] : memref<1x1x8xf32, #tpu.memory_space<vmem>>, vector<1x1x8xf32>
    %321 = vector.shape_cast %320 : vector<1x1x8xf32> to vector<1x8xf32>
    %cst_115 = arith.constant 1.000000e+00 : f32
    %322 = vector.broadcast %cst_115 : f32 to vector<1x8xf32>
    %323 = arith.subf %322, %321 : vector<1x8xf32>
    %cst_116 = arith.constant -1.000000e+09 : f32
    %324 = vector.broadcast %cst_116 : f32 to vector<1x8xf32>
    %325 = arith.mulf %323, %324 : vector<1x8xf32>
    %326 = vector.broadcast %325 : vector<1x8xf32> to vector<8x8xf32>
    %327 = arith.addf %319, %326 : vector<8x8xf32>
    %c0_117 = arith.constant 0 : index
    %c0_118 = arith.constant 0 : index
    %c0_119 = arith.constant 0 : index
    %328 = vector.load %arg6[%c0_117, %c0_118, %c0_119] : memref<1x8x32xf32, #tpu.memory_space<vmem>>, vector<1x8x32xf32>
    %329 = vector.shape_cast %328 : vector<1x8x32xf32> to vector<8x32xf32>
    %330 = arith.truncf %329 : vector<8x32xf32> to vector<8x32xbf16>
    %c448 = arith.constant 448 : index
    %c0_120 = arith.constant 0 : index
    %331 = vector.load %arg11[%c448, %c0_120] : memref<992x96xbf16, #tpu.memory_space<vmem>>, vector<32x96xbf16>
    %cst_121 = arith.constant dense<0.000000e+00> : vector<8x96xf32>
    %332 = tpu.matmul %330, %331, %cst_121 {dimension_numbers = #tpu.dot_dimension_numbers<[1], [0], [0], [1], [0, 0, 1, 1], [], []>} : vector<8x32xbf16>, vector<32x96xbf16>, vector<8x96xf32> -> vector<8x96xf32>
    %c11 = arith.constant 11 : index
    %c0_122 = arith.constant 0 : index
    %333 = vector.load %arg12[%c11, %c0_122] : memref<40x96xf32, #tpu.memory_space<vmem>>, vector<1x96xf32>
    %334 = vector.broadcast %333 : vector<1x96xf32> to vector<8x96xf32>
    %335 = arith.addf %332, %334 : vector<8x96xf32>
    %336 = vector.extract_strided_slice %335 {offsets = [0, 0], sizes = [8, 32], strides = [1, 1]} : vector<8x96xf32> to vector<8x32xf32>
    %337 = vector.extract_strided_slice %335 {offsets = [0, 32], sizes = [8, 32], strides = [1, 1]} : vector<8x96xf32> to vector<8x32xf32>
    %338 = vector.extract_strided_slice %335 {offsets = [0, 64], sizes = [8, 32], strides = [1, 1]} : vector<8x96xf32> to vector<8x32xf32>
    %339 = vector.extract_strided_slice %336 {offsets = [0, 0], sizes = [8, 8], strides = [1, 1]} : vector<8x32xf32> to vector<8x8xf32>
    %340 = vector.extract_strided_slice %336 {offsets = [0, 8], sizes = [8, 8], strides = [1, 1]} : vector<8x32xf32> to vector<8x8xf32>
    %341 = vector.extract_strided_slice %336 {offsets = [0, 16], sizes = [8, 8], strides = [1, 1]} : vector<8x32xf32> to vector<8x8xf32>
    %342 = vector.extract_strided_slice %336 {offsets = [0, 24], sizes = [8, 8], strides = [1, 1]} : vector<8x32xf32> to vector<8x8xf32>
    %343 = vector.shape_cast %339 : vector<8x8xf32> to vector<1x8x8xf32>
    %344 = vector.shape_cast %340 : vector<8x8xf32> to vector<1x8x8xf32>
    %345 = vector.shape_cast %341 : vector<8x8xf32> to vector<1x8x8xf32>
    %346 = vector.shape_cast %342 : vector<8x8xf32> to vector<1x8x8xf32>
    %347 = tpu.concatenate %343, %344, %345, %346 in 0 : vector<1x8x8xf32>, vector<1x8x8xf32>, vector<1x8x8xf32>, vector<1x8x8xf32> -> vector<4x8x8xf32>
    %348 = arith.truncf %347 : vector<4x8x8xf32> to vector<4x8x8xbf16>
    %349 = vector.extract_strided_slice %337 {offsets = [0, 0], sizes = [8, 8], strides = [1, 1]} : vector<8x32xf32> to vector<8x8xf32>
    %350 = vector.extract_strided_slice %337 {offsets = [0, 8], sizes = [8, 8], strides = [1, 1]} : vector<8x32xf32> to vector<8x8xf32>
    %351 = vector.extract_strided_slice %337 {offsets = [0, 16], sizes = [8, 8], strides = [1, 1]} : vector<8x32xf32> to vector<8x8xf32>
    %352 = vector.extract_strided_slice %337 {offsets = [0, 24], sizes = [8, 8], strides = [1, 1]} : vector<8x32xf32> to vector<8x8xf32>
    %353 = vector.shape_cast %349 : vector<8x8xf32> to vector<1x8x8xf32>
    %354 = vector.shape_cast %350 : vector<8x8xf32> to vector<1x8x8xf32>
    %355 = vector.shape_cast %351 : vector<8x8xf32> to vector<1x8x8xf32>
    %356 = vector.shape_cast %352 : vector<8x8xf32> to vector<1x8x8xf32>
    %357 = tpu.concatenate %353, %354, %355, %356 in 0 : vector<1x8x8xf32>, vector<1x8x8xf32>, vector<1x8x8xf32>, vector<1x8x8xf32> -> vector<4x8x8xf32>
    %358 = arith.truncf %357 : vector<4x8x8xf32> to vector<4x8x8xbf16>
    %359 = vector.extract_strided_slice %338 {offsets = [0, 0], sizes = [8, 8], strides = [1, 1]} : vector<8x32xf32> to vector<8x8xf32>
    %360 = vector.extract_strided_slice %338 {offsets = [0, 8], sizes = [8, 8], strides = [1, 1]} : vector<8x32xf32> to vector<8x8xf32>
    %361 = vector.extract_strided_slice %338 {offsets = [0, 16], sizes = [8, 8], strides = [1, 1]} : vector<8x32xf32> to vector<8x8xf32>
    %362 = vector.extract_strided_slice %338 {offsets = [0, 24], sizes = [8, 8], strides = [1, 1]} : vector<8x32xf32> to vector<8x8xf32>
    %363 = vector.shape_cast %359 : vector<8x8xf32> to vector<1x8x8xf32>
    %364 = vector.shape_cast %360 : vector<8x8xf32> to vector<1x8x8xf32>
    %365 = vector.shape_cast %361 : vector<8x8xf32> to vector<1x8x8xf32>
    %366 = vector.shape_cast %362 : vector<8x8xf32> to vector<1x8x8xf32>
    %367 = tpu.concatenate %363, %364, %365, %366 in 0 : vector<1x8x8xf32>, vector<1x8x8xf32>, vector<1x8x8xf32>, vector<1x8x8xf32> -> vector<4x8x8xf32>
    %368 = arith.truncf %367 : vector<4x8x8xf32> to vector<4x8x8xbf16>
    "tpu.trace_start"() <{level = 10 : i32, message = "hqd,hkd->hqk"}> : () -> ()
    %cst_123 = arith.constant dense<0.000000e+00> : vector<4x8x8xf32>
    %369 = tpu.matmul %348, %358, %cst_123 {dimension_numbers = #tpu.dot_dimension_numbers<[2], [2], [1], [1], [0, 0, 0, 1, 1, 1], [0], [0]>} : vector<4x8x8xbf16>, vector<4x8x8xbf16>, vector<4x8x8xf32> -> vector<4x8x8xf32>
    "tpu.trace_stop"() : () -> ()
    %cst_124 = arith.constant 0.353553385 : f32
    %370 = vector.broadcast %cst_124 : f32 to vector<4x8x8xf32>
    %371 = arith.mulf %369, %370 : vector<4x8x8xf32>
    %372 = vector.shape_cast %327 : vector<8x8xf32> to vector<1x8x8xf32>
    %373 = vector.broadcast %372 : vector<1x8x8xf32> to vector<4x8x8xf32>
    %374 = arith.addf %371, %373 : vector<4x8x8xf32>
    %cst_125 = arith.constant dense<0xFF800000> : vector<4x8xf32>
    %375 = vector.multi_reduction <maximumf>, %374, %cst_125 [2] : vector<4x8x8xf32> to vector<4x8xf32>
    %376 = vector.shape_cast %375 : vector<4x8xf32> to vector<4x8x1xf32>
    %377 = vector.broadcast %376 : vector<4x8x1xf32> to vector<4x8x8xf32>
    %378 = arith.subf %374, %377 : vector<4x8x8xf32>
    %379 = math.exp %378 : vector<4x8x8xf32>
    %cst_126 = arith.constant dense<0.000000e+00> : vector<4x8xf32>
    %380 = vector.multi_reduction <add>, %379, %cst_126 [2] : vector<4x8x8xf32> to vector<4x8xf32>
    %381 = vector.shape_cast %380 : vector<4x8xf32> to vector<4x8x1xf32>
    %382 = tpu.reciprocal %381 {approx = true} : vector<4x8x1xf32> -> vector<4x8x1xf32>
    %383 = vector.broadcast %382 : vector<4x8x1xf32> to vector<4x8x8xf32>
    %384 = arith.mulf %379, %383 : vector<4x8x8xf32>
    %385 = arith.truncf %384 : vector<4x8x8xf32> to vector<4x8x8xbf16>
    "tpu.trace_start"() <{level = 10 : i32, message = "hqk,hkd->hqd"}> : () -> ()
    %cst_127 = arith.constant dense<0.000000e+00> : vector<4x8x8xf32>
    %386 = tpu.matmul %385, %368, %cst_127 {dimension_numbers = #tpu.dot_dimension_numbers<[2], [1], [1], [2], [0, 0, 0, 1, 1, 2], [0], [0]>} : vector<4x8x8xbf16>, vector<4x8x8xbf16>, vector<4x8x8xf32> -> vector<4x8x8xf32>
    "tpu.trace_stop"() : () -> ()
    %387 = vector.extract_strided_slice %386 {offsets = [0, 0, 0], sizes = [1, 8, 8], strides = [1, 1, 1]} : vector<4x8x8xf32> to vector<1x8x8xf32>
    %388 = vector.shape_cast %387 : vector<1x8x8xf32> to vector<8x8xf32>
    %389 = vector.extract_strided_slice %386 {offsets = [1, 0, 0], sizes = [1, 8, 8], strides = [1, 1, 1]} : vector<4x8x8xf32> to vector<1x8x8xf32>
    %390 = vector.shape_cast %389 : vector<1x8x8xf32> to vector<8x8xf32>
    %391 = vector.extract_strided_slice %386 {offsets = [2, 0, 0], sizes = [1, 8, 8], strides = [1, 1, 1]} : vector<4x8x8xf32> to vector<1x8x8xf32>
    %392 = vector.shape_cast %391 : vector<1x8x8xf32> to vector<8x8xf32>
    %393 = vector.extract_strided_slice %386 {offsets = [3, 0, 0], sizes = [1, 8, 8], strides = [1, 1, 1]} : vector<4x8x8xf32> to vector<1x8x8xf32>
    %394 = vector.shape_cast %393 : vector<1x8x8xf32> to vector<8x8xf32>
    %395 = tpu.concatenate %388, %390, %392, %394 in 1 : vector<8x8xf32>, vector<8x8xf32>, vector<8x8xf32>, vector<8x8xf32> -> vector<8x32xf32>
    %396 = arith.truncf %395 : vector<8x32xf32> to vector<8x32xbf16>
    %c480 = arith.constant 480 : index
    %c0_128 = arith.constant 0 : index
    %397 = vector.load %arg11[%c480, %c0_128] : memref<992x96xbf16, #tpu.memory_space<vmem>>, vector<32x32xbf16>
    %cst_129 = arith.constant dense<0.000000e+00> : vector<8x32xf32>
    %398 = tpu.matmul %396, %397, %cst_129 {dimension_numbers = #tpu.dot_dimension_numbers<[1], [0], [0], [1], [0, 0, 1, 1], [], []>} : vector<8x32xbf16>, vector<32x32xbf16>, vector<8x32xf32> -> vector<8x32xf32>
    %399 = arith.addf %329, %398 : vector<8x32xf32>
    %c12 = arith.constant 12 : index
    %c0_130 = arith.constant 0 : index
    %400 = vector.load %arg12[%c12, %c0_130] : memref<40x96xf32, #tpu.memory_space<vmem>>, vector<1x32xf32>
    %401 = vector.broadcast %400 : vector<1x32xf32> to vector<8x32xf32>
    %402 = arith.addf %399, %401 : vector<8x32xf32>
    %c13 = arith.constant 13 : index
    %c0_131 = arith.constant 0 : index
    %403 = vector.load %arg12[%c13, %c0_131] : memref<40x96xf32, #tpu.memory_space<vmem>>, vector<1x32xf32>
    %c14_132 = arith.constant 14 : index
    %c0_133 = arith.constant 0 : index
    %404 = vector.load %arg12[%c14_132, %c0_133] : memref<40x96xf32, #tpu.memory_space<vmem>>, vector<1x32xf32>
    %cst_134 = arith.constant dense<0.000000e+00> : vector<8xf32>
    %405 = vector.multi_reduction <add>, %402, %cst_134 [1] : vector<8x32xf32> to vector<8xf32>
    %406 = vector.shape_cast %405 : vector<8xf32> to vector<8x1xf32>
    %cst_135 = arith.constant 3.200000e+01 : f32
    %407 = vector.broadcast %cst_135 : f32 to vector<8x1xf32>
    %408 = arith.divf %406, %407 : vector<8x1xf32>
    %409 = vector.broadcast %408 : vector<8x1xf32> to vector<8x32xf32>
    %410 = arith.subf %402, %409 : vector<8x32xf32>
    %411 = vector.broadcast %408 : vector<8x1xf32> to vector<8x32xf32>
    %412 = arith.subf %402, %411 : vector<8x32xf32>
    %413 = arith.mulf %410, %412 : vector<8x32xf32>
    %cst_136 = arith.constant dense<0.000000e+00> : vector<8xf32>
    %414 = vector.multi_reduction <add>, %413, %cst_136 [1] : vector<8x32xf32> to vector<8xf32>
    %415 = vector.shape_cast %414 : vector<8xf32> to vector<8x1xf32>
    %cst_137 = arith.constant 3.200000e+01 : f32
    %416 = vector.broadcast %cst_137 : f32 to vector<8x1xf32>
    %417 = arith.divf %415, %416 : vector<8x1xf32>
    %418 = vector.broadcast %408 : vector<8x1xf32> to vector<8x32xf32>
    %419 = arith.subf %402, %418 : vector<8x32xf32>
    %cst_138 = arith.constant 9.99999974E-6 : f32
    %420 = vector.broadcast %cst_138 : f32 to vector<8x1xf32>
    %421 = arith.addf %417, %420 : vector<8x1xf32>
    %422 = math.rsqrt %421 : vector<8x1xf32>
    %423 = vector.broadcast %422 : vector<8x1xf32> to vector<8x32xf32>
    %424 = arith.mulf %419, %423 : vector<8x32xf32>
    %425 = vector.broadcast %403 : vector<1x32xf32> to vector<8x32xf32>
    %426 = arith.mulf %424, %425 : vector<8x32xf32>
    %427 = vector.broadcast %404 : vector<1x32xf32> to vector<8x32xf32>
    %428 = arith.addf %426, %427 : vector<8x32xf32>
    %429 = arith.truncf %428 : vector<8x32xf32> to vector<8x32xbf16>
    %c512 = arith.constant 512 : index
    %c0_139 = arith.constant 0 : index
    %430 = vector.load %arg11[%c512, %c0_139] : memref<992x96xbf16, #tpu.memory_space<vmem>>, vector<32x32xbf16>
    %cst_140 = arith.constant dense<0.000000e+00> : vector<8x32xf32>
    %431 = tpu.matmul %429, %430, %cst_140 {dimension_numbers = #tpu.dot_dimension_numbers<[1], [0], [0], [1], [0, 0, 1, 1], [], []>} : vector<8x32xbf16>, vector<32x32xbf16>, vector<8x32xf32> -> vector<8x32xf32>
    %c15 = arith.constant 15 : index
    %c0_141 = arith.constant 0 : index
    %432 = vector.load %arg12[%c15, %c0_141] : memref<40x96xf32, #tpu.memory_space<vmem>>, vector<1x32xf32>
    %433 = vector.broadcast %432 : vector<1x32xf32> to vector<8x32xf32>
    %434 = arith.addf %431, %433 : vector<8x32xf32>
    %435 = arith.truncf %318 : vector<20x32xf32> to vector<20x32xbf16>
    %c544 = arith.constant 544 : index
    %c0_142 = arith.constant 0 : index
    %436 = vector.load %arg11[%c544, %c0_142] : memref<992x96xbf16, #tpu.memory_space<vmem>>, vector<32x64xbf16>
    %cst_143 = arith.constant dense<0.000000e+00> : vector<20x64xf32>
    %437 = tpu.matmul %435, %436, %cst_143 {dimension_numbers = #tpu.dot_dimension_numbers<[1], [0], [0], [1], [0, 0, 1, 1], [], []>} : vector<20x32xbf16>, vector<32x64xbf16>, vector<20x64xf32> -> vector<20x64xf32>
    %c16 = arith.constant 16 : index
    %c0_144 = arith.constant 0 : index
    %438 = vector.load %arg12[%c16, %c0_144] : memref<40x96xf32, #tpu.memory_space<vmem>>, vector<1x64xf32>
    %439 = vector.broadcast %438 : vector<1x64xf32> to vector<20x64xf32>
    %440 = arith.addf %437, %439 : vector<20x64xf32>
    %441 = vector.extract_strided_slice %440 {offsets = [0, 0], sizes = [20, 32], strides = [1, 1]} : vector<20x64xf32> to vector<20x32xf32>
    %442 = vector.extract_strided_slice %440 {offsets = [0, 32], sizes = [20, 32], strides = [1, 1]} : vector<20x64xf32> to vector<20x32xf32>
    %443 = vector.extract_strided_slice %434 {offsets = [0, 0], sizes = [8, 8], strides = [1, 1]} : vector<8x32xf32> to vector<8x8xf32>
    %444 = vector.extract_strided_slice %434 {offsets = [0, 8], sizes = [8, 8], strides = [1, 1]} : vector<8x32xf32> to vector<8x8xf32>
    %445 = vector.extract_strided_slice %434 {offsets = [0, 16], sizes = [8, 8], strides = [1, 1]} : vector<8x32xf32> to vector<8x8xf32>
    %446 = vector.extract_strided_slice %434 {offsets = [0, 24], sizes = [8, 8], strides = [1, 1]} : vector<8x32xf32> to vector<8x8xf32>
    %447 = vector.shape_cast %443 : vector<8x8xf32> to vector<1x8x8xf32>
    %448 = vector.shape_cast %444 : vector<8x8xf32> to vector<1x8x8xf32>
    %449 = vector.shape_cast %445 : vector<8x8xf32> to vector<1x8x8xf32>
    %450 = vector.shape_cast %446 : vector<8x8xf32> to vector<1x8x8xf32>
    %451 = tpu.concatenate %447, %448, %449, %450 in 0 : vector<1x8x8xf32>, vector<1x8x8xf32>, vector<1x8x8xf32>, vector<1x8x8xf32> -> vector<4x8x8xf32>
    %452 = arith.truncf %451 : vector<4x8x8xf32> to vector<4x8x8xbf16>
    %453 = vector.extract_strided_slice %441 {offsets = [0, 0], sizes = [20, 8], strides = [1, 1]} : vector<20x32xf32> to vector<20x8xf32>
    %454 = vector.extract_strided_slice %441 {offsets = [0, 8], sizes = [20, 8], strides = [1, 1]} : vector<20x32xf32> to vector<20x8xf32>
    %455 = vector.extract_strided_slice %441 {offsets = [0, 16], sizes = [20, 8], strides = [1, 1]} : vector<20x32xf32> to vector<20x8xf32>
    %456 = vector.extract_strided_slice %441 {offsets = [0, 24], sizes = [20, 8], strides = [1, 1]} : vector<20x32xf32> to vector<20x8xf32>
    %457 = vector.shape_cast %453 : vector<20x8xf32> to vector<1x20x8xf32>
    %458 = vector.shape_cast %454 : vector<20x8xf32> to vector<1x20x8xf32>
    %459 = vector.shape_cast %455 : vector<20x8xf32> to vector<1x20x8xf32>
    %460 = vector.shape_cast %456 : vector<20x8xf32> to vector<1x20x8xf32>
    %461 = tpu.concatenate %457, %458, %459, %460 in 0 : vector<1x20x8xf32>, vector<1x20x8xf32>, vector<1x20x8xf32>, vector<1x20x8xf32> -> vector<4x20x8xf32>
    %462 = arith.truncf %461 : vector<4x20x8xf32> to vector<4x20x8xbf16>
    %463 = vector.extract_strided_slice %442 {offsets = [0, 0], sizes = [20, 8], strides = [1, 1]} : vector<20x32xf32> to vector<20x8xf32>
    %464 = vector.extract_strided_slice %442 {offsets = [0, 8], sizes = [20, 8], strides = [1, 1]} : vector<20x32xf32> to vector<20x8xf32>
    %465 = vector.extract_strided_slice %442 {offsets = [0, 16], sizes = [20, 8], strides = [1, 1]} : vector<20x32xf32> to vector<20x8xf32>
    %466 = vector.extract_strided_slice %442 {offsets = [0, 24], sizes = [20, 8], strides = [1, 1]} : vector<20x32xf32> to vector<20x8xf32>
    %467 = vector.shape_cast %463 : vector<20x8xf32> to vector<1x20x8xf32>
    %468 = vector.shape_cast %464 : vector<20x8xf32> to vector<1x20x8xf32>
    %469 = vector.shape_cast %465 : vector<20x8xf32> to vector<1x20x8xf32>
    %470 = vector.shape_cast %466 : vector<20x8xf32> to vector<1x20x8xf32>
    %471 = tpu.concatenate %467, %468, %469, %470 in 0 : vector<1x20x8xf32>, vector<1x20x8xf32>, vector<1x20x8xf32>, vector<1x20x8xf32> -> vector<4x20x8xf32>
    %472 = arith.truncf %471 : vector<4x20x8xf32> to vector<4x20x8xbf16>
    "tpu.trace_start"() <{level = 10 : i32, message = "hqd,hkd->hqk"}> : () -> ()
    %cst_145 = arith.constant dense<0.000000e+00> : vector<4x8x20xf32>
    %473 = tpu.matmul %452, %462, %cst_145 {dimension_numbers = #tpu.dot_dimension_numbers<[2], [2], [1], [1], [0, 0, 0, 1, 1, 1], [0], [0]>} : vector<4x8x8xbf16>, vector<4x20x8xbf16>, vector<4x8x20xf32> -> vector<4x8x20xf32>
    "tpu.trace_stop"() : () -> ()
    %cst_146 = arith.constant 0.353553385 : f32
    %474 = vector.broadcast %cst_146 : f32 to vector<4x8x20xf32>
    %475 = arith.mulf %473, %474 : vector<4x8x20xf32>
    %476 = vector.shape_cast %101 : vector<1x20xf32> to vector<1x1x20xf32>
    %477 = vector.broadcast %476 : vector<1x1x20xf32> to vector<4x8x20xf32>
    %478 = arith.addf %475, %477 : vector<4x8x20xf32>
    %cst_147 = arith.constant dense<0xFF800000> : vector<4x8xf32>
    %479 = vector.multi_reduction <maximumf>, %478, %cst_147 [2] : vector<4x8x20xf32> to vector<4x8xf32>
    %480 = vector.shape_cast %479 : vector<4x8xf32> to vector<4x8x1xf32>
    %481 = vector.broadcast %480 : vector<4x8x1xf32> to vector<4x8x20xf32>
    %482 = arith.subf %478, %481 : vector<4x8x20xf32>
    %483 = math.exp %482 : vector<4x8x20xf32>
    %cst_148 = arith.constant dense<0.000000e+00> : vector<4x8xf32>
    %484 = vector.multi_reduction <add>, %483, %cst_148 [2] : vector<4x8x20xf32> to vector<4x8xf32>
    %485 = vector.shape_cast %484 : vector<4x8xf32> to vector<4x8x1xf32>
    %486 = tpu.reciprocal %485 {approx = true} : vector<4x8x1xf32> -> vector<4x8x1xf32>
    %487 = vector.broadcast %486 : vector<4x8x1xf32> to vector<4x8x20xf32>
    %488 = arith.mulf %483, %487 : vector<4x8x20xf32>
    %489 = arith.truncf %488 : vector<4x8x20xf32> to vector<4x8x20xbf16>
    "tpu.trace_start"() <{level = 10 : i32, message = "hqk,hkd->hqd"}> : () -> ()
    %cst_149 = arith.constant dense<0.000000e+00> : vector<4x8x8xf32>
    %490 = tpu.matmul %489, %472, %cst_149 {dimension_numbers = #tpu.dot_dimension_numbers<[2], [1], [1], [2], [0, 0, 0, 1, 1, 2], [0], [0]>} : vector<4x8x20xbf16>, vector<4x20x8xbf16>, vector<4x8x8xf32> -> vector<4x8x8xf32>
    "tpu.trace_stop"() : () -> ()
    %491 = vector.extract_strided_slice %490 {offsets = [0, 0, 0], sizes = [1, 8, 8], strides = [1, 1, 1]} : vector<4x8x8xf32> to vector<1x8x8xf32>
    %492 = vector.shape_cast %491 : vector<1x8x8xf32> to vector<8x8xf32>
    %493 = vector.extract_strided_slice %490 {offsets = [1, 0, 0], sizes = [1, 8, 8], strides = [1, 1, 1]} : vector<4x8x8xf32> to vector<1x8x8xf32>
    %494 = vector.shape_cast %493 : vector<1x8x8xf32> to vector<8x8xf32>
    %495 = vector.extract_strided_slice %490 {offsets = [2, 0, 0], sizes = [1, 8, 8], strides = [1, 1, 1]} : vector<4x8x8xf32> to vector<1x8x8xf32>
    %496 = vector.shape_cast %495 : vector<1x8x8xf32> to vector<8x8xf32>
    %497 = vector.extract_strided_slice %490 {offsets = [3, 0, 0], sizes = [1, 8, 8], strides = [1, 1, 1]} : vector<4x8x8xf32> to vector<1x8x8xf32>
    %498 = vector.shape_cast %497 : vector<1x8x8xf32> to vector<8x8xf32>
    %499 = tpu.concatenate %492, %494, %496, %498 in 1 : vector<8x8xf32>, vector<8x8xf32>, vector<8x8xf32>, vector<8x8xf32> -> vector<8x32xf32>
    %500 = arith.truncf %499 : vector<8x32xf32> to vector<8x32xbf16>
    %c576 = arith.constant 576 : index
    %c0_150 = arith.constant 0 : index
    %501 = vector.load %arg11[%c576, %c0_150] : memref<992x96xbf16, #tpu.memory_space<vmem>>, vector<32x32xbf16>
    %cst_151 = arith.constant dense<0.000000e+00> : vector<8x32xf32>
    %502 = tpu.matmul %500, %501, %cst_151 {dimension_numbers = #tpu.dot_dimension_numbers<[1], [0], [0], [1], [0, 0, 1, 1], [], []>} : vector<8x32xbf16>, vector<32x32xbf16>, vector<8x32xf32> -> vector<8x32xf32>
    %503 = arith.addf %428, %502 : vector<8x32xf32>
    %c17 = arith.constant 17 : index
    %c0_152 = arith.constant 0 : index
    %504 = vector.load %arg12[%c17, %c0_152] : memref<40x96xf32, #tpu.memory_space<vmem>>, vector<1x32xf32>
    %505 = vector.broadcast %504 : vector<1x32xf32> to vector<8x32xf32>
    %506 = arith.addf %503, %505 : vector<8x32xf32>
    %c18 = arith.constant 18 : index
    %c0_153 = arith.constant 0 : index
    %507 = vector.load %arg12[%c18, %c0_153] : memref<40x96xf32, #tpu.memory_space<vmem>>, vector<1x32xf32>
    %c19 = arith.constant 19 : index
    %c0_154 = arith.constant 0 : index
    %508 = vector.load %arg12[%c19, %c0_154] : memref<40x96xf32, #tpu.memory_space<vmem>>, vector<1x32xf32>
    %cst_155 = arith.constant dense<0.000000e+00> : vector<8xf32>
    %509 = vector.multi_reduction <add>, %506, %cst_155 [1] : vector<8x32xf32> to vector<8xf32>
    %510 = vector.shape_cast %509 : vector<8xf32> to vector<8x1xf32>
    %cst_156 = arith.constant 3.200000e+01 : f32
    %511 = vector.broadcast %cst_156 : f32 to vector<8x1xf32>
    %512 = arith.divf %510, %511 : vector<8x1xf32>
    %513 = vector.broadcast %512 : vector<8x1xf32> to vector<8x32xf32>
    %514 = arith.subf %506, %513 : vector<8x32xf32>
    %515 = vector.broadcast %512 : vector<8x1xf32> to vector<8x32xf32>
    %516 = arith.subf %506, %515 : vector<8x32xf32>
    %517 = arith.mulf %514, %516 : vector<8x32xf32>
    %cst_157 = arith.constant dense<0.000000e+00> : vector<8xf32>
    %518 = vector.multi_reduction <add>, %517, %cst_157 [1] : vector<8x32xf32> to vector<8xf32>
    %519 = vector.shape_cast %518 : vector<8xf32> to vector<8x1xf32>
    %cst_158 = arith.constant 3.200000e+01 : f32
    %520 = vector.broadcast %cst_158 : f32 to vector<8x1xf32>
    %521 = arith.divf %519, %520 : vector<8x1xf32>
    %522 = vector.broadcast %512 : vector<8x1xf32> to vector<8x32xf32>
    %523 = arith.subf %506, %522 : vector<8x32xf32>
    %cst_159 = arith.constant 9.99999974E-6 : f32
    %524 = vector.broadcast %cst_159 : f32 to vector<8x1xf32>
    %525 = arith.addf %521, %524 : vector<8x1xf32>
    %526 = math.rsqrt %525 : vector<8x1xf32>
    %527 = vector.broadcast %526 : vector<8x1xf32> to vector<8x32xf32>
    %528 = arith.mulf %523, %527 : vector<8x32xf32>
    %529 = vector.broadcast %507 : vector<1x32xf32> to vector<8x32xf32>
    %530 = arith.mulf %528, %529 : vector<8x32xf32>
    %531 = vector.broadcast %508 : vector<1x32xf32> to vector<8x32xf32>
    %532 = arith.addf %530, %531 : vector<8x32xf32>
    %533 = arith.truncf %532 : vector<8x32xf32> to vector<8x32xbf16>
    %c608 = arith.constant 608 : index
    %c0_160 = arith.constant 0 : index
    %534 = vector.load %arg11[%c608, %c0_160] : memref<992x96xbf16, #tpu.memory_space<vmem>>, vector<32x64xbf16>
    %cst_161 = arith.constant dense<0.000000e+00> : vector<8x64xf32>
    %535 = tpu.matmul %533, %534, %cst_161 {dimension_numbers = #tpu.dot_dimension_numbers<[1], [0], [0], [1], [0, 0, 1, 1], [], []>} : vector<8x32xbf16>, vector<32x64xbf16>, vector<8x64xf32> -> vector<8x64xf32>
    %c20 = arith.constant 20 : index
    %c0_162 = arith.constant 0 : index
    %536 = vector.load %arg12[%c20, %c0_162] : memref<40x96xf32, #tpu.memory_space<vmem>>, vector<1x64xf32>
    %537 = vector.broadcast %536 : vector<1x64xf32> to vector<8x64xf32>
    %538 = arith.addf %535, %537 : vector<8x64xf32>
    %cst_163 = arith.constant 0.000000e+00 : f32
    %539 = vector.broadcast %cst_163 : f32 to vector<8x64xf32>
    %540 = arith.maximumf %538, %539 : vector<8x64xf32>
    %541 = arith.truncf %540 : vector<8x64xf32> to vector<8x64xbf16>
    %c640 = arith.constant 640 : index
    %c0_164 = arith.constant 0 : index
    %542 = vector.load %arg11[%c640, %c0_164] : memref<992x96xbf16, #tpu.memory_space<vmem>>, vector<64x32xbf16>
    %cst_165 = arith.constant dense<0.000000e+00> : vector<8x32xf32>
    %543 = tpu.matmul %541, %542, %cst_165 {dimension_numbers = #tpu.dot_dimension_numbers<[1], [0], [0], [1], [0, 0, 1, 1], [], []>} : vector<8x64xbf16>, vector<64x32xbf16>, vector<8x32xf32> -> vector<8x32xf32>
    %544 = arith.addf %532, %543 : vector<8x32xf32>
    %c21 = arith.constant 21 : index
    %c0_166 = arith.constant 0 : index
    %545 = vector.load %arg12[%c21, %c0_166] : memref<40x96xf32, #tpu.memory_space<vmem>>, vector<1x32xf32>
    %546 = vector.broadcast %545 : vector<1x32xf32> to vector<8x32xf32>
    %547 = arith.addf %544, %546 : vector<8x32xf32>
    %c22 = arith.constant 22 : index
    %c0_167 = arith.constant 0 : index
    %548 = vector.load %arg12[%c22, %c0_167] : memref<40x96xf32, #tpu.memory_space<vmem>>, vector<1x32xf32>
    %c23 = arith.constant 23 : index
    %c0_168 = arith.constant 0 : index
    %549 = vector.load %arg12[%c23, %c0_168] : memref<40x96xf32, #tpu.memory_space<vmem>>, vector<1x32xf32>
    %cst_169 = arith.constant dense<0.000000e+00> : vector<8xf32>
    %550 = vector.multi_reduction <add>, %547, %cst_169 [1] : vector<8x32xf32> to vector<8xf32>
    %551 = vector.shape_cast %550 : vector<8xf32> to vector<8x1xf32>
    %cst_170 = arith.constant 3.200000e+01 : f32
    %552 = vector.broadcast %cst_170 : f32 to vector<8x1xf32>
    %553 = arith.divf %551, %552 : vector<8x1xf32>
    %554 = vector.broadcast %553 : vector<8x1xf32> to vector<8x32xf32>
    %555 = arith.subf %547, %554 : vector<8x32xf32>
    %556 = vector.broadcast %553 : vector<8x1xf32> to vector<8x32xf32>
    %557 = arith.subf %547, %556 : vector<8x32xf32>
    %558 = arith.mulf %555, %557 : vector<8x32xf32>
    %cst_171 = arith.constant dense<0.000000e+00> : vector<8xf32>
    %559 = vector.multi_reduction <add>, %558, %cst_171 [1] : vector<8x32xf32> to vector<8xf32>
    %560 = vector.shape_cast %559 : vector<8xf32> to vector<8x1xf32>
    %cst_172 = arith.constant 3.200000e+01 : f32
    %561 = vector.broadcast %cst_172 : f32 to vector<8x1xf32>
    %562 = arith.divf %560, %561 : vector<8x1xf32>
    %563 = vector.broadcast %553 : vector<8x1xf32> to vector<8x32xf32>
    %564 = arith.subf %547, %563 : vector<8x32xf32>
    %cst_173 = arith.constant 9.99999974E-6 : f32
    %565 = vector.broadcast %cst_173 : f32 to vector<8x1xf32>
    %566 = arith.addf %562, %565 : vector<8x1xf32>
    %567 = math.rsqrt %566 : vector<8x1xf32>
    %568 = vector.broadcast %567 : vector<8x1xf32> to vector<8x32xf32>
    %569 = arith.mulf %564, %568 : vector<8x32xf32>
    %570 = vector.broadcast %548 : vector<1x32xf32> to vector<8x32xf32>
    %571 = arith.mulf %569, %570 : vector<8x32xf32>
    %572 = vector.broadcast %549 : vector<1x32xf32> to vector<8x32xf32>
    %573 = arith.addf %571, %572 : vector<8x32xf32>
    %574 = arith.truncf %573 : vector<8x32xf32> to vector<8x32xbf16>
    %c704 = arith.constant 704 : index
    %c0_174 = arith.constant 0 : index
    %575 = vector.load %arg11[%c704, %c0_174] : memref<992x96xbf16, #tpu.memory_space<vmem>>, vector<32x96xbf16>
    %cst_175 = arith.constant dense<0.000000e+00> : vector<8x96xf32>
    %576 = tpu.matmul %574, %575, %cst_175 {dimension_numbers = #tpu.dot_dimension_numbers<[1], [0], [0], [1], [0, 0, 1, 1], [], []>} : vector<8x32xbf16>, vector<32x96xbf16>, vector<8x96xf32> -> vector<8x96xf32>
    %c24 = arith.constant 24 : index
    %c0_176 = arith.constant 0 : index
    %577 = vector.load %arg12[%c24, %c0_176] : memref<40x96xf32, #tpu.memory_space<vmem>>, vector<1x96xf32>
    %578 = vector.broadcast %577 : vector<1x96xf32> to vector<8x96xf32>
    %579 = arith.addf %576, %578 : vector<8x96xf32>
    %580 = vector.extract_strided_slice %579 {offsets = [0, 0], sizes = [8, 32], strides = [1, 1]} : vector<8x96xf32> to vector<8x32xf32>
    %581 = vector.extract_strided_slice %579 {offsets = [0, 32], sizes = [8, 32], strides = [1, 1]} : vector<8x96xf32> to vector<8x32xf32>
    %582 = vector.extract_strided_slice %579 {offsets = [0, 64], sizes = [8, 32], strides = [1, 1]} : vector<8x96xf32> to vector<8x32xf32>
    %583 = vector.extract_strided_slice %580 {offsets = [0, 0], sizes = [8, 8], strides = [1, 1]} : vector<8x32xf32> to vector<8x8xf32>
    %584 = vector.extract_strided_slice %580 {offsets = [0, 8], sizes = [8, 8], strides = [1, 1]} : vector<8x32xf32> to vector<8x8xf32>
    %585 = vector.extract_strided_slice %580 {offsets = [0, 16], sizes = [8, 8], strides = [1, 1]} : vector<8x32xf32> to vector<8x8xf32>
    %586 = vector.extract_strided_slice %580 {offsets = [0, 24], sizes = [8, 8], strides = [1, 1]} : vector<8x32xf32> to vector<8x8xf32>
    %587 = vector.shape_cast %583 : vector<8x8xf32> to vector<1x8x8xf32>
    %588 = vector.shape_cast %584 : vector<8x8xf32> to vector<1x8x8xf32>
    %589 = vector.shape_cast %585 : vector<8x8xf32> to vector<1x8x8xf32>
    %590 = vector.shape_cast %586 : vector<8x8xf32> to vector<1x8x8xf32>
    %591 = tpu.concatenate %587, %588, %589, %590 in 0 : vector<1x8x8xf32>, vector<1x8x8xf32>, vector<1x8x8xf32>, vector<1x8x8xf32> -> vector<4x8x8xf32>
    %592 = arith.truncf %591 : vector<4x8x8xf32> to vector<4x8x8xbf16>
    %593 = vector.extract_strided_slice %581 {offsets = [0, 0], sizes = [8, 8], strides = [1, 1]} : vector<8x32xf32> to vector<8x8xf32>
    %594 = vector.extract_strided_slice %581 {offsets = [0, 8], sizes = [8, 8], strides = [1, 1]} : vector<8x32xf32> to vector<8x8xf32>
    %595 = vector.extract_strided_slice %581 {offsets = [0, 16], sizes = [8, 8], strides = [1, 1]} : vector<8x32xf32> to vector<8x8xf32>
    %596 = vector.extract_strided_slice %581 {offsets = [0, 24], sizes = [8, 8], strides = [1, 1]} : vector<8x32xf32> to vector<8x8xf32>
    %597 = vector.shape_cast %593 : vector<8x8xf32> to vector<1x8x8xf32>
    %598 = vector.shape_cast %594 : vector<8x8xf32> to vector<1x8x8xf32>
    %599 = vector.shape_cast %595 : vector<8x8xf32> to vector<1x8x8xf32>
    %600 = vector.shape_cast %596 : vector<8x8xf32> to vector<1x8x8xf32>
    %601 = tpu.concatenate %597, %598, %599, %600 in 0 : vector<1x8x8xf32>, vector<1x8x8xf32>, vector<1x8x8xf32>, vector<1x8x8xf32> -> vector<4x8x8xf32>
    %602 = arith.truncf %601 : vector<4x8x8xf32> to vector<4x8x8xbf16>
    %603 = vector.extract_strided_slice %582 {offsets = [0, 0], sizes = [8, 8], strides = [1, 1]} : vector<8x32xf32> to vector<8x8xf32>
    %604 = vector.extract_strided_slice %582 {offsets = [0, 8], sizes = [8, 8], strides = [1, 1]} : vector<8x32xf32> to vector<8x8xf32>
    %605 = vector.extract_strided_slice %582 {offsets = [0, 16], sizes = [8, 8], strides = [1, 1]} : vector<8x32xf32> to vector<8x8xf32>
    %606 = vector.extract_strided_slice %582 {offsets = [0, 24], sizes = [8, 8], strides = [1, 1]} : vector<8x32xf32> to vector<8x8xf32>
    %607 = vector.shape_cast %603 : vector<8x8xf32> to vector<1x8x8xf32>
    %608 = vector.shape_cast %604 : vector<8x8xf32> to vector<1x8x8xf32>
    %609 = vector.shape_cast %605 : vector<8x8xf32> to vector<1x8x8xf32>
    %610 = vector.shape_cast %606 : vector<8x8xf32> to vector<1x8x8xf32>
    %611 = tpu.concatenate %607, %608, %609, %610 in 0 : vector<1x8x8xf32>, vector<1x8x8xf32>, vector<1x8x8xf32>, vector<1x8x8xf32> -> vector<4x8x8xf32>
    %612 = arith.truncf %611 : vector<4x8x8xf32> to vector<4x8x8xbf16>
    "tpu.trace_start"() <{level = 10 : i32, message = "hqd,hkd->hqk"}> : () -> ()
    %cst_177 = arith.constant dense<0.000000e+00> : vector<4x8x8xf32>
    %613 = tpu.matmul %592, %602, %cst_177 {dimension_numbers = #tpu.dot_dimension_numbers<[2], [2], [1], [1], [0, 0, 0, 1, 1, 1], [0], [0]>} : vector<4x8x8xbf16>, vector<4x8x8xbf16>, vector<4x8x8xf32> -> vector<4x8x8xf32>
    "tpu.trace_stop"() : () -> ()
    %cst_178 = arith.constant 0.353553385 : f32
    %614 = vector.broadcast %cst_178 : f32 to vector<4x8x8xf32>
    %615 = arith.mulf %613, %614 : vector<4x8x8xf32>
    %616 = vector.shape_cast %327 : vector<8x8xf32> to vector<1x8x8xf32>
    %617 = vector.broadcast %616 : vector<1x8x8xf32> to vector<4x8x8xf32>
    %618 = arith.addf %615, %617 : vector<4x8x8xf32>
    %cst_179 = arith.constant dense<0xFF800000> : vector<4x8xf32>
    %619 = vector.multi_reduction <maximumf>, %618, %cst_179 [2] : vector<4x8x8xf32> to vector<4x8xf32>
    %620 = vector.shape_cast %619 : vector<4x8xf32> to vector<4x8x1xf32>
    %621 = vector.broadcast %620 : vector<4x8x1xf32> to vector<4x8x8xf32>
    %622 = arith.subf %618, %621 : vector<4x8x8xf32>
    %623 = math.exp %622 : vector<4x8x8xf32>
    %cst_180 = arith.constant dense<0.000000e+00> : vector<4x8xf32>
    %624 = vector.multi_reduction <add>, %623, %cst_180 [2] : vector<4x8x8xf32> to vector<4x8xf32>
    %625 = vector.shape_cast %624 : vector<4x8xf32> to vector<4x8x1xf32>
    %626 = tpu.reciprocal %625 {approx = true} : vector<4x8x1xf32> -> vector<4x8x1xf32>
    %627 = vector.broadcast %626 : vector<4x8x1xf32> to vector<4x8x8xf32>
    %628 = arith.mulf %623, %627 : vector<4x8x8xf32>
    %629 = arith.truncf %628 : vector<4x8x8xf32> to vector<4x8x8xbf16>
    "tpu.trace_start"() <{level = 10 : i32, message = "hqk,hkd->hqd"}> : () -> ()
    %cst_181 = arith.constant dense<0.000000e+00> : vector<4x8x8xf32>
    %630 = tpu.matmul %629, %612, %cst_181 {dimension_numbers = #tpu.dot_dimension_numbers<[2], [1], [1], [2], [0, 0, 0, 1, 1, 2], [0], [0]>} : vector<4x8x8xbf16>, vector<4x8x8xbf16>, vector<4x8x8xf32> -> vector<4x8x8xf32>
    "tpu.trace_stop"() : () -> ()
    %631 = vector.extract_strided_slice %630 {offsets = [0, 0, 0], sizes = [1, 8, 8], strides = [1, 1, 1]} : vector<4x8x8xf32> to vector<1x8x8xf32>
    %632 = vector.shape_cast %631 : vector<1x8x8xf32> to vector<8x8xf32>
    %633 = vector.extract_strided_slice %630 {offsets = [1, 0, 0], sizes = [1, 8, 8], strides = [1, 1, 1]} : vector<4x8x8xf32> to vector<1x8x8xf32>
    %634 = vector.shape_cast %633 : vector<1x8x8xf32> to vector<8x8xf32>
    %635 = vector.extract_strided_slice %630 {offsets = [2, 0, 0], sizes = [1, 8, 8], strides = [1, 1, 1]} : vector<4x8x8xf32> to vector<1x8x8xf32>
    %636 = vector.shape_cast %635 : vector<1x8x8xf32> to vector<8x8xf32>
    %637 = vector.extract_strided_slice %630 {offsets = [3, 0, 0], sizes = [1, 8, 8], strides = [1, 1, 1]} : vector<4x8x8xf32> to vector<1x8x8xf32>
    %638 = vector.shape_cast %637 : vector<1x8x8xf32> to vector<8x8xf32>
    %639 = tpu.concatenate %632, %634, %636, %638 in 1 : vector<8x8xf32>, vector<8x8xf32>, vector<8x8xf32>, vector<8x8xf32> -> vector<8x32xf32>
    %640 = arith.truncf %639 : vector<8x32xf32> to vector<8x32xbf16>
    %c736 = arith.constant 736 : index
    %c0_182 = arith.constant 0 : index
    %641 = vector.load %arg11[%c736, %c0_182] : memref<992x96xbf16, #tpu.memory_space<vmem>>, vector<32x32xbf16>
    %cst_183 = arith.constant dense<0.000000e+00> : vector<8x32xf32>
    %642 = tpu.matmul %640, %641, %cst_183 {dimension_numbers = #tpu.dot_dimension_numbers<[1], [0], [0], [1], [0, 0, 1, 1], [], []>} : vector<8x32xbf16>, vector<32x32xbf16>, vector<8x32xf32> -> vector<8x32xf32>
    %643 = arith.addf %573, %642 : vector<8x32xf32>
    %c25 = arith.constant 25 : index
    %c0_184 = arith.constant 0 : index
    %644 = vector.load %arg12[%c25, %c0_184] : memref<40x96xf32, #tpu.memory_space<vmem>>, vector<1x32xf32>
    %645 = vector.broadcast %644 : vector<1x32xf32> to vector<8x32xf32>
    %646 = arith.addf %643, %645 : vector<8x32xf32>
    %c26 = arith.constant 26 : index
    %c0_185 = arith.constant 0 : index
    %647 = vector.load %arg12[%c26, %c0_185] : memref<40x96xf32, #tpu.memory_space<vmem>>, vector<1x32xf32>
    %c27 = arith.constant 27 : index
    %c0_186 = arith.constant 0 : index
    %648 = vector.load %arg12[%c27, %c0_186] : memref<40x96xf32, #tpu.memory_space<vmem>>, vector<1x32xf32>
    %cst_187 = arith.constant dense<0.000000e+00> : vector<8xf32>
    %649 = vector.multi_reduction <add>, %646, %cst_187 [1] : vector<8x32xf32> to vector<8xf32>
    %650 = vector.shape_cast %649 : vector<8xf32> to vector<8x1xf32>
    %cst_188 = arith.constant 3.200000e+01 : f32
    %651 = vector.broadcast %cst_188 : f32 to vector<8x1xf32>
    %652 = arith.divf %650, %651 : vector<8x1xf32>
    %653 = vector.broadcast %652 : vector<8x1xf32> to vector<8x32xf32>
    %654 = arith.subf %646, %653 : vector<8x32xf32>
    %655 = vector.broadcast %652 : vector<8x1xf32> to vector<8x32xf32>
    %656 = arith.subf %646, %655 : vector<8x32xf32>
    %657 = arith.mulf %654, %656 : vector<8x32xf32>
    %cst_189 = arith.constant dense<0.000000e+00> : vector<8xf32>
    %658 = vector.multi_reduction <add>, %657, %cst_189 [1] : vector<8x32xf32> to vector<8xf32>
    %659 = vector.shape_cast %658 : vector<8xf32> to vector<8x1xf32>
    %cst_190 = arith.constant 3.200000e+01 : f32
    %660 = vector.broadcast %cst_190 : f32 to vector<8x1xf32>
    %661 = arith.divf %659, %660 : vector<8x1xf32>
    %662 = vector.broadcast %652 : vector<8x1xf32> to vector<8x32xf32>
    %663 = arith.subf %646, %662 : vector<8x32xf32>
    %cst_191 = arith.constant 9.99999974E-6 : f32
    %664 = vector.broadcast %cst_191 : f32 to vector<8x1xf32>
    %665 = arith.addf %661, %664 : vector<8x1xf32>
    %666 = math.rsqrt %665 : vector<8x1xf32>
    %667 = vector.broadcast %666 : vector<8x1xf32> to vector<8x32xf32>
    %668 = arith.mulf %663, %667 : vector<8x32xf32>
    %669 = vector.broadcast %647 : vector<1x32xf32> to vector<8x32xf32>
    %670 = arith.mulf %668, %669 : vector<8x32xf32>
    %671 = vector.broadcast %648 : vector<1x32xf32> to vector<8x32xf32>
    %672 = arith.addf %670, %671 : vector<8x32xf32>
    %673 = arith.truncf %672 : vector<8x32xf32> to vector<8x32xbf16>
    %c768 = arith.constant 768 : index
    %c0_192 = arith.constant 0 : index
    %674 = vector.load %arg11[%c768, %c0_192] : memref<992x96xbf16, #tpu.memory_space<vmem>>, vector<32x32xbf16>
    %cst_193 = arith.constant dense<0.000000e+00> : vector<8x32xf32>
    %675 = tpu.matmul %673, %674, %cst_193 {dimension_numbers = #tpu.dot_dimension_numbers<[1], [0], [0], [1], [0, 0, 1, 1], [], []>} : vector<8x32xbf16>, vector<32x32xbf16>, vector<8x32xf32> -> vector<8x32xf32>
    %c28 = arith.constant 28 : index
    %c0_194 = arith.constant 0 : index
    %676 = vector.load %arg12[%c28, %c0_194] : memref<40x96xf32, #tpu.memory_space<vmem>>, vector<1x32xf32>
    %677 = vector.broadcast %676 : vector<1x32xf32> to vector<8x32xf32>
    %678 = arith.addf %675, %677 : vector<8x32xf32>
    %679 = arith.truncf %318 : vector<20x32xf32> to vector<20x32xbf16>
    %c800 = arith.constant 800 : index
    %c0_195 = arith.constant 0 : index
    %680 = vector.load %arg11[%c800, %c0_195] : memref<992x96xbf16, #tpu.memory_space<vmem>>, vector<32x64xbf16>
    %cst_196 = arith.constant dense<0.000000e+00> : vector<20x64xf32>
    %681 = tpu.matmul %679, %680, %cst_196 {dimension_numbers = #tpu.dot_dimension_numbers<[1], [0], [0], [1], [0, 0, 1, 1], [], []>} : vector<20x32xbf16>, vector<32x64xbf16>, vector<20x64xf32> -> vector<20x64xf32>
    %c29 = arith.constant 29 : index
    %c0_197 = arith.constant 0 : index
    %682 = vector.load %arg12[%c29, %c0_197] : memref<40x96xf32, #tpu.memory_space<vmem>>, vector<1x64xf32>
    %683 = vector.broadcast %682 : vector<1x64xf32> to vector<20x64xf32>
    %684 = arith.addf %681, %683 : vector<20x64xf32>
    %685 = vector.extract_strided_slice %684 {offsets = [0, 0], sizes = [20, 32], strides = [1, 1]} : vector<20x64xf32> to vector<20x32xf32>
    %686 = vector.extract_strided_slice %684 {offsets = [0, 32], sizes = [20, 32], strides = [1, 1]} : vector<20x64xf32> to vector<20x32xf32>
    %687 = vector.extract_strided_slice %678 {offsets = [0, 0], sizes = [8, 8], strides = [1, 1]} : vector<8x32xf32> to vector<8x8xf32>
    %688 = vector.extract_strided_slice %678 {offsets = [0, 8], sizes = [8, 8], strides = [1, 1]} : vector<8x32xf32> to vector<8x8xf32>
    %689 = vector.extract_strided_slice %678 {offsets = [0, 16], sizes = [8, 8], strides = [1, 1]} : vector<8x32xf32> to vector<8x8xf32>
    %690 = vector.extract_strided_slice %678 {offsets = [0, 24], sizes = [8, 8], strides = [1, 1]} : vector<8x32xf32> to vector<8x8xf32>
    %691 = vector.shape_cast %687 : vector<8x8xf32> to vector<1x8x8xf32>
    %692 = vector.shape_cast %688 : vector<8x8xf32> to vector<1x8x8xf32>
    %693 = vector.shape_cast %689 : vector<8x8xf32> to vector<1x8x8xf32>
    %694 = vector.shape_cast %690 : vector<8x8xf32> to vector<1x8x8xf32>
    %695 = tpu.concatenate %691, %692, %693, %694 in 0 : vector<1x8x8xf32>, vector<1x8x8xf32>, vector<1x8x8xf32>, vector<1x8x8xf32> -> vector<4x8x8xf32>
    %696 = arith.truncf %695 : vector<4x8x8xf32> to vector<4x8x8xbf16>
    %697 = vector.extract_strided_slice %685 {offsets = [0, 0], sizes = [20, 8], strides = [1, 1]} : vector<20x32xf32> to vector<20x8xf32>
    %698 = vector.extract_strided_slice %685 {offsets = [0, 8], sizes = [20, 8], strides = [1, 1]} : vector<20x32xf32> to vector<20x8xf32>
    %699 = vector.extract_strided_slice %685 {offsets = [0, 16], sizes = [20, 8], strides = [1, 1]} : vector<20x32xf32> to vector<20x8xf32>
    %700 = vector.extract_strided_slice %685 {offsets = [0, 24], sizes = [20, 8], strides = [1, 1]} : vector<20x32xf32> to vector<20x8xf32>
    %701 = vector.shape_cast %697 : vector<20x8xf32> to vector<1x20x8xf32>
    %702 = vector.shape_cast %698 : vector<20x8xf32> to vector<1x20x8xf32>
    %703 = vector.shape_cast %699 : vector<20x8xf32> to vector<1x20x8xf32>
    %704 = vector.shape_cast %700 : vector<20x8xf32> to vector<1x20x8xf32>
    %705 = tpu.concatenate %701, %702, %703, %704 in 0 : vector<1x20x8xf32>, vector<1x20x8xf32>, vector<1x20x8xf32>, vector<1x20x8xf32> -> vector<4x20x8xf32>
    %706 = arith.truncf %705 : vector<4x20x8xf32> to vector<4x20x8xbf16>
    %707 = vector.extract_strided_slice %686 {offsets = [0, 0], sizes = [20, 8], strides = [1, 1]} : vector<20x32xf32> to vector<20x8xf32>
    %708 = vector.extract_strided_slice %686 {offsets = [0, 8], sizes = [20, 8], strides = [1, 1]} : vector<20x32xf32> to vector<20x8xf32>
    %709 = vector.extract_strided_slice %686 {offsets = [0, 16], sizes = [20, 8], strides = [1, 1]} : vector<20x32xf32> to vector<20x8xf32>
    %710 = vector.extract_strided_slice %686 {offsets = [0, 24], sizes = [20, 8], strides = [1, 1]} : vector<20x32xf32> to vector<20x8xf32>
    %711 = vector.shape_cast %707 : vector<20x8xf32> to vector<1x20x8xf32>
    %712 = vector.shape_cast %708 : vector<20x8xf32> to vector<1x20x8xf32>
    %713 = vector.shape_cast %709 : vector<20x8xf32> to vector<1x20x8xf32>
    %714 = vector.shape_cast %710 : vector<20x8xf32> to vector<1x20x8xf32>
    %715 = tpu.concatenate %711, %712, %713, %714 in 0 : vector<1x20x8xf32>, vector<1x20x8xf32>, vector<1x20x8xf32>, vector<1x20x8xf32> -> vector<4x20x8xf32>
    %716 = arith.truncf %715 : vector<4x20x8xf32> to vector<4x20x8xbf16>
    "tpu.trace_start"() <{level = 10 : i32, message = "hqd,hkd->hqk"}> : () -> ()
    %cst_198 = arith.constant dense<0.000000e+00> : vector<4x8x20xf32>
    %717 = tpu.matmul %696, %706, %cst_198 {dimension_numbers = #tpu.dot_dimension_numbers<[2], [2], [1], [1], [0, 0, 0, 1, 1, 1], [0], [0]>} : vector<4x8x8xbf16>, vector<4x20x8xbf16>, vector<4x8x20xf32> -> vector<4x8x20xf32>
    "tpu.trace_stop"() : () -> ()
    %cst_199 = arith.constant 0.353553385 : f32
    %718 = vector.broadcast %cst_199 : f32 to vector<4x8x20xf32>
    %719 = arith.mulf %717, %718 : vector<4x8x20xf32>
    %720 = vector.shape_cast %101 : vector<1x20xf32> to vector<1x1x20xf32>
    %721 = vector.broadcast %720 : vector<1x1x20xf32> to vector<4x8x20xf32>
    %722 = arith.addf %719, %721 : vector<4x8x20xf32>
    %cst_200 = arith.constant dense<0xFF800000> : vector<4x8xf32>
    %723 = vector.multi_reduction <maximumf>, %722, %cst_200 [2] : vector<4x8x20xf32> to vector<4x8xf32>
    %724 = vector.shape_cast %723 : vector<4x8xf32> to vector<4x8x1xf32>
    %725 = vector.broadcast %724 : vector<4x8x1xf32> to vector<4x8x20xf32>
    %726 = arith.subf %722, %725 : vector<4x8x20xf32>
    %727 = math.exp %726 : vector<4x8x20xf32>
    %cst_201 = arith.constant dense<0.000000e+00> : vector<4x8xf32>
    %728 = vector.multi_reduction <add>, %727, %cst_201 [2] : vector<4x8x20xf32> to vector<4x8xf32>
    %729 = vector.shape_cast %728 : vector<4x8xf32> to vector<4x8x1xf32>
    %730 = tpu.reciprocal %729 {approx = true} : vector<4x8x1xf32> -> vector<4x8x1xf32>
    %731 = vector.broadcast %730 : vector<4x8x1xf32> to vector<4x8x20xf32>
    %732 = arith.mulf %727, %731 : vector<4x8x20xf32>
    %733 = arith.truncf %732 : vector<4x8x20xf32> to vector<4x8x20xbf16>
    "tpu.trace_start"() <{level = 10 : i32, message = "hqk,hkd->hqd"}> : () -> ()
    %cst_202 = arith.constant dense<0.000000e+00> : vector<4x8x8xf32>
    %734 = tpu.matmul %733, %716, %cst_202 {dimension_numbers = #tpu.dot_dimension_numbers<[2], [1], [1], [2], [0, 0, 0, 1, 1, 2], [0], [0]>} : vector<4x8x20xbf16>, vector<4x20x8xbf16>, vector<4x8x8xf32> -> vector<4x8x8xf32>
    "tpu.trace_stop"() : () -> ()
    %735 = vector.extract_strided_slice %734 {offsets = [0, 0, 0], sizes = [1, 8, 8], strides = [1, 1, 1]} : vector<4x8x8xf32> to vector<1x8x8xf32>
    %736 = vector.shape_cast %735 : vector<1x8x8xf32> to vector<8x8xf32>
    %737 = vector.extract_strided_slice %734 {offsets = [1, 0, 0], sizes = [1, 8, 8], strides = [1, 1, 1]} : vector<4x8x8xf32> to vector<1x8x8xf32>
    %738 = vector.shape_cast %737 : vector<1x8x8xf32> to vector<8x8xf32>
    %739 = vector.extract_strided_slice %734 {offsets = [2, 0, 0], sizes = [1, 8, 8], strides = [1, 1, 1]} : vector<4x8x8xf32> to vector<1x8x8xf32>
    %740 = vector.shape_cast %739 : vector<1x8x8xf32> to vector<8x8xf32>
    %741 = vector.extract_strided_slice %734 {offsets = [3, 0, 0], sizes = [1, 8, 8], strides = [1, 1, 1]} : vector<4x8x8xf32> to vector<1x8x8xf32>
    %742 = vector.shape_cast %741 : vector<1x8x8xf32> to vector<8x8xf32>
    %743 = tpu.concatenate %736, %738, %740, %742 in 1 : vector<8x8xf32>, vector<8x8xf32>, vector<8x8xf32>, vector<8x8xf32> -> vector<8x32xf32>
    %744 = arith.truncf %743 : vector<8x32xf32> to vector<8x32xbf16>
    %c832 = arith.constant 832 : index
    %c0_203 = arith.constant 0 : index
    %745 = vector.load %arg11[%c832, %c0_203] : memref<992x96xbf16, #tpu.memory_space<vmem>>, vector<32x32xbf16>
    %cst_204 = arith.constant dense<0.000000e+00> : vector<8x32xf32>
    %746 = tpu.matmul %744, %745, %cst_204 {dimension_numbers = #tpu.dot_dimension_numbers<[1], [0], [0], [1], [0, 0, 1, 1], [], []>} : vector<8x32xbf16>, vector<32x32xbf16>, vector<8x32xf32> -> vector<8x32xf32>
    %747 = arith.addf %672, %746 : vector<8x32xf32>
    %c30 = arith.constant 30 : index
    %c0_205 = arith.constant 0 : index
    %748 = vector.load %arg12[%c30, %c0_205] : memref<40x96xf32, #tpu.memory_space<vmem>>, vector<1x32xf32>
    %749 = vector.broadcast %748 : vector<1x32xf32> to vector<8x32xf32>
    %750 = arith.addf %747, %749 : vector<8x32xf32>
    %c31 = arith.constant 31 : index
    %c0_206 = arith.constant 0 : index
    %751 = vector.load %arg12[%c31, %c0_206] : memref<40x96xf32, #tpu.memory_space<vmem>>, vector<1x32xf32>
    %c32 = arith.constant 32 : index
    %c0_207 = arith.constant 0 : index
    %752 = vector.load %arg12[%c32, %c0_207] : memref<40x96xf32, #tpu.memory_space<vmem>>, vector<1x32xf32>
    %cst_208 = arith.constant dense<0.000000e+00> : vector<8xf32>
    %753 = vector.multi_reduction <add>, %750, %cst_208 [1] : vector<8x32xf32> to vector<8xf32>
    %754 = vector.shape_cast %753 : vector<8xf32> to vector<8x1xf32>
    %cst_209 = arith.constant 3.200000e+01 : f32
    %755 = vector.broadcast %cst_209 : f32 to vector<8x1xf32>
    %756 = arith.divf %754, %755 : vector<8x1xf32>
    %757 = vector.broadcast %756 : vector<8x1xf32> to vector<8x32xf32>
    %758 = arith.subf %750, %757 : vector<8x32xf32>
    %759 = vector.broadcast %756 : vector<8x1xf32> to vector<8x32xf32>
    %760 = arith.subf %750, %759 : vector<8x32xf32>
    %761 = arith.mulf %758, %760 : vector<8x32xf32>
    %cst_210 = arith.constant dense<0.000000e+00> : vector<8xf32>
    %762 = vector.multi_reduction <add>, %761, %cst_210 [1] : vector<8x32xf32> to vector<8xf32>
    %763 = vector.shape_cast %762 : vector<8xf32> to vector<8x1xf32>
    %cst_211 = arith.constant 3.200000e+01 : f32
    %764 = vector.broadcast %cst_211 : f32 to vector<8x1xf32>
    %765 = arith.divf %763, %764 : vector<8x1xf32>
    %766 = vector.broadcast %756 : vector<8x1xf32> to vector<8x32xf32>
    %767 = arith.subf %750, %766 : vector<8x32xf32>
    %cst_212 = arith.constant 9.99999974E-6 : f32
    %768 = vector.broadcast %cst_212 : f32 to vector<8x1xf32>
    %769 = arith.addf %765, %768 : vector<8x1xf32>
    %770 = math.rsqrt %769 : vector<8x1xf32>
    %771 = vector.broadcast %770 : vector<8x1xf32> to vector<8x32xf32>
    %772 = arith.mulf %767, %771 : vector<8x32xf32>
    %773 = vector.broadcast %751 : vector<1x32xf32> to vector<8x32xf32>
    %774 = arith.mulf %772, %773 : vector<8x32xf32>
    %775 = vector.broadcast %752 : vector<1x32xf32> to vector<8x32xf32>
    %776 = arith.addf %774, %775 : vector<8x32xf32>
    %777 = arith.truncf %776 : vector<8x32xf32> to vector<8x32xbf16>
    %c864 = arith.constant 864 : index
    %c0_213 = arith.constant 0 : index
    %778 = vector.load %arg11[%c864, %c0_213] : memref<992x96xbf16, #tpu.memory_space<vmem>>, vector<32x64xbf16>
    %cst_214 = arith.constant dense<0.000000e+00> : vector<8x64xf32>
    %779 = tpu.matmul %777, %778, %cst_214 {dimension_numbers = #tpu.dot_dimension_numbers<[1], [0], [0], [1], [0, 0, 1, 1], [], []>} : vector<8x32xbf16>, vector<32x64xbf16>, vector<8x64xf32> -> vector<8x64xf32>
    %c33 = arith.constant 33 : index
    %c0_215 = arith.constant 0 : index
    %780 = vector.load %arg12[%c33, %c0_215] : memref<40x96xf32, #tpu.memory_space<vmem>>, vector<1x64xf32>
    %781 = vector.broadcast %780 : vector<1x64xf32> to vector<8x64xf32>
    %782 = arith.addf %779, %781 : vector<8x64xf32>
    %cst_216 = arith.constant 0.000000e+00 : f32
    %783 = vector.broadcast %cst_216 : f32 to vector<8x64xf32>
    %784 = arith.maximumf %782, %783 : vector<8x64xf32>
    %785 = arith.truncf %784 : vector<8x64xf32> to vector<8x64xbf16>
    %c896 = arith.constant 896 : index
    %c0_217 = arith.constant 0 : index
    %786 = vector.load %arg11[%c896, %c0_217] : memref<992x96xbf16, #tpu.memory_space<vmem>>, vector<64x32xbf16>
    %cst_218 = arith.constant dense<0.000000e+00> : vector<8x32xf32>
    %787 = tpu.matmul %785, %786, %cst_218 {dimension_numbers = #tpu.dot_dimension_numbers<[1], [0], [0], [1], [0, 0, 1, 1], [], []>} : vector<8x64xbf16>, vector<64x32xbf16>, vector<8x32xf32> -> vector<8x32xf32>
    %788 = arith.addf %776, %787 : vector<8x32xf32>
    %c34 = arith.constant 34 : index
    %c0_219 = arith.constant 0 : index
    %789 = vector.load %arg12[%c34, %c0_219] : memref<40x96xf32, #tpu.memory_space<vmem>>, vector<1x32xf32>
    %790 = vector.broadcast %789 : vector<1x32xf32> to vector<8x32xf32>
    %791 = arith.addf %788, %790 : vector<8x32xf32>
    %c35 = arith.constant 35 : index
    %c0_220 = arith.constant 0 : index
    %792 = vector.load %arg12[%c35, %c0_220] : memref<40x96xf32, #tpu.memory_space<vmem>>, vector<1x32xf32>
    %c36 = arith.constant 36 : index
    %c0_221 = arith.constant 0 : index
    %793 = vector.load %arg12[%c36, %c0_221] : memref<40x96xf32, #tpu.memory_space<vmem>>, vector<1x32xf32>
    %cst_222 = arith.constant dense<0.000000e+00> : vector<8xf32>
    %794 = vector.multi_reduction <add>, %791, %cst_222 [1] : vector<8x32xf32> to vector<8xf32>
    %795 = vector.shape_cast %794 : vector<8xf32> to vector<8x1xf32>
    %cst_223 = arith.constant 3.200000e+01 : f32
    %796 = vector.broadcast %cst_223 : f32 to vector<8x1xf32>
    %797 = arith.divf %795, %796 : vector<8x1xf32>
    %798 = vector.broadcast %797 : vector<8x1xf32> to vector<8x32xf32>
    %799 = arith.subf %791, %798 : vector<8x32xf32>
    %800 = vector.broadcast %797 : vector<8x1xf32> to vector<8x32xf32>
    %801 = arith.subf %791, %800 : vector<8x32xf32>
    %802 = arith.mulf %799, %801 : vector<8x32xf32>
    %cst_224 = arith.constant dense<0.000000e+00> : vector<8xf32>
    %803 = vector.multi_reduction <add>, %802, %cst_224 [1] : vector<8x32xf32> to vector<8xf32>
    %804 = vector.shape_cast %803 : vector<8xf32> to vector<8x1xf32>
    %cst_225 = arith.constant 3.200000e+01 : f32
    %805 = vector.broadcast %cst_225 : f32 to vector<8x1xf32>
    %806 = arith.divf %804, %805 : vector<8x1xf32>
    %807 = vector.broadcast %797 : vector<8x1xf32> to vector<8x32xf32>
    %808 = arith.subf %791, %807 : vector<8x32xf32>
    %cst_226 = arith.constant 9.99999974E-6 : f32
    %809 = vector.broadcast %cst_226 : f32 to vector<8x1xf32>
    %810 = arith.addf %806, %809 : vector<8x1xf32>
    %811 = math.rsqrt %810 : vector<8x1xf32>
    %812 = vector.broadcast %811 : vector<8x1xf32> to vector<8x32xf32>
    %813 = arith.mulf %808, %812 : vector<8x32xf32>
    %814 = vector.broadcast %792 : vector<1x32xf32> to vector<8x32xf32>
    %815 = arith.mulf %813, %814 : vector<8x32xf32>
    %816 = vector.broadcast %793 : vector<1x32xf32> to vector<8x32xf32>
    %817 = arith.addf %815, %816 : vector<8x32xf32>
    %818 = arith.truncf %817 : vector<8x32xf32> to vector<8x32xbf16>
    %c960 = arith.constant 960 : index
    %c0_227 = arith.constant 0 : index
    %819 = vector.load %arg11[%c960, %c0_227] : memref<992x96xbf16, #tpu.memory_space<vmem>>, vector<32x64xbf16>
    %cst_228 = arith.constant dense<0.000000e+00> : vector<8x64xf32>
    %820 = tpu.matmul %818, %819, %cst_228 {dimension_numbers = #tpu.dot_dimension_numbers<[1], [0], [0], [1], [0, 0, 1, 1], [], []>} : vector<8x32xbf16>, vector<32x64xbf16>, vector<8x64xf32> -> vector<8x64xf32>
    %c37 = arith.constant 37 : index
    %c0_229 = arith.constant 0 : index
    %821 = vector.load %arg12[%c37, %c0_229] : memref<40x96xf32, #tpu.memory_space<vmem>>, vector<1x64xf32>
    %822 = vector.broadcast %821 : vector<1x64xf32> to vector<8x64xf32>
    %823 = arith.addf %820, %822 : vector<8x64xf32>
    %c0_230 = arith.constant 0 : index
    %c0_231 = arith.constant 0 : index
    %c0_232 = arith.constant 0 : index
    %824 = vector.load %arg13[%c0_230, %c0_231, %c0_232] : memref<1x8x64xf32, #tpu.memory_space<vmem>>, vector<1x8x64xf32>
    %825 = vector.shape_cast %824 : vector<1x8x64xf32> to vector<8x64xf32>
    %826 = vector.shape_cast %823 : vector<8x64xf32> to vector<1x8x64xf32>
    tpu.vector_store %arg13[%c0_230, %c0_231, %c0_232], %826 {strides = array<i32>} : memref<1x8x64xf32, #tpu.memory_space<vmem>>, vector<1x8x64xf32>,
    return
  }
  func.func @transform_0(%arg0: i32) -> (i32, i32, i32) {
    %c0_i32 = arith.constant 0 : i32
    %c0_i32_0 = arith.constant 0 : i32
    %c0_i32_1 = arith.constant 0 : i32
    return %arg0, %c0_i32, %c0_i32_0 : i32, i32, i32
  }
  func.func @transform_1(%arg0: i32) -> (i32, i32, i32) {
    %c0_i32 = arith.constant 0 : i32
    %c0_i32_0 = arith.constant 0 : i32
    %c0_i32_1 = arith.constant 0 : i32
    return %arg0, %c0_i32, %c0_i32_0 : i32, i32, i32
  }
  func.func @transform_2(%arg0: i32) -> (i32, i32, i32) {
    %c0_i32 = arith.constant 0 : i32
    %c0_i32_0 = arith.constant 0 : i32
    %c0_i32_1 = arith.constant 0 : i32
    return %arg0, %c0_i32, %c0_i32_0 : i32, i32, i32
  }
  func.func @transform_3(%arg0: i32) -> (i32, i32, i32) {
    %c0_i32 = arith.constant 0 : i32
    %c0_i32_0 = arith.constant 0 : i32
    %c0_i32_1 = arith.constant 0 : i32
    return %arg0, %c0_i32, %c0_i32_0 : i32, i32, i32
  }
  func.func @transform_4(%arg0: i32) -> (i32, i32, i32) {
    %c0_i32 = arith.constant 0 : i32
    %c0_i32_0 = arith.constant 0 : i32
    %c0_i32_1 = arith.constant 0 : i32
    return %arg0, %c0_i32, %c0_i32_0 : i32, i32, i32
  }
  func.func @transform_5(%arg0: i32) -> (i32, i32, i32) {
    %c0_i32 = arith.constant 0 : i32
    %c0_i32_0 = arith.constant 0 : i32
    %c0_i32_1 = arith.constant 0 : i32
    return %arg0, %c0_i32, %c0_i32_0 : i32, i32, i32
  }
  func.func @transform_6(%arg0: i32) -> (i32, i32, i32) {
    %c0_i32 = arith.constant 0 : i32
    %c0_i32_0 = arith.constant 0 : i32
    %c0_i32_1 = arith.constant 0 : i32
    return %arg0, %c0_i32, %c0_i32_0 : i32, i32, i32
  }
  func.func @transform_7(%arg0: i32) -> (i32, i32, i32) {
    %c0_i32 = arith.constant 0 : i32
    %c0_i32_0 = arith.constant 0 : i32
    %c0_i32_1 = arith.constant 0 : i32
    return %arg0, %c0_i32, %c0_i32_0 : i32, i32, i32
  }
  func.func @transform_8(%arg0: i32) -> (i32, i32, i32) {
    %c0_i32 = arith.constant 0 : i32
    %c0_i32_0 = arith.constant 0 : i32
    %c0_i32_1 = arith.constant 0 : i32
    %c0_i32_2 = arith.constant 0 : i32
    return %c0_i32, %c0_i32_0, %c0_i32_1 : i32, i32, i32
  }
  func.func @transform_9(%arg0: i32) -> (i32, i32) {
    %c0_i32 = arith.constant 0 : i32
    %c0_i32_0 = arith.constant 0 : i32
    %c0_i32_1 = arith.constant 0 : i32
    return %c0_i32, %c0_i32_0 : i32, i32
  }
  func.func @transform_10(%arg0: i32) -> (i32, i32) {
    %c0_i32 = arith.constant 0 : i32
    %c0_i32_0 = arith.constant 0 : i32
    %c0_i32_1 = arith.constant 0 : i32
    return %c0_i32, %c0_i32_0 : i32, i32
  }
  func.func @transform_11(%arg0: i32) -> (i32, i32) {
    %c0_i32 = arith.constant 0 : i32
    %c0_i32_0 = arith.constant 0 : i32
    %c0_i32_1 = arith.constant 0 : i32
    return %c0_i32, %c0_i32_0 : i32, i32
  }
  func.func @transform_12(%arg0: i32) -> (i32, i32, i32) {
    %c0_i32 = arith.constant 0 : i32
    %c0_i32_0 = arith.constant 0 : i32
    %c0_i32_1 = arith.constant 0 : i32
    return %arg0, %c0_i32, %c0_i32_0 : i32, i32, i32
  }
}

</mosaic_0001>

<bundles_post_ra>
// kernel: forward.1
= control target key start
LH: loop header
LB: loop body
LE: loop exit
PB: predicated region body
PF: predicated region fallthrough
CT: control target
= control target key end

     0   :  { %s9801_s0 = inlined_call_operand.vmem [shape: f32[2,20,32], index: 0, kind: input, shape index: {}]   ;;  %s9802_s1 = inlined_call_operand.vmem [shape: f32[2,6,4], index: 1, kind: input, shape index: {}]   ;;  %s9803_s2 = inlined_call_operand.vmem [shape: f32[2,6,40], index: 2, kind: input, shape index: {}]   ;;  %s9804_s3 = inlined_call_operand.vmem [shape: f32[2,6,4], index: 3, kind: input, shape index: {}]   ;;  %s9805_s4 = inlined_call_operand.vmem [shape: f32[2,6,48], index: 4, kind: input, shape index: {}]   ;;  %s9806_s5 = inlined_call_operand.vmem [shape: f32[2,8,32], index: 5, kind: input, shape index: {}]   ;;  %s9807_s6 = inlined_call_operand.vmem [shape: f32[2,1,20], index: 6, kind: input, shape index: {}]   ;;  %s9808_s7 = inlined_call_operand.vmem [shape: f32[2,1,8], index: 7, kind: input, shape index: {}]   ;;  %s9809_s8 = inlined_call_operand.vmem [shape: f32[4,20,20], index: 8, kind: input, shape index: {}]   ;;  %s9810_s9 = inlined_call_operand.vmem [shape: f32[8,8], index: 9, kind: input, shape index: {}]   ;;  %s9811_s10 = inlined_call_operand.vmem [shape: bf16[992,96], index: 10, kind: input, shape index: {}]   ;;  %s9812_s11 = inlined_call_operand.vmem [shape: f32[40,96], index: 11, kind: input, shape index: {}]   ;;  %s9813_s12 = inlined_call_operand.hbm [shape: f32[2,8,64], index: 12, kind: output, shape index: {}]  }
   0x1   :  { %9833 = sst [smem:[#allocation9_spill]] %s9801_s0 }
   0x2   :  { %9834 = sst [smem:[#allocation10_spill]] %s9802_s1 }
   0x3   :  { %9835 = sst [smem:[#allocation11_spill]] %s9803_s2 }
   0x4   :  { %9836 = sst [smem:[#allocation12_spill]] %s9804_s3 }
   0x5   :  { %17 = vsyncpa [#allocation4], 0 }
   0x6   :  { %19 = vsyncpa [#allocation4 + $0x1], 0  ;;  %s8118_s21 = smov 0   ;;  %s8120_s22 = smov 0  }
   0x7   :  { %s8122_s23 = smov 0   ;;  %s8124_s24 = smov 0  }
   0x8 LB: > { %9837 = sst [smem:[#allocation6_spill]] %s8036_s23  ;;  %s8139_s25 = sadd.s32 4294967295, %s8040_s24   ;;  %s8040_s24 = sphi %s8124_s24, %s9854_s24   ;;  %s8036_s23 = sphi %s8122_s23, %s9856_s23   ;;  %s8032_s22 = sphi %s8120_s22, %s9858_s22   ;;  %s8028_s21 = sphi %s8118_s21, %s9857_s21  }
   0x9   : > { %s6503_s26 = sadd.s32 4294967294, %s8040_s24   ;;  %s8143_s27 = sadd.s32 1, %s8040_s24  }
   0xa   : > { %9838 = sst [smem:[#allocation7_spill]] %s8143_s27  ;;  %s324_s28 = sadd.s32 1, %s8036_s23 }
   0xb   : > { %s321_s29 = ssub.s32 %s8040_s24, %s8143_s27  ;;  %p334_p0 = scmp.ne.s32.totalorder %s8036_s23, %s8032_s22 }
   0xc   : > { %p322_p1 = scmp.eq.s32.totalorder %s321_s29, 0  ;;  %p335_p2 = scmp.eq.s32.totalorder %s8139_s25, 1 }
   0xd   : > { %p340_p3 = scmp.ne.s32.totalorder %s8032_s22, %s8028_s21  ;;  %p341_p4 = scmp.eq.s32.totalorder %s6503_s26, 1 }
   0xe   : > { %s8154_s30 = scalar_select %p322_p1, %s8036_s23, %s324_s28  }
   0xf   : > { %p8156_p5 = por %p335_p2, %p334_p0  ;;  %p8160_p6 = por %p341_p4, %p340_p3 }
  0x10   : > { %9839 = sst [smem:[#allocation8_spill]] %s8154_s30  ;;  %p6506_p7 = scmp.ge.s32.totalorder %s8040_s24, 1 }
  0x11   : > { %p426_p8 = scmp.lt.s32.totalorder %s8040_s24, 3 }
  0x13   : > { %p427_p9 = pnand %p6506_p7, %p426_p8 }
  0x14   : > { %v7708_v0 = vld [vmem:[%s9811_s10 + $0x20] sm:$0xff] (!%p427_p9)   ;;  %v8042_v1 = vmov (!%p427_p9), 0.0   ;;  %v608_v2 = vld [vmem:[%s9811_s10 + $0x38] sm:$0x3] (!%p427_p9)  ;;  %vm618_vm0 = vcmask (!%p427_p9), 1041408   ;;  %v7709_v4 = vld [vmem:[%s9811_s10 + $0x28] sm:$0xff] (!%p427_p9)  }
  0x15   : > { %430 = sbr.rel (%p427_p9) target bundleno = 13772 (0x35cc), region = 68  ;;  %6960 = vmatprep.subr.bf16.mxu0 (!%p427_p9), %v8042_v1  ;;  %6970 = vmatprep.subr.bf16.mxu1 (!%p427_p9), %v8042_v1  ;;  %v620_v3 = vsel (!%p427_p9), %vm618_vm0, %v608_v2, 0  ;;  %p494_p10 = scmp.lt.s32.totalorder (!%p427_p9), %s8139_s25, 1  ;;  %vm8043_vm1 = vmmov (!%p427_p9), 0   ;;  %v7711_v5 = vld [vmem:[%s9811_s10 + $0x30] ss:$0 sps:$4 sm:$0xff] (!%p427_p9)  }
  0x16   : > { %6961 = vmatpush3.bf16.msra.mxu0 (!%p427_p9), %v7708_v0  ;;  %6971 = vmatpush3.bf16.msra.mxu1 (!%p427_p9), %v620_v3  ;;  %vm563_vm2 = vcmask (!%p427_p9), 1043456   ;;  %s9842_s1 = sld [smem:[#allocation10_spill]] (!%p427_p9)  ;;  %vm614_vm3 = vcmask (!%p427_p9), 31744   ;;  %v7710_v8 = vld [vmem:[%s9811_s10] sm:$0xff] (!%p427_p9)   ;;  %s9843_s2 = sld [smem:[#allocation11_spill]] (!%p427_p9)  ;;  %vm559_vm4 = vcmask (!%p427_p9), 326656  }
  0x17   : > { %6962 = vmatprep.subr.bf16.mxu0 (!%p427_p9), %v8042_v1  ;;  %6972 = vmatprep.mubr.msk.bf16.mxu1 (!%p427_p9), %vm8043_vm1, %v8042_v1  ;;  %v565_v6 = vsel (!%p427_p9), %vm563_vm2, %v7711_v5, 0  ;;  %v768_v9 = vld [vmem:[%s9811_s10 + $0x18] sm:$0x3] (!%p427_p9)  ;;  %s9844_s3 = sld [smem:[#allocation12_spill]] (!%p427_p9)  ;;  %v7712_v13 = vld [vmem:[%s9811_s10 + $0x8] sm:$0xff] (!%p427_p9)   ;;  %vm723_vm5 = vcmask (!%p427_p9), 392192  }
  0x18   : > { %6976 = vmatprep.subr.bf16.mxu1 (!%p427_p9), %v8042_v1  ;;  %6966 = vmatprep.mubr.msk.bf16.mxu0 (!%p427_p9), %vm8043_vm1, %v8042_v1  ;;  %v778_v14 = vsel (!%p427_p9), %vm618_vm0, %v768_v9, 0  ;;  %v7713_v16 = vld [vmem:[%s9811_s10 + $0x10] sm:$0xff] (!%p427_p9)   ;;  %v6519_v20 = vld [vmem:[%s9812_s11 + $0x4] ss:$0 sm:$0xff] (!%p427_p9)  ;;  %v6514_v22 = vld [vmem:[%s9812_s11 + $0x3] ss:$0 sm:$0xff] (!%p427_p9) }
  0x19   : > { %vm663_vm6 = vcmask (!%p427_p9), 259072   ;;  %v6527_v35 = vld [vmem:[%s9812_s11 + $0x1] ss:$0 sm:$0xff] (!%p427_p9)  ;;  %v6522_v36 = vld [vmem:[%s9812_s11] ss:$0 sm:$0xff] (!%p427_p9)  ;;  %vm527_vm7 = vcmask (!%p427_p9), 261120  }
  0x1a   : > { %6963 = vmatpush3.bf16.msra.mxu0 (!%p427_p9), %v7709_v4  ;;  %s9845_s0 = sld [smem:[#allocation9_spill]] (!%p427_p9)  ;;  %vm891_vm8 = vcmask (!%p427_p9), 257024   ;;  %vm1030_vm9 = vcmask (!%p427_p9), 64512   ;;  %s9827_s29 = smov (!%p427_p9), 104   ;;  %vm1296_vm10 = vcmask (!%p427_p9), 158720   ;;  %vm1289_vm11 = vcmask (!%p427_p9), 162816  }
  0x1b   : > { %6964 = vmatprep.subr.bf16.mxu0 (!%p427_p9), %v8042_v1  ;;  %s9831_s16 = smov (!%p427_p9), 112   ;;  %s9817_s17 = smov (!%p427_p9), 96   ;;  %vm1718_vm12 = vcmask (!%p427_p9), 130048   ;;  %vm1722_vm13 = vcmask (!%p427_p9), 195584   ;;  %vm1942_vm14 = vcmask (!%p427_p9), 523264  }
  0x1c   : > { %s8184_s26 = scalar_select %p494_p10, %s8139_s25, 1 }
  0x1d   : > { %s9847_s28 = smov 64   ;;  %s9848_s19 = smov 8  }
  0x1e   : > { %s8192_s15 = sshll.u32 %s8184_s26, 3  ;;  %6965 = vmatpush3.bf16.msra.mxu0 %v565_v6  ;;  %s521_s23 = scalar_lea.vmem %s9807_s6, %s8184_s26 }
  0x1f   : > { %s502_s18 = scalar_lea.vmem %s9842_s1, %s8192_s15  ;;  %s506_s30 = scalar_lea.vmem %s9843_s2, %s8192_s15  ;;  %6986 = vmatprep.subr.bf16.mxu0 %v8042_v1 }
  0x20   : > { %v530_v7 = vld [vmem:[%s502_s18] sm:$0x3f]  ;;  %s510_s27 = scalar_lea.vmem %s9844_s3, %s8192_s15  ;;  %s9821_s18 = smov 16  }
  0x21   : > { %v607_v10 = vpack.c.bf16 %v530_v7, %v530_v7  ;;  %v531_v11 = vld [vmem:[%s506_s30] sm:$0x3f]  ;;  %s514_s30 = scalar_lea.vmem %s9805_s4, %s8192_s15  ;;  %s9846_s1 = smov 96  }
  0x22   : > { %v533_v12 = vpack.c.bf16 %v531_v11, %v531_v11  ;;  %v690_v15 = vld [vmem:[%s510_s27] sm:$0x3f]  ;;  %s9850_s20 = smov 24  }
  0x23   : > { %6973 = vmatmul.mubr.msk.bf16.vlgmr.msra.gmra.mrb[0].mxu1 %vm614_vm3, %v607_v10  ;;  %v691_v17 = vld [vmem:[%s514_s30] sm:$0x3f]  ;;  %v767_v18 = vpack.c.bf16 %v690_v15, %v690_v15  ;;  %s7568_s30 = smul.u32 24, %s8184_s26 }
  0x24   : > { %6977 = vmatpush3.bf16.msra.mxu1 %v7710_v8  ;;  %6982 = vmatprep.mubr.msk.bf16.mxu1 %vm8043_vm1, %v8042_v1  ;;  %v693_v19 = vpack.c.bf16 %v691_v17, %v691_v17  ;;  %v6521_v8 = vld [vmem:[%s9812_s11 + $0x5] ss:$0 sm:$0xff] }
  0x25   : > { %6978 = vmatprep.subr.bf16.mxu1 %v8042_v1  ;;  %6967 = vmatmul.mubr.msk.bf16.vlgmr.msra.gmra.mrb[0].mxu0 %vm559_vm4, %v533_v12  ;;  %s8254_s27 = scalar_lea.vmem %s9845_s0, %s7568_s30  ;;  %s9823_s30 = smov 8  }
  0x26   : > { %6987 = vmatpush3.bf16.msra.mxu0 %v778_v14  ;;  %6988 = vmatprep.mubr.msk.bf16.mxu0 %vm8043_vm1, %v8042_v1  ;;  %v526_v52 = vld [vmem:[%s8254_s27] sm:$0xff]  ;;  %v529_v12 = vld [vmem:[%s8254_s27 + $0x8] sm:$0x3f]  ;;  %s9853_s0 = smov 104  }
  0x27   : > { %528 = vst.msk [vmem:[#allocation2] sm:$0xff] %vm527_vm7, %v526_v52 }
  0x28   : > { %6979 = vmatpush3.bf16.msra.mxu1 %v7712_v13 }
  0x29   : > { %6980 = vmatprep.subr.bf16.mxu1 %v8042_v1 }
  0x2c   : > { %6981 = vmatpush3.bf16.msra.mxu1 %v7713_v16 }
  0x2d   : > { %6989 = vmatmul.mubr.msk.bf16.vlgmr.msra.gmra.mrb[4].mxu0 %vm614_vm3, %v767_v18  ;;  %v6529_v18 = vld [vmem:[%s9812_s11 + $0x2] ss:$0 sm:$0xff] }
  0x2e   : > { %v8258_v53 = vld [vmem:[#allocation2] sm:$0xff] }
  0x2f   : > { %6983 = vmatmul.mubr.msk.bf16.vlgmr.msra.gmra.mrb[4].mxu1 %vm723_vm5, %v693_v19  ;;  %v882_v54 = vmul.f32 %v8258_v53, %v8258_v53 }
  0x31   : > { %v885_v55 = vsel %vm527_vm7, %v882_v54, 0.0 }
  0xf6   : > { %v656_v21 = vpop.f32.mrb[0].mxu1 }
  0xf7   : > { %v6974_v23 = vpop.f32.mrb[1].mxu1  ;;  %v657_v26 = vadd.f32 %v6519_v20, %v656_v21 }
  0xf8   : > { %v659_v24 = vpop.f32.mrb[2].mxu1  ;;  %v601_v25 = vpop.f32.mrb[0].mxu0 }
  0xf9   : > { %v6975_v27 = vpop.f32.mrb[3].mxu1  ;;  %v602_v28 = vadd.f32 %v6514_v22, %v601_v25  ;;  %v6968_v29 = vpop.f32.mrb[1].mxu0  ;;  %v677_v34 = vmul.f32 %v657_v26, %v657_v26  ;;  %v689_v22 = vld [vmem:[%s8254_s27 + $0xe] sm:$0x3f]  ;;  %s9829_s27 = smov 120  }
  0xfa   : > { %v604_v30 = vpop.f32.mrb[2].mxu0 }
  0xfb   : > { %v6969_v31 = vpop.f32.mrb[3].mxu0  ;;  %v662_v32 = vmul.f32 %v602_v28, %v602_v28  ;;  %v678_v40 = vsel %vm663_vm6, %v677_v34, 0.0 }
  0xfc   : > { %v7714_v31 = vld [vmem:[%s9811_s10 + $0x40] sm:$0xff]  }
  0xfd   : > { %v664_v33 = vsel %vm663_vm6, %v662_v32, 0.0  ;;  %6992 = vmatprep.subr.bf16.mxu1 %v7714_v31  ;;  %v7715_v32 = vld [vmem:[%s9811_s10 + $0x48] sm:$0xff]  }
  0xfe   : > { %665 = vadd.xlane.f32.xlu0 %v664_v33  ;;  %6993 = vmatpush3.bf16.msra.mxu1 %v7714_v31 }
  0xff   : > { %6994 = vmatprep.subr.bf16.mxu1 %v7715_v32 }
 0x100   : > { %v814_v37 = vpop.f32.mrb[4].mxu0 }
 0x101   : > { %v815_v38 = vadd.f32 %v6527_v35, %v814_v37  ;;  %v6990_v39 = vpop.f32.mrb[5].mxu0 }
 0x102   : > { %v761_v41 = vpop.f32.mrb[4].mxu1  ;;  %v817_v42 = vpop.f32.mrb[6].mxu0  ;;  %679 = vadd.xlane.f32.xlu0 %v678_v40  ;;  %6995 = vmatpush3.bf16.msra.mxu1 %v7715_v32 }
 0x103   : > { %v762_v43 = vadd.f32 %v6522_v36, %v761_v41  ;;  %v6984_v44 = vpop.f32.mrb[5].mxu1  ;;  %v6991_v45 = vpop.f32.mrb[7].mxu0  ;;  %v833_v49 = vmul.f32 %v815_v38, %v815_v38 }
 0x104   : > { %v764_v46 = vpop.f32.mrb[6].mxu1  ;;  %v6530_v45 = vld [vmem:[%s9812_s11 + $0x6] ss:$0 sm:$0xff] }
 0x105   : > { %v6985_v47 = vpop.f32.mrb[7].mxu1  ;;  %v820_v48 = vmul.f32 %v762_v43, %v762_v43  ;;  %v834_v51 = vsel %vm663_vm6, %v833_v49, 0.0 }
 0x106   : > { %886 = vadd.xlane.f32.xlu0 %v885_v55 }
 0x107   : > { %v821_v50 = vsel %vm663_vm6, %v820_v48, 0.0 }
 0x108   : > { %822 = vadd.xlane.f32.xlu1 %v821_v50 }
 0x10c   : > { %835 = vadd.xlane.f32.xlu1 %v834_v51 }
 0x18b   : > { %v666_v56 = vpop.xlane.xlu0 %665 }
 0x18c   : > { %v668_v57 = vmul.f32 0.03125, %v666_v56 }
 0x18e   : > { %v669_v58 = vadd.f32 1e-06, %v668_v57 }
 0x18f   : > { %v680_v59 = vpop.xlane.xlu0 %679 }
 0x190   : > { %7768 = vrsqrt.f32 %v669_v58  ;;  %v681_v60 = vmul.f32 0.03125, %v680_v59 }
 0x192   : > { %v682_v61 = vadd.f32 1e-06, %v681_v60 }
 0x193   : > { %v887_v33 = vpop.xlane.xlu0 %886 }
 0x194   : > { %7770 = vrsqrt.f32 %v682_v61  ;;  %v895_v34 = vmul.f32 0.03125, %v887_v33 }
 0x195   : > { %v823_v62 = vpop.xlane.xlu1 %822 }
 0x196   : > { %v824_v63 = vmul.f32 0.03125, %v823_v62  ;;  %v898_v35 = vadd.f32 1e-06, %v895_v34 }
 0x198   : > { %v825_v0 = vadd.f32 1e-06, %v824_v63 }
 0x199   : > { %v836_v2 = vpop.xlane.xlu1 %835 }
 0x19a   : > { %v7769_v3 = vpop.eup %7768  ;;  %7772 = vrsqrt.f32 %v825_v0  ;;  %v837_v4 = vmul.f32 0.03125, %v836_v2 }
 0x19b   : > { %v671_v6 = vmul.f32 %v7769_v3, %v602_v28 }
 0x19c   : > { %v838_v5 = vadd.f32 1e-06, %v837_v4 }
 0x19d   : > { %v676_v10 = vmul.f32 %v6521_v8, %v671_v6 }
 0x19e   : > { %v7771_v7 = vpop.eup %7770  ;;  %7774 = vrsqrt.f32 %v838_v5 }
 0x19f   : > { %v684_v9 = vmul.f32 %v7771_v7, %v657_v26  ;;  %7776 = vrsqrt.f32 %v898_v35  ;;  %v864_v35 = vlaneseq }
 0x1a1   : > { %v685_v11 = vmul.f32 %v6521_v8, %v684_v9 }
 0x1a3   : > { %v686_v13 = vadd.f32 %v685_v11, %v676_v10 }
 0x1a4   : > { %v7773_v14 = vpop.eup %7772 }
 0x1a5   : > { %v687_v15 = vadd.f32 %v686_v13, %v529_v12  ;;  %v827_v16 = vmul.f32 %v7773_v14, %v762_v43 }
 0x1a7   : > { %688 = vst.msk [vmem:[#allocation2 + $0x8] sm:$0x3f] %vm663_vm6, %v687_v15  ;;  %v832_v20 = vmul.f32 %v6529_v18, %v827_v16 }
 0x1a8   : > { %v7775_v17 = vpop.eup %7774 }
 0x1a9   : > { %v840_v19 = vmul.f32 %v7775_v17, %v815_v38  ;;  %v7777_v42 = vpop.eup %7776 }
 0x1aa   : > { %v904_v43 = vmul.f32 %v7777_v42, %v8258_v53  ;;  %v853_v42 = vld [vmem:[%s9809_s8 + $0x10] sm:$0xf] }
 0x1ab   : > { %v841_v21 = vmul.f32 %v6529_v18, %v840_v19 }
 0x1ac   : > { %v911_v49 = vmul.f32 %v6530_v45, %v904_v43  ;;  %v851_v43 = vld [vmem:[%s9809_s8] sm:$0xff] }
 0x1ad   : > { %v842_v23 = vadd.f32 %v841_v21, %v832_v20 }
 0x1af   : > { %v843_v24 = vadd.f32 %v842_v23, %v689_v22 }
 0x1b1   : > { %844 = vst.msk [vmem:[#allocation2 + $0xe] sm:$0x3f] %vm663_vm6, %v843_v24 }
 0x1b8   : > { %v8273_v25 = vld [vmem:[#allocation2 + $0x8] sm:$0xff]  ;;  %v8275_v26 = vld [vmem:[#allocation2 + $0x10] sm:$0xf] }
 0x1b9   : > { %v883_v27 = vmul.f32 %v8273_v25, %v8273_v25  ;;  %v884_v28 = vmul.f32 %v8275_v26, %v8275_v26 }
 0x1bb   : > { %v888_v29 = vsel %vm527_vm7, %v883_v27, 0.0  ;;  %v892_v30 = vsel %vm891_vm8, %v884_v28, 0.0 }
 0x1bc   : > { %889 = vadd.xlane.f32.xlu1 %v888_v29  ;;  %893 = vadd.xlane.f32.xlu0 %v892_v30 }
 0x249   : > { %v890_v36 = vpop.xlane.xlu1 %889  ;;  %v894_v37 = vpop.xlane.xlu0 %893 }
 0x24a   : > { %v896_v38 = vmul.f32 0.03125, %v890_v36  ;;  %v897_v39 = vmul.f32 0.03125, %v894_v37  ;;  %v848_v36 = vld [vmem:[%s521_s23] sm:$0x1]  ;;  %s9825_s23 = smov 64  }
 0x24b   : > { %v849_v37 = vsub.f32 1.0, %v848_v36 }
 0x24c   : > { %v899_v40 = vadd.f32 1e-06, %v896_v38  ;;  %v900_v41 = vadd.f32 1e-06, %v897_v39  ;;  %v8371_v38 = vshrl.u32 %v864_v35, 7 }
 0x24d   : > { %v850_v39 = vmul.f32 -1e+09, %v849_v37  ;;  %v860_v37 = vld [vmem:[%s9809_s8 + $0x48] sm:$0xff] }
 0x24e   : > { %7778 = vrsqrt.f32 %v899_v40  ;;  %v866_v40 = vsub.s32 0, %v8371_v38 }
 0x24f   : > { %7780 = vrsqrt.f32 %v900_v41 }
 0x250   : > { %v8376_v41 = vrot.slane %v850_v39, %v866_v40  ;;  %v862_v39 = vld [vmem:[%s9809_s8 + $0x58] sm:$0xf] }
 0x258   : > { %v7779_v44 = vpop.eup %7778 }
 0x259   : > { %v7781_v46 = vpop.eup %7780  ;;  %v905_v47 = vmul.f32 %v7779_v44, %v8273_v25  ;;  %v8385_v44 = vadd.f32 %v8376_v41, %v853_v42  ;;  %v8482_v42 = vadd.f32 %v8376_v41, %v860_v37 }
 0x25a   : > { %v906_v48 = vmul.f32 %v7781_v46, %v8275_v26  ;;  %v8391_v46 = vadd.f32 %v8376_v41, %v851_v43 }
 0x25b   : > { %v912_v50 = vmul.f32 %v6530_v45, %v905_v47 }
 0x25c   : > { %v913_v51 = vmul.f32 %v6530_v45, %v906_v48  ;;  %v852_v45 = vld [vmem:[%s9809_s8 + $0x8] sm:$0xff] }
 0x25d   : > { %v914_v52 = vpack.c.bf16 %v912_v50, %v911_v49  ;;  %v8394_v48 = vadd.f32 %v8376_v41, %v852_v45  ;;  %v8487_v45 = vadd.f32 %v8376_v41, %v862_v39 }
 0x25e   : > { %v915_v54 = vpack.c.bf16 %v913_v51, %v913_v51 }
 0x25f   : > { %6996 = vmatprep.mubr.msk.bf16.mxu1 %vm527_vm7, %v914_v52 }
 0x260   : > { %6997 = vmatmul.mubr.msk.bf16.vlgmr.msra.gmra.mrb[8].mxu1 %vm527_vm7, %v915_v54 }
 0x333   : > { %v6998_v55 = vpop.f32.mrb[8].mxu1 }
 0x334   : > { %993 = vrot.lane.b32.xlu0 %v6998_v55, %s9829_s27  ;;  %v972_v56 = vpop.f32.mrb[9].mxu1  ;;  %v8309_v61 = vpack.c.bf16 %v6998_v55, %v6998_v55 }
 0x335   : > { %v6999_v57 = vpop.f32.mrb[10].mxu1 }
 0x336   : > { %v975_v58 = vpop.f32.mrb[11].mxu1 }
 0x337   : > { %v8298_v59 = vpack.c.bf16 %v975_v58, %v972_v56  ;;  %v7618_v60 = vpack.i.bf16 %v975_v58, %v972_v56 }
 0x338   : > { %1011 = vrot.lane.b32.xlu0 %v6998_v55, %s9827_s29 }
 0x339   : > { %7619 = vrot.lane.b32.xlu1 %v7618_v60, %s9829_s27  ;;  %7004 = vmatprep.mubr.msk.bf16.mxu0 %vm1030_vm9, %v8298_v59 }
 0x33d   : > { %7624 = vrot.lane.b32.xlu1 %v7618_v60, %s9831_s16 }
 0x341   : > { %7629 = vrot.lane.b32.xlu1 %v7618_v60, %s9827_s29  ;;  %v856_v60 = vld [vmem:[%s9809_s8 + $0x28] sm:$0xf] }
 0x345   : > { %1002 = vrot.lane.b32.xlu1 %v6998_v55, %s9831_s16 }
 0x349   : > { %1026 = vrot.lane.b32.xlu1 %v8298_v59, %s9817_s17 }
 0x34d   : > { %1028 = vrot.lane.b32.xlu1 %v8309_v61, %s9817_s17 }
 0x3a6   : > { %v994_v3 = vpop.permute.xlu0 %993 }
 0x3a7   : > { %v8319_v7 = vpack.c.bf16 %v994_v3, %v994_v3 }
 0x3aa   : > { %v1012_v13 = vpop.permute.xlu0 %1011 }
 0x3ab   : > { %v7620_v62 = vpop.permute.xlu1 %7619  ;;  %v8333_v16 = vpack.c.bf16 %v1012_v13, %v1012_v13 }
 0x3ac   : > { %v7622_v63 = vunpack.i.h.bf16 %v7620_v62  ;;  %v7621_v0 = vunpack.i.l.bf16 %v7620_v62  ;;  %v854_v62 = vld [vmem:[%s9809_s8 + $0x18] sm:$0xff] }
 0x3ad   : > { %v8424_v3 = vadd.f32 %v8376_v41, %v854_v62 }
 0x3ae   : > { %v8313_v2 = vpack.c.bf16 %v7622_v63, %v7621_v0  ;;  %v8418_v63 = vadd.f32 %v8376_v41, %v856_v60  ;;  %v859_v0 = vld [vmem:[%s9809_s8 + $0x40] sm:$0xf] }
 0x3af   : > { %v7625_v4 = vpop.permute.xlu1 %7624 }
 0x3b0   : > { %v7627_v5 = vunpack.i.h.bf16 %v7625_v4  ;;  %v7626_v6 = vunpack.i.l.bf16 %v7625_v4  ;;  %1093 = vrot.lane.b32.xlu0 %v8313_v2, %s9817_s17  ;;  %7012 = vmatprep.mubr.msk.bf16.mxu1 %vm1030_vm9, %v8313_v2 }
 0x3b2   : > { %v8321_v8 = vpack.c.bf16 %v7627_v5, %v7626_v6  ;;  %v857_v5 = vld [vmem:[%s9809_s8 + $0x30] sm:$0xff] }
 0x3b3   : > { %v7630_v9 = vpop.permute.xlu1 %7629 }
 0x3b4   : > { %v7632_v10 = vunpack.i.h.bf16 %v7630_v9  ;;  %v7631_v11 = vunpack.i.l.bf16 %v7630_v9  ;;  %1095 = vrot.lane.b32.xlu0 %v8319_v7, %s9817_s17  ;;  %1159 = vrot.lane.b32.xlu1 %v8321_v8, %s9817_s17 }
 0x3b6   : > { %v8327_v12 = vpack.c.bf16 %v7632_v10, %v7631_v11  ;;  %v8433_v10 = vadd.f32 %v8376_v41, %v859_v0  ;;  %v858_v11 = vld [vmem:[%s9809_s8 + $0x38] sm:$0xff] }
 0x3b7   : > { %v1003_v14 = vpop.permute.xlu1 %1002 }
 0x3b8   : > { %v8329_v15 = vpack.c.bf16 %v1003_v14, %v1003_v14  ;;  %1225 = vrot.lane.b32.xlu0 %v8327_v12, %s9817_s17 }
 0x3ba   : > { %1161 = vrot.lane.b32.xlu1 %v8329_v15, %s9817_s17 }
 0x3bb   : > { %v1027_v17 = vpop.permute.xlu1 %1026 }
 0x3bc   : > { %1227 = vrot.lane.b32.xlu0 %v8333_v16, %s9817_s17  ;;  %7544 = vmatprep.subr.msk.bf16.mxu0 %vm1030_vm9, %v1027_v17  ;;  %v1038_v18 = vsel %vm1030_vm9, %v1027_v17, 0  ;;  %s9819_s17 = smov 24  }
 0x3bd   : > { %7001 = vmatpush3.bf16.xpose.msra.mxu0 %v1038_v18 }
 0x3bf   : > { %v1029_v19 = vpop.permute.xlu1 %1028 }
 0x3c0   : > { %7545 = vmatprep.subr.msk.bf16.mxu0 %vm1030_vm9, %v1029_v19  ;;  %v1041_v20 = vsel %vm1030_vm9, %v1029_v19, 0  ;;  %v8444_v19 = vadd.f32 %v8376_v41, %v857_v5  ;;  %v861_v5 = vld [vmem:[%s9809_s8 + $0x50] sm:$0xff] }
 0x3c5   : > { %7003 = vmatpush3.bf16.xpose.msra.mxu0 %v1041_v20  ;;  %v855_v20 = vld [vmem:[%s9809_s8 + $0x20] sm:$0xff] }
 0x3cc   : > { %7005 = vmatmul.mubr.msk.bf16.vlgmr.msra.gmra.mrb[8].mxu0 %vm1030_vm9, %v8309_v61 }
 0x3cd   : > { %7020 = vmatprep.mubr.msk.bf16.mxu0 %vm1030_vm9, %v8321_v8 }
 0x422   : > { %v1094_v21 = vpop.permute.xlu0 %1093 }
 0x423   : > { %7546 = vmatprep.subr.msk.bf16.mxu1 %vm1030_vm9, %v1094_v21  ;;  %v1104_v22 = vsel %vm1030_vm9, %v1094_v21, 0 }
 0x424   : > { %7009 = vmatpush3.bf16.xpose.msra.mxu1 %v1104_v22  ;;  %v8450_v22 = vadd.f32 %v8376_v41, %v858_v11 }
 0x426   : > { %v1096_v23 = vpop.permute.xlu0 %1095  ;;  %v1160_v24 = vpop.permute.xlu1 %1159 }
 0x427   : > { %7547 = vmatprep.subr.msk.bf16.mxu1 %vm1030_vm9, %v1096_v23  ;;  %7548 = vmatprep.subr.msk.bf16.mxu0 %vm1030_vm9, %v1160_v24  ;;  %v1170_v27 = vsel %vm1030_vm9, %v1160_v24, 0  ;;  %v1107_v28 = vsel %vm1030_vm9, %v1096_v23, 0 }
 0x428   : > { %7017 = vmatpush3.bf16.xpose.msra.mxu0 %v1170_v27 }
 0x42a   : > { %v1226_v29 = vpop.permute.xlu0 %1225 }
 0x42b   : > { %v1236_v32 = vsel %vm1030_vm9, %v1226_v29, 0 }
 0x42c   : > { %7011 = vmatpush3.bf16.xpose.msra.mxu1 %v1107_v28  ;;  %v1162_v30 = vpop.permute.xlu1 %1161  ;;  %v8456_v28 = vadd.f32 %v8376_v41, %v855_v20 }
 0x42d   : > { %7549 = vmatprep.subr.msk.bf16.mxu0 %vm1030_vm9, %v1162_v30  ;;  %7550 = vmatprep.subr.msk.bf16.mxu1 %vm1030_vm9, %v1226_v29  ;;  %v1173_v31 = vsel %vm1030_vm9, %v1162_v30, 0 }
 0x42e   : > { %v1228_v33 = vpop.permute.xlu0 %1227 }
 0x42f   : > { %v1239_v34 = vsel %vm1030_vm9, %v1228_v33, 0 }
 0x430   : > { %7019 = vmatpush3.bf16.xpose.msra.mxu0 %v1173_v31 }
 0x433   : > { %7013 = vmatmul.mubr.msk.bf16.vlgmr.msra.gmra.mrb[12].mxu1 %vm1030_vm9, %v8319_v7 }
 0x434   : > { %7025 = vmatpush3.bf16.xpose.msra.mxu1 %v1236_v32  ;;  %7028 = vmatprep.mubr.msk.bf16.mxu1 %vm1030_vm9, %v8327_v12 }
 0x435   : > { %7551 = vmatprep.subr.msk.bf16.mxu1 %vm1030_vm9, %v1228_v33 }
 0x437   : > { %7021 = vmatmul.mubr.msk.bf16.vlgmr.msra.gmra.mrb[12].mxu0 %vm1030_vm9, %v8329_v15 }
 0x43c   : > { %7027 = vmatpush3.bf16.xpose.msra.mxu1 %v1239_v34 }
 0x443   : > { %7029 = vmatmul.mubr.msk.bf16.vlgmr.msra.gmra.mrb[16].mxu1 %vm1030_vm9, %v8333_v16 }
 0x49f   : > { %v7006_v47 = vpop.f32.mrb[8].mxu0 }
 0x4a0   : > { %v8397_v49 = vadd.f32 %v7006_v47, %v8385_v44  ;;  %v1077_v50 = vpop.f32.mrb[9].mxu0 }
 0x4a1   : > { %v8400_v51 = vadd.f32 %v1077_v50, %v8391_v46  ;;  %v7007_v52 = vpop.f32.mrb[10].mxu0 }
 0x4a2   : > { %v1080_v54 = vpop.f32.mrb[11].mxu0  ;;  %v1297_v55 = vsel %vm1296_vm10, %v8397_v49, -inf }
 0x4a3   : > { %v8405_v56 = vadd.f32 %v1080_v54, %v8394_v48  ;;  %1298 = vmax.xlane.f32.xlu0 %v1297_v55  ;;  %v1290_v57 = vsel %vm1289_vm11, %v8400_v51, -inf }
 0x4a4   : > { %1291 = vmax.xlane.f32.xlu1 %v1290_v57 }
 0x4a5   : > { %v1293_v58 = vsel %vm1289_vm11, %v8405_v56, -inf }
 0x4a7   : > { %1294 = vmax.xlane.f32.xlu0 %v1293_v58 }
 0x506   : > { %v7014_v4 = vpop.f32.mrb[12].mxu1 }
 0x507   : > { %v8430_v6 = vadd.f32 %v7014_v4, %v8418_v63  ;;  %v1143_v9 = vpop.f32.mrb[13].mxu1 }
 0x508   : > { %v7015_v13 = vpop.f32.mrb[14].mxu1  ;;  %v8439_v14 = vadd.f32 %v1143_v9, %v8424_v3  ;;  %v8512_v9 = vadd.f32 %v8376_v41, %v861_v5 }
 0x509   : > { %v1146_v17 = vpop.f32.mrb[15].mxu1  ;;  %v1306_v18 = vsel %vm1296_vm10, %v8430_v6, -inf }
 0x50a   : > { %v7022_v21 = vpop.f32.mrb[12].mxu0  ;;  %1307 = vmax.xlane.f32.xlu0 %v1306_v18  ;;  %v1300_v31 = vsel %vm1289_vm11, %v8439_v14, -inf  ;;  %v8471_v35 = vadd.f32 %v1146_v17, %v8456_v28 }
 0x50b   : > { %v8453_v23 = vadd.f32 %v7022_v21, %v8433_v10  ;;  %v1209_v24 = vpop.f32.mrb[13].mxu0 }
 0x50c   : > { %v7023_v27 = vpop.f32.mrb[14].mxu0  ;;  %v8459_v29 = vadd.f32 %v1209_v24, %v8444_v19  ;;  %v1303_v43 = vsel %vm1289_vm11, %v8471_v35, -inf }
 0x50d   : > { %v1212_v30 = vpop.f32.mrb[15].mxu0  ;;  %v1315_v32 = vsel %vm1296_vm10, %v8453_v23, -inf }
 0x50e   : > { %v8466_v33 = vadd.f32 %v1212_v30, %v8450_v22  ;;  %1301 = vmax.xlane.f32.xlu0 %v1300_v31  ;;  %1316 = vmax.xlane.f32.xlu1 %v1315_v32  ;;  %v1309_v36 = vsel %vm1289_vm11, %v8459_v29, -inf }
 0x510   : > { %v1312_v34 = vsel %vm1289_vm11, %v8466_v33, -inf }
 0x512   : > { %1313 = vmax.xlane.f32.xlu0 %v1312_v34  ;;  %1310 = vmax.xlane.f32.xlu1 %v1309_v36 }
 0x516   : > { %v7030_v47 = vpop.f32.mrb[16].mxu1  ;;  %1304 = vmax.xlane.f32.xlu1 %v1303_v43 }
 0x517   : > { %v1275_v50 = vpop.f32.mrb[17].mxu1  ;;  %v8493_v57 = vadd.f32 %v7030_v47, %v8487_v45 }
 0x518   : > { %v8490_v52 = vadd.f32 %v1275_v50, %v8482_v42  ;;  %v7031_v54 = vpop.f32.mrb[18].mxu1 }
 0x519   : > { %v1278_v55 = vpop.f32.mrb[19].mxu1  ;;  %v1324_v60 = vsel %vm1296_vm10, %v8493_v57, -inf }
 0x51a   : > { %v1318_v58 = vsel %vm1289_vm11, %v8490_v52, -inf }
 0x51b   : > { %1319 = vmax.xlane.f32.xlu0 %v1318_v58 }
 0x51f   : > { %1325 = vmax.xlane.f32.xlu0 %v1324_v60 }
 0x527   : > { %1431 = vrot.lane.b32.xlu1 %v8298_v59, %s9825_s23 }
 0x52b   : > { %1433 = vrot.lane.b32.xlu1 %v8309_v61, %s9825_s23  ;;  %v8515_v61 = vadd.f32 %v1278_v55, %v8512_v9 }
 0x530   : > { %v1299_v62 = vpop.xlane.xlu0 %1298 }
 0x531   : > { %v1329_v11 = vsub.f32 %v8397_v49, %v1299_v62  ;;  %v1292_v13 = vpop.xlane.xlu1 %1291 }
 0x532   : > { %v1327_v18 = vsub.f32 %v8400_v51, %v1292_v13 }
 0x533   : > { %v1343_v17 = vmul.f32 1.442695, %v1329_v11 }
 0x534   : > { %v1295_v0 = vpop.xlane.xlu0 %1294  ;;  %v1339_v20 = vmul.f32 1.442695, %v1327_v18 }
 0x535   : > { %1493 = vrot.lane.b32.xlu0 %v8313_v2, %s9825_s23  ;;  %v1328_v4 = vsub.f32 %v8405_v56, %v1295_v0  ;;  %v1321_v2 = vsel %vm1289_vm11, %v8515_v61, -inf }
 0x537   : > { %v1341_v59 = vmul.f32 1.442695, %v1328_v4 }
 0x539   : > { %1617 = vrot.lane.b32.xlu0 %v8327_v12, %s9825_s23  ;;  %7782 = vpow2.f32 %v1341_v59 }
 0x53a   : > { %7784 = vpow2.f32 %v1343_v17 }
 0x53b   : > { %7786 = vpow2.f32 %v1339_v20 }
 0x543   : > { %v8519_v12 = vpop.eup %7782 }
 0x544   : > { %v1366_v56 = vsel %vm1289_vm11, %v8519_v12, 0.0  ;;  %v8529_v21 = vpop.eup %7784 }
 0x545   : > { %v1369_v24 = vsel %vm1296_vm10, %v8529_v21, 0.0  ;;  %v8533_v27 = vpop.eup %7786 }
 0x54f   : > { %1322 = vmax.xlane.f32.xlu1 %v1321_v2 }
 0x558   : > { %1367 = vadd.xlane.f32.xlu0 %v1366_v56 }
 0x560   : > { %1495 = vrot.lane.b32.xlu1 %v8319_v7, %s9825_s23  ;;  %v1363_v7 = vsel %vm1289_vm11, %v8533_v27, 0.0 }
 0x564   : > { %1555 = vrot.lane.b32.xlu1 %v8321_v8, %s9825_s23 }
 0x588   : > { %1370 = vadd.xlane.f32.xlu1 %v1369_v24 }
 0x58c   : > { %1364 = vadd.xlane.f32.xlu1 %v1363_v7 }
 0x597   : > { %v1308_v8 = vpop.xlane.xlu0 %1307 }
 0x598   : > { %v1332_v49 = vsub.f32 %v8430_v6, %v1308_v8 }
 0x59a   : > { %v1349_v30 = vmul.f32 1.442695, %v1332_v49 }
 0x59b   : > { %v1302_v51 = vpop.xlane.xlu0 %1301  ;;  %v1317_v31 = vpop.xlane.xlu1 %1316 }
 0x59c   : > { %7788 = vpow2.f32 %v1349_v30  ;;  %v1330_v32 = vsub.f32 %v8439_v14, %v1302_v51  ;;  %v1335_v34 = vsub.f32 %v8453_v23, %v1317_v31 }
 0x59e   : > { %v1345_v36 = vmul.f32 1.442695, %v1330_v32  ;;  %v1355_v37 = vmul.f32 1.442695, %v1335_v34 }
 0x59f   : > { %v1314_v39 = vpop.xlane.xlu0 %1313  ;;  %v1311_v43 = vpop.xlane.xlu1 %1310 }
 0x5a0   : > { %7790 = vpow2.f32 %v1345_v36  ;;  %v1334_v47 = vsub.f32 %v8466_v33, %v1314_v39  ;;  %v1333_v50 = vsub.f32 %v8459_v29, %v1311_v43 }
 0x5a1   : > { %7792 = vpow2.f32 %v1355_v37 }
 0x5a2   : > { %v1353_v54 = vmul.f32 1.442695, %v1334_v47  ;;  %v1351_v6 = vmul.f32 1.442695, %v1333_v50 }
 0x5a3   : > { %v1305_v55 = vpop.xlane.xlu1 %1304 }
 0x5a4   : > { %7794 = vpow2.f32 %v1353_v54  ;;  %v1331_v58 = vsub.f32 %v8471_v35, %v1305_v55 }
 0x5a5   : > { %7796 = vpow2.f32 %v1351_v6 }
 0x5a6   : > { %v8543_v14 = vpop.eup %7788  ;;  %v1347_v23 = vmul.f32 1.442695, %v1331_v58 }
 0x5a7   : > { %v1432_v60 = vpop.permute.xlu1 %1431  ;;  %v1378_v62 = vsel %vm1296_vm10, %v8543_v14, 0.0 }
 0x5a8   : > { %7798 = vpow2.f32 %v1347_v23  ;;  %1379 = vadd.xlane.f32.xlu0 %v1378_v62  ;;  %v1320_v33 = vpop.xlane.xlu0 %1319  ;;  %7032 = vmatprep.subr.bf16.mxu0 %v1432_v60 }
 0x5a9   : > { %7033 = vmatpush3.bf16.msra.mxu0 %v1432_v60  ;;  %v1336_v4 = vsub.f32 %v8490_v52, %v1320_v33 }
 0x5aa   : > { %v8547_v29 = vpop.eup %7790 }
 0x5ab   : > { %v8549_v0 = vpop.eup %7792  ;;  %v1434_v35 = vpop.permute.xlu1 %1433  ;;  %v1372_v5 = vsel %vm1289_vm11, %v8547_v29, 0.0  ;;  %v1357_v17 = vmul.f32 1.442695, %v1336_v4 }
 0x5ac   : > { %1373 = vadd.xlane.f32.xlu0 %v1372_v5  ;;  %v1326_v59 = vpop.xlane.xlu0 %1325  ;;  %v1387_v2 = vsel %vm1296_vm10, %v8549_v0, 0.0  ;;  %7552 = vmatprep.subr.msk.bf16.mxu0 %vm618_vm0, %v1434_v35  ;;  %v1443_v56 = vsel %vm618_vm0, %v1434_v35, 0 }
 0x5ad   : > { %v1338_v11 = vsub.f32 %v8493_v57, %v1326_v59  ;;  %1388 = vadd.xlane.f32.xlu1 %v1387_v2  ;;  %7035 = vmatpush3.bf16.msra.mxu0 %v1443_v56 }
 0x5ae   : > { %v8559_v13 = vpop.eup %7794 }
 0x5af   : > { %v8561_v52 = vpop.eup %7796  ;;  %v1361_v18 = vmul.f32 1.442695, %v1338_v11  ;;  %v1384_v20 = vsel %vm1289_vm11, %v8559_v13, 0.0 }
 0x5b0   : > { %1385 = vadd.xlane.f32.xlu0 %v1384_v20  ;;  %v1494_v24 = vpop.permute.xlu0 %1493  ;;  %v1381_v7 = vsel %vm1289_vm11, %v8561_v52, 0.0 }
 0x5b1   : > { %7800 = vpow2.f32 %v1361_v18  ;;  %1382 = vadd.xlane.f32.xlu1 %v1381_v7  ;;  %7040 = vmatprep.subr.bf16.mxu1 %v1494_v24 }
 0x5b2   : > { %v8567_v57 = vpop.eup %7798  ;;  %7041 = vmatpush3.bf16.msra.mxu1 %v1494_v24  ;;  %7802 = vpow2.f32 %v1357_v17 }
 0x5b3   : > { %v1375_v8 = vsel %vm1289_vm11, %v8567_v57, 0.0 }
 0x5b4   : > { %v1618_v43 = vpop.permute.xlu0 %1617 }
 0x5b5   : > { %1376 = vadd.xlane.f32.xlu1 %v1375_v8 }
 0x5bb   : > { %v8571_v49 = vpop.eup %7800 }
 0x5bc   : > { %v1396_v30 = vsel %vm1296_vm10, %v8571_v49, 0.0  ;;  %v8575_v51 = vpop.eup %7802 }
 0x5bd   : > { %1397 = vadd.xlane.f32.xlu0 %v1396_v30  ;;  %v1390_v31 = vsel %vm1289_vm11, %v8575_v51, 0.0 }
 0x5c1   : > { %1391 = vadd.xlane.f32.xlu0 %v1390_v31 }
 0x5d7   : > { %1619 = vrot.lane.b32.xlu0 %v8333_v16, %s9825_s23 }
 0x5dc   : > { %v1323_v32 = vpop.xlane.xlu1 %1322 }
 0x5dd   : > { %v1337_v34 = vsub.f32 %v8515_v61, %v1323_v32 }
 0x5df   : > { %v1359_v36 = vmul.f32 1.442695, %v1337_v34 }
 0x5e0   : > { %v1496_v37 = vpop.permute.xlu1 %1495 }
 0x5e1   : > { %7804 = vpow2.f32 %v1359_v36  ;;  %7553 = vmatprep.subr.msk.bf16.mxu1 %vm618_vm0, %v1496_v37  ;;  %v1505_v39 = vsel %vm618_vm0, %v1496_v37, 0 }
 0x5e2   : > { %7043 = vmatpush3.bf16.msra.mxu1 %v1505_v39 }
 0x5e3   : > { %7056 = vmatprep.subr.bf16.mxu1 %v1618_v43 }
 0x5e4   : > { %v1556_v47 = vpop.permute.xlu1 %1555 }
 0x5e5   : > { %7048 = vmatprep.subr.bf16.mxu0 %v1556_v47  ;;  %v1368_v61 = vpop.xlane.xlu0 %1367 }
 0x5eb   : > { %v8584_v50 = vpop.eup %7804 }
 0x5ec   : > { %v1393_v16 = vsel %vm1289_vm11, %v8584_v50, 0.0 }
 0x5ed   : > { %1394 = vadd.xlane.f32.xlu1 %v1393_v16 }
 0x5fe   : > { %1557 = vrot.lane.b32.xlu1 %v8329_v15, %s9825_s23 }
 0x615   : > { %v1371_v54 = vpop.xlane.xlu1 %1370 }
 0x616   : > { %7806 = vrcp.f32 %v1371_v54 }
 0x617   : > { %7808 = vrcp.f32 %v1368_v61 }
 0x619   : > { %v1365_v6 = vpop.xlane.xlu1 %1364 }
 0x61a   : > { %7810 = vrcp.f32 %v1365_v6 }
 0x620   : > { %v7807_v55 = vpop.eup %7806 }
 0x621   : > { %v7809_v58 = vpop.eup %7808  ;;  %v1413_v60 = vmul.f32 %v7807_v55, %v8529_v21 }
 0x622   : > { %v1412_v33 = vmul.f32 %v7809_v58, %v8519_v12 }
 0x623   : > { %v1424_v35 = vpack.c.bf16 %v1413_v60, %v1413_v60 }
 0x624   : > { %v7811_v23 = vpop.eup %7810 }
 0x625   : > { %v1411_v62 = vmul.f32 %v7811_v23, %v8533_v27 }
 0x627   : > { %v1423_v4 = vpack.c.bf16 %v1412_v33, %v1411_v62 }
 0x629   : > { %7036 = vmatprep.mubr.msk.bf16.mxu0 %vm1289_vm11, %v1423_v4 }
 0x62a   : > { %7037 = vmatmul.mubr.msk.bf16.vlgmr.msra.gmra.mrb[16].mxu0 %vm1289_vm11, %v1424_v35 }
 0x62b   : > { %7049 = vmatpush3.bf16.msra.mxu0 %v1556_v47 }
 0x635   : > { %v1380_v15 = vpop.xlane.xlu0 %1379 }
 0x639   : > { %v1374_v5 = vpop.xlane.xlu0 %1373 }
 0x63a   : > { %v1389_v59 = vpop.xlane.xlu1 %1388 }
 0x63d   : > { %v1386_v2 = vpop.xlane.xlu0 %1385 }
 0x63e   : > { %7812 = vrcp.f32 %v1386_v2  ;;  %v1383_v56 = vpop.xlane.xlu1 %1382 }
 0x63f   : > { %7814 = vrcp.f32 %v1383_v56 }
 0x640   : > { %7816 = vrcp.f32 %v1380_v15 }
 0x641   : > { %7818 = vrcp.f32 %v1374_v5 }
 0x642   : > { %v1377_v21 = vpop.xlane.xlu1 %1376 }
 0x643   : > { %7820 = vrcp.f32 %v1377_v21 }
 0x644   : > { %7822 = vrcp.f32 %v1389_v59 }
 0x648   : > { %v7813_v27 = vpop.eup %7812 }
 0x649   : > { %v7815_v12 = vpop.eup %7814  ;;  %v1418_v11 = vmul.f32 %v7813_v27, %v8559_v13  ;;  %v7717_v27 = vld [vmem:[%s9811_s10 + $0x58] sm:$0xff]  }
 0x64a   : > { %v7817_v17 = vpop.eup %7816  ;;  %v1398_v18 = vpop.xlane.xlu0 %1397  ;;  %v1417_v20 = vmul.f32 %v7815_v12, %v8561_v52 }
 0x64b   : > { %v7819_v24 = vpop.eup %7818  ;;  %v1416_v30 = vmul.f32 %v7817_v17, %v8543_v14  ;;  %7824 = vrcp.f32 %v1398_v18 }
 0x64c   : > { %v1427_v7 = vpack.c.bf16 %v1418_v11, %v1417_v20  ;;  %v1414_v32 = vmul.f32 %v7819_v24, %v8547_v29 }
 0x64d   : > { %v7821_v8 = vpop.eup %7820  ;;  %v1426_v37 = vpack.c.bf16 %v1416_v30, %v1416_v30 }
 0x64e   : > { %7052 = vmatprep.mubr.msk.bf16.mxu0 %vm1289_vm11, %v1427_v7  ;;  %v1392_v31 = vpop.xlane.xlu0 %1391  ;;  %v1415_v34 = vmul.f32 %v7821_v8, %v8567_v57  ;;  %v7823_v14 = vpop.eup %7822 }
 0x64f   : > { %7826 = vrcp.f32 %v1392_v31  ;;  %v1419_v57 = vmul.f32 %v7823_v14, %v8549_v0 }
 0x650   : > { %v1425_v36 = vpack.c.bf16 %v1415_v34, %v1414_v32 }
 0x652   : > { %7044 = vmatprep.mubr.msk.bf16.mxu1 %vm1289_vm11, %v1425_v36  ;;  %v1620_v13 = vpop.permute.xlu0 %1619 }
 0x653   : > { %7045 = vmatmul.mubr.msk.bf16.vlgmr.msra.gmra.mrb[20].mxu1 %vm1289_vm11, %v1426_v37  ;;  %v1629_v52 = vsel %vm618_vm0, %v1620_v13, 0 }
 0x654   : > { %7057 = vmatpush3.bf16.msra.mxu1 %v1618_v43  ;;  %v1428_v43 = vpack.c.bf16 %v1419_v57, %v1419_v57 }
 0x655   : > { %7555 = vmatprep.subr.msk.bf16.mxu1 %vm618_vm0, %v1620_v13  ;;  %v7825_v16 = vpop.eup %7824 }
 0x656   : > { %v1422_v6 = vmul.f32 %v7825_v16, %v8571_v49 }
 0x658   : > { %7059 = vmatpush3.bf16.msra.mxu1 %v1629_v52  ;;  %v1430_v0 = vpack.c.bf16 %v1422_v6, %v1422_v6 }
 0x659   : > { %v7827_v61 = vpop.eup %7826 }
 0x65a   : > { %v1420_v55 = vmul.f32 %v7827_v61, %v8575_v51 }
 0x67a   : > { %v1395_v29 = vpop.xlane.xlu1 %1394 }
 0x67b   : > { %7828 = vrcp.f32 %v1395_v29 }
 0x67e   : > { %v1558_v39 = vpop.permute.xlu1 %1557 }
 0x67f   : > { %7554 = vmatprep.subr.msk.bf16.mxu0 %vm618_vm0, %v1558_v39  ;;  %v1567_v47 = vsel %vm618_vm0, %v1558_v39, 0 }
 0x680   : > { %7051 = vmatpush3.bf16.msra.mxu0 %v1567_v47 }
 0x683   : > { %7053 = vmatmul.mubr.msk.bf16.vlgmr.msra.gmra.mrb[20].mxu0 %vm1289_vm11, %v1428_v43 }
 0x685   : > { %v7829_v54 = vpop.eup %7828 }
 0x686   : > { %v1421_v58 = vmul.f32 %v7829_v54, %v8584_v50  ;;  %v7716_v50 = vld [vmem:[%s9811_s10 + $0x50] sm:$0xff]  }
 0x687   : > { %7064 = vmatprep.subr.bf16.mxu0 %v7716_v50 }
 0x688   : > { %v1429_v23 = vpack.c.bf16 %v1421_v58, %v1420_v55  ;;  %7065 = vmatpush3.bf16.msra.mxu0 %v7716_v50 }
 0x689   : > { %7066 = vmatprep.subr.bf16.mxu0 %v7717_v27 }
 0x68a   : > { %7060 = vmatprep.mubr.msk.bf16.mxu1 %vm1289_vm11, %v1429_v23 }
 0x68b   : > { %7061 = vmatmul.mubr.msk.bf16.vlgmr.msra.gmra.mrb[24].mxu1 %vm1289_vm11, %v1430_v0 }
 0x68c   : > { %7067 = vmatpush3.bf16.msra.mxu0 %v7717_v27 }
 0x6fd   : > { %v7038_v60 = vpop.f32.mrb[16].mxu0 }
 0x6fe   : > { %v1479_v62 = vpop.f32.mrb[17].mxu0 }
 0x6ff   : > { %v7039_v33 = vpop.f32.mrb[18].mxu0 }
 0x700   : > { %v1482_v4 = vpop.f32.mrb[19].mxu0 }
 0x726   : > { %v7046_v35 = vpop.f32.mrb[20].mxu1 }
 0x727   : > { %1686 = vrot.lane.b32.xlu0 %v7046_v35, %s9823_s30  ;;  %v1541_v15 = vpop.f32.mrb[21].mxu1 }
 0x728   : > { %v7047_v49 = vpop.f32.mrb[22].mxu1 }
 0x729   : > { %v1544_v5 = vpop.f32.mrb[23].mxu1 }
 0x72a   : > { %v7633_v51 = vpack.i.bf16 %v1544_v5, %v1541_v15 }
 0x72c   : > { %7634 = vrot.lane.b32.xlu1 %v7633_v51, %s9823_s30  ;;  %s9849_s30 = smov 16  }
 0x756   : > { %v7054_v59 = vpop.f32.mrb[20].mxu0 }
 0x757   : > { %1698 = vrot.lane.b32.xlu0 %v7054_v59, %s9821_s18  ;;  %v1603_v2 = vpop.f32.mrb[21].mxu0  ;;  %v7719_v59 = vld [vmem:[%s9811_s10 + $0x68] sm:$0xff]  }
 0x758   : > { %v7055_v56 = vpop.f32.mrb[22].mxu0 }
 0x759   : > { %v1606_v21 = vpop.f32.mrb[23].mxu0  ;;  %v7721_v56 = vld [vmem:[%s9811_s10 + $0x78] sm:$0xff]  }
 0x75a   : > { %v7638_v12 = vpack.i.bf16 %v1606_v21, %v1603_v2  ;;  %v7720_v2 = vld [vmem:[%s9811_s10 + $0x70] sm:$0xff]  }
 0x75b   : > { %7080 = vmatprep.subr.bf16.mxu0 %v7720_v2 }
 0x75c   : > { %7639 = vrot.lane.b32.xlu1 %v7638_v12, %s9821_s18  ;;  %s518_s18 = scalar_lea.vmem %s9806_s5, %s8192_s15 }
 0x75e   : > { %v7062_v11 = vpop.f32.mrb[24].mxu1 }
 0x75f   : > { %v1665_v17 = vpop.f32.mrb[25].mxu1  ;;  %1710 = vrot.lane.b32.xlu0 %v7062_v11, %s9819_s17 }
 0x760   : > { %v7063_v18 = vpop.f32.mrb[26].mxu1 }
 0x761   : > { %v1668_v20 = vpop.f32.mrb[27].mxu1 }
 0x762   : > { %v7643_v24 = vpack.i.bf16 %v1668_v20, %v1665_v17 }
 0x764   : > { %7644 = vrot.lane.b32.xlu1 %v7643_v24, %s9819_s17  ;;  %s9852_s17 = smov 120  }
 0x799   : > { %v1687_v7 = vpop.permute.xlu0 %1686 }
 0x79a   : > { %v1717_v52 = vsel %vm1030_vm9, %v7038_v60, %v1687_v7 }
 0x79e   : > { %v7635_v8 = vpop.permute.xlu1 %7634 }
 0x79f   : > { %v7637_v32 = vunpack.i.h.bf16 %v7635_v8  ;;  %v7636_v34 = vunpack.i.l.bf16 %v7635_v8 }
 0x7a1   : > { %v1716_v14 = vsel %vm1030_vm9, %v1482_v4, %v7637_v32  ;;  %v1715_v57 = vsel %vm1030_vm9, %v1479_v62, %v7636_v34  ;;  %v6555_v32 = vld [vmem:[%s9812_s11 + $0x7] ss:$0 sm:$0xff] }
 0x7c9   : > { %v1699_v30 = vpop.permute.xlu0 %1698 }
 0x7ca   : > { %v1721_v39 = vsel %vm1718_vm12, %v1717_v52, %v1699_v30 }
 0x7ce   : > { %v7640_v31 = vpop.permute.xlu1 %7639 }
 0x7cf   : > { %v7642_v36 = vunpack.i.h.bf16 %v7640_v31  ;;  %v7641_v37 = vunpack.i.l.bf16 %v7640_v31 }
 0x7d1   : > { %v1711_v13 = vpop.permute.xlu0 %1710  ;;  %v1719_v16 = vsel %vm1718_vm12, %v1715_v57, %v7641_v37  ;;  %v1720_v61 = vsel %vm1718_vm12, %v1716_v14, %v7642_v36 }
 0x7d2   : > { %v1725_v54 = vsel %vm1722_vm13, %v1721_v39, %v1711_v13  ;;  %v7722_v39 = vld [vmem:[%s9811_s10 + $0x80] sm:$0xff]  }
 0x7d3   : > { %v1727_v23 = vpack.c.bf16 %v1725_v54, %v1725_v54 }
 0x7d6   : > { %v7645_v29 = vpop.permute.xlu1 %7644 }
 0x7d7   : > { %v7647_v47 = vunpack.i.h.bf16 %v7645_v29  ;;  %v7646_v43 = vunpack.i.l.bf16 %v7645_v29 }
 0x7d9   : > { %v1723_v6 = vsel %vm1722_vm13, %v1719_v16, %v7646_v43  ;;  %v1724_v55 = vsel %vm1722_vm13, %v1720_v61, %v7647_v47  ;;  %v7723_v47 = vld [vmem:[%s9811_s10 + $0x88] sm:$0xff]  }
 0x7da   : > { %v1726_v58 = vpack.c.bf16 %v1724_v55, %v1723_v6 }
 0x7dc   : > { %7068 = vmatprep.mubr.msk.bf16.mxu0 %vm527_vm7, %v1726_v58 }
 0x7dd   : > { %7069 = vmatmul.mubr.msk.bf16.vlgmr.msra.gmra.mrb[24].mxu0 %vm527_vm7, %v1727_v23 }
 0x7de   : > { %7081 = vmatpush3.bf16.msra.mxu0 %v7720_v2  ;;  %v7725_v2 = vld [vmem:[%s9811_s10 + $0x98] sm:$0xff]  }
 0x7df   : > { %7082 = vmatprep.subr.bf16.mxu0 %v7721_v56 }
 0x7e2   : > { %7083 = vmatpush3.bf16.msra.mxu0 %v7721_v56 }
 0x7e3   : > { %7084 = vmatprep.subr.bf16.mxu0 %v7722_v39 }
 0x7e6   : > { %7085 = vmatpush3.bf16.msra.mxu0 %v7722_v39 }
 0x7e7   : > { %7086 = vmatprep.subr.bf16.mxu0 %v7723_v47 }
 0x7ea   : > { %7087 = vmatpush3.bf16.msra.mxu0 %v7723_v47 }
 0x8b0   : > { %v7070_v0 = vpop.f32.mrb[24].mxu0 }
 0x8b1   : > { %v1784_v60 = vpop.f32.mrb[25].mxu0  ;;  %v8641_v35 = vadd.f32 %v7070_v0, %v8275_v26 }
 0x8b2   : > { %v8638_v62 = vadd.f32 %v1784_v60, %v8258_v53  ;;  %v7071_v33 = vpop.f32.mrb[26].mxu0 }
 0x8b3   : > { %v1787_v4 = vpop.f32.mrb[27].mxu0  ;;  %v1804_v50 = vmul.f32 %v8641_v35, %v8641_v35 }
 0x8b4   : > { %v8644_v15 = vadd.f32 %v1787_v4, %v8273_v25  ;;  %v1802_v49 = vmul.f32 %v8638_v62, %v8638_v62  ;;  %v7718_v25 = vld [vmem:[%s9811_s10 + $0x60] sm:$0xff]  }
 0x8b5   : > { %v1811_v26 = vsel %vm891_vm8, %v1804_v50, 0.0  ;;  %7072 = vmatprep.subr.bf16.mxu1 %v7718_v25 }
 0x8b6   : > { %v1805_v5 = vsel %vm527_vm7, %v1802_v49, 0.0  ;;  %v1803_v51 = vmul.f32 %v8644_v15, %v8644_v15  ;;  %7073 = vmatpush3.bf16.msra.mxu1 %v7718_v25 }
 0x8b7   : > { %1806 = vadd.xlane.f32.xlu1 %v1805_v5  ;;  %7074 = vmatprep.subr.bf16.mxu1 %v7719_v59 }
 0x8b8   : > { %v1808_v53 = vsel %vm527_vm7, %v1803_v51, 0.0 }
 0x8b9   : > { %1809 = vadd.xlane.f32.xlu0 %v1808_v53 }
 0x8ba   : > { %7075 = vmatpush3.bf16.msra.mxu1 %v7719_v59 }
 0x8bd   : > { %1812 = vadd.xlane.f32.xlu0 %v1811_v26 }
 0x944   : > { %v1807_v21 = vpop.xlane.xlu1 %1806 }
 0x945   : > { %v1814_v27 = vmul.f32 0.03125, %v1807_v21 }
 0x946   : > { %v1810_v12 = vpop.xlane.xlu0 %1809 }
 0x947   : > { %v1817_v11 = vadd.f32 1e-06, %v1814_v27  ;;  %v1815_v17 = vmul.f32 0.03125, %v1810_v12 }
 0x949   : > { %7830 = vrsqrt.f32 %v1817_v11  ;;  %v1818_v18 = vadd.f32 1e-06, %v1815_v17 }
 0x94a   : > { %v1813_v20 = vpop.xlane.xlu0 %1812 }
 0x94b   : > { %7832 = vrsqrt.f32 %v1818_v18  ;;  %v1816_v24 = vmul.f32 0.03125, %v1813_v20 }
 0x94d   : > { %v1819_v7 = vadd.f32 1e-06, %v1816_v24 }
 0x94f   : > { %7834 = vrsqrt.f32 %v1819_v7 }
 0x953   : > { %v7831_v8 = vpop.eup %7830 }
 0x954   : > { %v1823_v30 = vmul.f32 %v7831_v8, %v8638_v62 }
 0x955   : > { %v7833_v31 = vpop.eup %7832 }
 0x956   : > { %v1824_v34 = vmul.f32 %v7833_v31, %v8644_v15  ;;  %v1830_v36 = vmul.f32 %v6555_v32, %v1823_v30  ;;  %v6566_v31 = vld [vmem:[%s9812_s11 + $0x8] ss:$0 sm:$0xff] }
 0x958   : > { %v1831_v37 = vmul.f32 %v6555_v32, %v1824_v34 }
 0x959   : > { %v7835_v13 = vpop.eup %7834 }
 0x95a   : > { %v1825_v52 = vmul.f32 %v7835_v13, %v8641_v35  ;;  %v1833_v14 = vpack.c.bf16 %v1831_v37, %v1830_v36 }
 0x95c   : > { %7076 = vmatprep.mubr.msk.bf16.mxu1 %vm527_vm7, %v1833_v14  ;;  %v1832_v29 = vmul.f32 %v6555_v32, %v1825_v52 }
 0x95e   : > { %v1834_v57 = vpack.c.bf16 %v1832_v29, %v1832_v29 }
 0x960   : > { %7077 = vmatmul.mubr.msk.bf16.vlgmr.msra.gmra.mrb[28].mxu1 %vm527_vm7, %v1834_v57 }
 0xa33   : > { %v7078_v43 = vpop.f32.mrb[28].mxu1 }
 0xa34   : > { %v1891_v16 = vpop.f32.mrb[29].mxu1  ;;  %v1907_v54 = vmax.f32 %v7078_v43, 0.0 }
 0xa35   : > { %v7079_v61 = vpop.f32.mrb[30].mxu1  ;;  %v1905_v55 = vmax.f32 %v1891_v16, 0.0 }
 0xa36   : > { %v1894_v6 = vpop.f32.mrb[31].mxu1  ;;  %v1909_v0 = vpack.c.bf16 %v1907_v54, %v1907_v54 }
 0xa37   : > { %v1906_v58 = vmax.f32 %v1894_v6, 0.0 }
 0xa39   : > { %v1908_v23 = vpack.c.bf16 %v1906_v58, %v1905_v55 }
 0xa3b   : > { %7088 = vmatprep.mubr.msk.bf16.mxu0 %vm1942_vm14, %v1908_v23 }
 0xa3c   : > { %7089 = vmatmul.mubr.msk.bf16.vlgmr.msra.gmra.mrb[28].mxu0 %vm1942_vm14, %v1909_v0 }
 0xb0f   : > { %v7090_v60 = vpop.f32.mrb[28].mxu0 }
 0xb10   : > { %v1983_v33 = vpop.f32.mrb[29].mxu0  ;;  %v8684_v4 = vadd.f32 %v7090_v60, %v8641_v35 }
 0xb11   : > { %v8687_v49 = vadd.f32 %v1983_v33, %v8638_v62  ;;  %v7091_v5 = vpop.f32.mrb[30].mxu0 }
 0xb12   : > { %v1986_v51 = vpop.f32.mrb[31].mxu0  ;;  %v2003_v35 = vmul.f32 %v8684_v4, %v8684_v4 }
 0xb13   : > { %v8690_v53 = vadd.f32 %v1986_v51, %v8644_v15  ;;  %v2001_v50 = vmul.f32 %v8687_v49, %v8687_v49  ;;  %v7724_v15 = vld [vmem:[%s9811_s10 + $0x90] sm:$0xff]  }
 0xb14   : > { %v2010_v59 = vsel %vm891_vm8, %v2003_v35, 0.0  ;;  %7092 = vmatprep.subr.bf16.mxu1 %v7724_v15 }
 0xb15   : > { %v2004_v26 = vsel %vm527_vm7, %v2001_v50, 0.0  ;;  %v2002_v25 = vmul.f32 %v8690_v53, %v8690_v53  ;;  %7093 = vmatpush3.bf16.msra.mxu1 %v7724_v15 }
 0xb16   : > { %2005 = vadd.xlane.f32.xlu0 %v2004_v26  ;;  %7094 = vmatprep.subr.bf16.mxu1 %v7725_v2 }
 0xb17   : > { %v2007_v62 = vsel %vm527_vm7, %v2002_v25, 0.0 }
 0xb18   : > { %2008 = vadd.xlane.f32.xlu1 %v2007_v62 }
 0xb19   : > { %7095 = vmatpush3.bf16.msra.mxu1 %v7725_v2 }
 0xb1a   : > { %2011 = vadd.xlane.f32.xlu0 %v2010_v59 }
 0xba3   : > { %v2006_v56 = vpop.xlane.xlu0 %2005 }
 0xba4   : > { %v2013_v21 = vmul.f32 0.03125, %v2006_v56 }
 0xba5   : > { %v2009_v27 = vpop.xlane.xlu1 %2008 }
 0xba6   : > { %v2016_v12 = vadd.f32 1e-06, %v2013_v21  ;;  %v2014_v11 = vmul.f32 0.03125, %v2009_v27 }
 0xba7   : > { %v2012_v17 = vpop.xlane.xlu0 %2011 }
 0xba8   : > { %7836 = vrsqrt.f32 %v2016_v12  ;;  %v2017_v18 = vadd.f32 1e-06, %v2014_v11  ;;  %v2015_v20 = vmul.f32 0.03125, %v2012_v17 }
 0xbaa   : > { %7838 = vrsqrt.f32 %v2017_v18  ;;  %v2018_v24 = vadd.f32 1e-06, %v2015_v20 }
 0xbac   : > { %7840 = vrsqrt.f32 %v2018_v24 }
 0xbb2   : > { %v7837_v7 = vpop.eup %7836 }
 0xbb3   : > { %v2022_v8 = vmul.f32 %v7837_v7, %v8687_v49 }
 0xbb4   : > { %v7839_v30 = vpop.eup %7838 }
 0xbb5   : > { %v2023_v32 = vmul.f32 %v7839_v30, %v8690_v53  ;;  %v2029_v37 = vmul.f32 %v6566_v31, %v2022_v8 }
 0xbb6   : > { %v7841_v34 = vpop.eup %7840 }
 0xbb7   : > { %v2024_v36 = vmul.f32 %v7841_v34, %v8684_v4  ;;  %v2030_v13 = vmul.f32 %v6566_v31, %v2023_v32 }
 0xbb9   : > { %v2032_v52 = vpack.c.bf16 %v2030_v13, %v2029_v37  ;;  %v2031_v14 = vmul.f32 %v6566_v31, %v2024_v36 }
 0xbbb   : > { %7096 = vmatprep.mubr.msk.bf16.mxu1 %vm527_vm7, %v2032_v52  ;;  %v2033_v29 = vpack.c.bf16 %v2031_v14, %v2031_v14 }
 0xbbd   : > { %7097 = vmatmul.mubr.msk.bf16.vlgmr.msra.gmra.mrb[32].mxu1 %vm527_vm7, %v2033_v29 }
 0xc90   : > { %v7098_v57 = vpop.f32.mrb[32].mxu1 }
 0xc91   : > { %2111 = vrot.lane.b32.xlu0 %v7098_v57, %s9829_s27  ;;  %v2090_v39 = vpop.f32.mrb[33].mxu1  ;;  %v8727_v54 = vpack.c.bf16 %v7098_v57, %v7098_v57 }
 0xc92   : > { %v7099_v47 = vpop.f32.mrb[34].mxu1 }
 0xc93   : > { %v2093_v43 = vpop.f32.mrb[35].mxu1 }
 0xc94   : > { %v8716_v16 = vpack.c.bf16 %v2093_v43, %v2090_v39  ;;  %v7648_v61 = vpack.i.bf16 %v2093_v43, %v2090_v39 }
 0xc95   : > { %2129 = vrot.lane.b32.xlu0 %v7098_v57, %s9827_s29 }
 0xc96   : > { %7649 = vrot.lane.b32.xlu1 %v7648_v61, %s9829_s27  ;;  %7104 = vmatprep.mubr.msk.bf16.mxu1 %vm1030_vm9, %v8716_v16  ;;  %s524_s27 = scalar_lea.vmem %s9808_s7, %s8184_s26  ;;  %s8052_s26 = smov [#allocation3]  }
 0xc97   : > { %s7982_s23 = sshll.u32 %s8052_s26, 4  ;;  %s7983_s23 = int_to_ptr.vmem [resolvable:$false] %s7982_s23 }
 0xc98   : > { %s7984_s15 = scalar_lea.vmem %s7983_s23, 256 }
 0xc9a   : > { %7654 = vrot.lane.b32.xlu1 %v7648_v61, %s9831_s16 }
 0xc9e   : > { %7659 = vrot.lane.b32.xlu1 %v7648_v61, %s9827_s29 }
 0xca2   : > { %2120 = vrot.lane.b32.xlu1 %v7098_v57, %s9831_s16 }
 0xca6   : > { %2144 = vrot.lane.b32.xlu1 %v8716_v16, %s9846_s1 }
 0xcaa   : > { %2146 = vrot.lane.b32.xlu1 %v8727_v54, %s9846_s1 }
 0xd03   : > { %v2112_v0 = vpop.permute.xlu0 %2111 }
 0xd04   : > { %v8737_v51 = vpack.c.bf16 %v2112_v0, %v2112_v0 }
 0xd07   : > { %v2130_v59 = vpop.permute.xlu0 %2129 }
 0xd08   : > { %v7650_v6 = vpop.permute.xlu1 %7649  ;;  %v8751_v56 = vpack.c.bf16 %v2130_v59, %v2130_v59 }
 0xd09   : > { %v7652_v55 = vunpack.i.h.bf16 %v7650_v6  ;;  %v7651_v58 = vunpack.i.l.bf16 %v7650_v6 }
 0xd0b   : > { %v8731_v23 = vpack.c.bf16 %v7652_v55, %v7651_v58 }
 0xd0c   : > { %v7655_v60 = vpop.permute.xlu1 %7654 }
 0xd0d   : > { %v7657_v33 = vunpack.i.h.bf16 %v7655_v60  ;;  %v7656_v5 = vunpack.i.l.bf16 %v7655_v60  ;;  %2210 = vrot.lane.b32.xlu0 %v8731_v23, %s9846_s1  ;;  %7112 = vmatprep.mubr.msk.bf16.mxu0 %vm1030_vm9, %v8731_v23 }
 0xd0f   : > { %v8739_v50 = vpack.c.bf16 %v7657_v33, %v7656_v5 }
 0xd10   : > { %v7660_v26 = vpop.permute.xlu1 %7659 }
 0xd11   : > { %v7662_v25 = vunpack.i.h.bf16 %v7660_v26  ;;  %v7661_v35 = vunpack.i.l.bf16 %v7660_v26  ;;  %2212 = vrot.lane.b32.xlu0 %v8737_v51, %s9846_s1  ;;  %2276 = vrot.lane.b32.xlu1 %v8739_v50, %s9846_s1 }
 0xd13   : > { %v8745_v62 = vpack.c.bf16 %v7662_v25, %v7661_v35 }
 0xd14   : > { %v2121_v15 = vpop.permute.xlu1 %2120 }
 0xd15   : > { %v8747_v2 = vpack.c.bf16 %v2121_v15, %v2121_v15  ;;  %2342 = vrot.lane.b32.xlu0 %v8745_v62, %s9846_s1 }
 0xd17   : > { %2278 = vrot.lane.b32.xlu1 %v8747_v2, %s9846_s1 }
 0xd18   : > { %v2145_v21 = vpop.permute.xlu1 %2144 }
 0xd19   : > { %2344 = vrot.lane.b32.xlu0 %v8751_v56, %s9846_s1  ;;  %7556 = vmatprep.subr.msk.bf16.mxu1 %vm1030_vm9, %v2145_v21  ;;  %v2155_v27 = vsel %vm1030_vm9, %v2145_v21, 0 }
 0xd1a   : > { %7101 = vmatpush3.bf16.xpose.msra.mxu1 %v2155_v27 }
 0xd1c   : > { %v2147_v12 = vpop.permute.xlu1 %2146 }
 0xd1d   : > { %7557 = vmatprep.subr.msk.bf16.mxu1 %vm1030_vm9, %v2147_v12  ;;  %v2158_v11 = vsel %vm1030_vm9, %v2147_v12, 0 }
 0xd22   : > { %7103 = vmatpush3.bf16.xpose.msra.mxu1 %v2158_v11 }
 0xd29   : > { %7105 = vmatmul.mubr.msk.bf16.vlgmr.msra.gmra.mrb[36].mxu1 %vm1030_vm9, %v8727_v54 }
 0xd2a   : > { %7120 = vmatprep.mubr.msk.bf16.mxu1 %vm1030_vm9, %v8739_v50 }
 0xd7f   : > { %v2211_v17 = vpop.permute.xlu0 %2210 }
 0xd80   : > { %7558 = vmatprep.subr.msk.bf16.mxu0 %vm1030_vm9, %v2211_v17  ;;  %v2221_v18 = vsel %vm1030_vm9, %v2211_v17, 0 }
 0xd81   : > { %7109 = vmatpush3.bf16.xpose.msra.mxu0 %v2221_v18 }
 0xd83   : > { %v2213_v20 = vpop.permute.xlu0 %2212  ;;  %v2277_v24 = vpop.permute.xlu1 %2276 }
 0xd84   : > { %7559 = vmatprep.subr.msk.bf16.mxu0 %vm1030_vm9, %v2213_v20  ;;  %7560 = vmatprep.subr.msk.bf16.mxu1 %vm1030_vm9, %v2277_v24  ;;  %v2287_v7 = vsel %vm1030_vm9, %v2277_v24, 0  ;;  %v2224_v8 = vsel %vm1030_vm9, %v2213_v20, 0 }
 0xd85   : > { %7117 = vmatpush3.bf16.xpose.msra.mxu1 %v2287_v7 }
 0xd87   : > { %v2343_v30 = vpop.permute.xlu0 %2342 }
 0xd88   : > { %v2353_v34 = vsel %vm1030_vm9, %v2343_v30, 0 }
 0xd89   : > { %7111 = vmatpush3.bf16.xpose.msra.mxu0 %v2224_v8  ;;  %v2279_v31 = vpop.permute.xlu1 %2278 }
 0xd8a   : > { %7561 = vmatprep.subr.msk.bf16.mxu1 %vm1030_vm9, %v2279_v31  ;;  %7562 = vmatprep.subr.msk.bf16.mxu0 %vm1030_vm9, %v2343_v30  ;;  %v2290_v32 = vsel %vm1030_vm9, %v2279_v31, 0 }
 0xd8b   : > { %v2345_v36 = vpop.permute.xlu0 %2344 }
 0xd8c   : > { %v2356_v37 = vsel %vm1030_vm9, %v2345_v36, 0 }
 0xd8d   : > { %7119 = vmatpush3.bf16.xpose.msra.mxu1 %v2290_v32 }
 0xd90   : > { %7113 = vmatmul.mubr.msk.bf16.vlgmr.msra.gmra.mrb[32].mxu0 %vm1030_vm9, %v8737_v51 }
 0xd91   : > { %7125 = vmatpush3.bf16.xpose.msra.mxu0 %v2353_v34  ;;  %7128 = vmatprep.mubr.msk.bf16.mxu0 %vm1030_vm9, %v8745_v62 }
 0xd92   : > { %7563 = vmatprep.subr.msk.bf16.mxu0 %vm1030_vm9, %v2345_v36 }
 0xd94   : > { %7121 = vmatmul.mubr.msk.bf16.vlgmr.msra.gmra.mrb[40].mxu1 %vm1030_vm9, %v8747_v2 }
 0xd99   : > { %7127 = vmatpush3.bf16.xpose.msra.mxu0 %v2356_v37 }
 0xda0   : > { %7129 = vmatmul.mubr.msk.bf16.vlgmr.msra.gmra.mrb[36].mxu0 %vm1030_vm9, %v8751_v56 }
 0xdfc   : > { %v7106_v13 = vpop.f32.mrb[36].mxu1 }
 0xdfd   : > { %v8786_v52 = vadd.f32 %v7106_v13, %v8385_v44  ;;  %v2194_v14 = vpop.f32.mrb[37].mxu1 }
 0xdfe   : > { %v8789_v29 = vadd.f32 %v2194_v14, %v8391_v46  ;;  %v7107_v57 = vpop.f32.mrb[38].mxu1 }
 0xdff   : > { %v2197_v39 = vpop.f32.mrb[39].mxu1  ;;  %v2412_v47 = vsel %vm1296_vm10, %v8786_v52, -inf }
 0xe00   : > { %v2198_v43 = vadd.f32 %v2197_v39, %v8394_v48  ;;  %2413 = vmax.xlane.f32.xlu0 %v2412_v47  ;;  %v2406_v61 = vsel %vm1289_vm11, %v8789_v29, -inf }
 0xe01   : > { %2407 = vmax.xlane.f32.xlu1 %v2406_v61 }
 0xe02   : > { %v2409_v6 = vsel %vm1289_vm11, %v2198_v43, -inf }
 0xe04   : > { %2410 = vmax.xlane.f32.xlu0 %v2409_v6 }
 0xe63   : > { %v7114_v44 = vpop.f32.mrb[32].mxu0 }
 0xe64   : > { %v8798_v55 = vadd.f32 %v7114_v44, %v8418_v63  ;;  %v2260_v46 = vpop.f32.mrb[33].mxu0 }
 0xe65   : > { %v7115_v58 = vpop.f32.mrb[34].mxu0  ;;  %v8801_v0 = vadd.f32 %v2260_v46, %v8424_v3 }
 0xe66   : > { %v2263_v60 = vpop.f32.mrb[35].mxu0  ;;  %v2421_v48 = vsel %vm1296_vm10, %v8798_v55, -inf }
 0xe67   : > { %v7122_v33 = vpop.f32.mrb[40].mxu1  ;;  %2422 = vmax.xlane.f32.xlu0 %v2421_v48  ;;  %v2415_v59 = vsel %vm1289_vm11, %v8801_v0, -inf  ;;  %v8821_v21 = vadd.f32 %v2263_v60, %v8456_v28 }
 0xe68   : > { %v8806_v5 = vadd.f32 %v7122_v33, %v8433_v10  ;;  %v2326_v26 = vpop.f32.mrb[41].mxu1 }
 0xe69   : > { %v7123_v25 = vpop.f32.mrb[42].mxu1  ;;  %v8809_v35 = vadd.f32 %v2326_v26, %v8444_v19  ;;  %v2418_v27 = vsel %vm1289_vm11, %v8821_v21, -inf }
 0xe6a   : > { %v2329_v63 = vpop.f32.mrb[43].mxu1  ;;  %v2430_v3 = vsel %vm1296_vm10, %v8806_v5, -inf }
 0xe6b   : > { %v8816_v15 = vadd.f32 %v2329_v63, %v8450_v22  ;;  %2416 = vmax.xlane.f32.xlu0 %v2415_v59  ;;  %2431 = vmax.xlane.f32.xlu1 %v2430_v3  ;;  %v2424_v19 = vsel %vm1289_vm11, %v8809_v35, -inf }
 0xe6d   : > { %v2427_v10 = vsel %vm1289_vm11, %v8816_v15, -inf }
 0xe6f   : > { %2428 = vmax.xlane.f32.xlu0 %v2427_v10  ;;  %2425 = vmax.xlane.f32.xlu1 %v2424_v19 }
 0xe73   : > { %v7130_v12 = vpop.f32.mrb[36].mxu0  ;;  %2419 = vmax.xlane.f32.xlu1 %v2418_v27 }
 0xe74   : > { %v2392_v22 = vpop.f32.mrb[37].mxu0  ;;  %v8831_v20 = vadd.f32 %v7130_v12, %v8487_v45 }
 0xe75   : > { %v8828_v11 = vadd.f32 %v2392_v22, %v8482_v42  ;;  %v7131_v17 = vpop.f32.mrb[38].mxu0 }
 0xe76   : > { %v2395_v18 = vpop.f32.mrb[39].mxu0  ;;  %v2439_v24 = vsel %vm1296_vm10, %v8831_v20, -inf }
 0xe77   : > { %v2433_v28 = vsel %vm1289_vm11, %v8828_v11, -inf  ;;  %v8846_v30 = vadd.f32 %v2395_v18, %v8512_v9 }
 0xe78   : > { %2434 = vmax.xlane.f32.xlu0 %v2433_v28 }
 0xe7c   : > { %2440 = vmax.xlane.f32.xlu0 %v2439_v24 }
 0xe84   : > { %2546 = vrot.lane.b32.xlu1 %v8716_v16, %s9847_s28  ;;  %v2436_v16 = vsel %vm1289_vm11, %v8846_v30, -inf }
 0xe88   : > { %2548 = vrot.lane.b32.xlu1 %v8727_v54, %s9847_s28 }
 0xe8d   : > { %v2414_v42 = vpop.xlane.xlu0 %2413 }
 0xe8e   : > { %v2444_v9 = vsub.f32 %v8786_v52, %v2414_v42 }
 0xe91   : > { %v2411_v45 = vpop.xlane.xlu0 %2410 }
 0xe92   : > { %2608 = vrot.lane.b32.xlu0 %v8731_v23, %s9847_s28  ;;  %v2443_v7 = vsub.f32 %v2198_v43, %v2411_v45  ;;  %v2408_v23 = vpop.xlane.xlu1 %2407 }
 0xe93   : > { %v2442_v32 = vsub.f32 %v8789_v29, %v2408_v23 }
 0xe94   : > { %v2456_v8 = vmul.f32 1.442695, %v2443_v7 }
 0xe95   : > { %v2454_v34 = vmul.f32 1.442695, %v2442_v32 }
 0xe96   : > { %2732 = vrot.lane.b32.xlu0 %v8745_v62, %s9847_s28  ;;  %7842 = vpow2.f32 %v2456_v8  ;;  %v2458_v62 = vmul.f32 1.442695, %v2444_v9 }
 0xe98   : > { %7844 = vpow2.f32 %v2458_v62 }
 0xe99   : > { %7846 = vpow2.f32 %v2454_v34 }
 0xea0   : > { %v8850_v31 = vpop.eup %7842 }
 0xea1   : > { %v2481_v54 = vsel %vm1289_vm11, %v8850_v31, 0.0 }
 0xea2   : > { %v8860_v36 = vpop.eup %7844 }
 0xea3   : > { %v2484_v37 = vsel %vm1296_vm10, %v8860_v36, 0.0  ;;  %v8864_v13 = vpop.eup %7846 }
 0xeac   : > { %2437 = vmax.xlane.f32.xlu1 %v2436_v16 }
 0xeb5   : > { %2482 = vadd.xlane.f32.xlu0 %v2481_v54 }
 0xebd   : > { %2610 = vrot.lane.b32.xlu1 %v8737_v51, %s9847_s28  ;;  %v2478_v51 = vsel %vm1289_vm11, %v8864_v13, 0.0 }
 0xec1   : > { %2670 = vrot.lane.b32.xlu1 %v8739_v50, %s9847_s28 }
 0xee5   : > { %2485 = vadd.xlane.f32.xlu1 %v2484_v37 }
 0xee9   : > { %2479 = vadd.xlane.f32.xlu1 %v2478_v51 }
 0xef4   : > { %v2423_v50 = vpop.xlane.xlu0 %2422 }
 0xef5   : > { %v2447_v52 = vsub.f32 %v8798_v55, %v2423_v50 }
 0xef7   : > { %v2464_v14 = vmul.f32 1.442695, %v2447_v52 }
 0xef8   : > { %v2417_v29 = vpop.xlane.xlu0 %2416  ;;  %v2432_v57 = vpop.xlane.xlu1 %2431 }
 0xef9   : > { %7848 = vpow2.f32 %v2464_v14  ;;  %v2445_v39 = vsub.f32 %v8801_v0, %v2417_v29  ;;  %v2450_v47 = vsub.f32 %v8806_v5, %v2432_v57 }
 0xefb   : > { %v2460_v43 = vmul.f32 1.442695, %v2445_v39  ;;  %v2470_v61 = vmul.f32 1.442695, %v2450_v47 }
 0xefc   : > { %v2429_v6 = vpop.xlane.xlu0 %2428  ;;  %v2426_v44 = vpop.xlane.xlu1 %2425 }
 0xefd   : > { %7850 = vpow2.f32 %v2460_v43  ;;  %v2449_v46 = vsub.f32 %v8816_v15, %v2429_v6  ;;  %v2448_v58 = vsub.f32 %v8809_v35, %v2426_v44 }
 0xefe   : > { %7852 = vpow2.f32 %v2470_v61 }
 0xeff   : > { %v2468_v60 = vmul.f32 1.442695, %v2449_v46  ;;  %v2466_v55 = vmul.f32 1.442695, %v2448_v58 }
 0xf00   : > { %v2420_v48 = vpop.xlane.xlu1 %2419 }
 0xf01   : > { %7854 = vpow2.f32 %v2468_v60  ;;  %v2446_v33 = vsub.f32 %v8821_v21, %v2420_v48 }
 0xf02   : > { %7856 = vpow2.f32 %v2466_v55 }
 0xf03   : > { %v8874_v0 = vpop.eup %7848  ;;  %v2462_v5 = vmul.f32 1.442695, %v2446_v33 }
 0xf04   : > { %v2547_v26 = vpop.permute.xlu1 %2546  ;;  %v2493_v25 = vsel %vm1296_vm10, %v8874_v0, 0.0 }
 0xf05   : > { %7858 = vpow2.f32 %v2462_v5  ;;  %2494 = vadd.xlane.f32.xlu0 %v2493_v25  ;;  %v2435_v63 = vpop.xlane.xlu0 %2434  ;;  %7132 = vmatprep.subr.bf16.mxu1 %v2547_v26 }
 0xf06   : > { %7133 = vmatpush3.bf16.msra.mxu1 %v2547_v26  ;;  %v2451_v3 = vsub.f32 %v8828_v11, %v2435_v63 }
 0xf07   : > { %v8878_v35 = vpop.eup %7850 }
 0xf08   : > { %v8880_v59 = vpop.eup %7852  ;;  %v2549_v15 = vpop.permute.xlu1 %2548  ;;  %v2487_v10 = vsel %vm1289_vm11, %v8878_v35, 0.0  ;;  %v2472_v17 = vmul.f32 1.442695, %v2451_v3 }
 0xf09   : > { %2488 = vadd.xlane.f32.xlu0 %v2487_v10  ;;  %v2441_v21 = vpop.xlane.xlu0 %2440  ;;  %v2502_v19 = vsel %vm1296_vm10, %v8880_v59, 0.0  ;;  %7564 = vmatprep.subr.msk.bf16.mxu1 %vm618_vm0, %v2549_v15  ;;  %v2558_v27 = vsel %vm618_vm0, %v2549_v15, 0 }
 0xf0a   : > { %v2453_v12 = vsub.f32 %v8831_v20, %v2441_v21  ;;  %2503 = vadd.xlane.f32.xlu1 %v2502_v19  ;;  %7135 = vmatpush3.bf16.msra.mxu1 %v2558_v27 }
 0xf0b   : > { %v8890_v22 = vpop.eup %7854 }
 0xf0c   : > { %v8892_v11 = vpop.eup %7856  ;;  %v2476_v18 = vmul.f32 1.442695, %v2453_v12  ;;  %v2499_v28 = vsel %vm1289_vm11, %v8890_v22, 0.0 }
 0xf0d   : > { %2500 = vadd.xlane.f32.xlu0 %v2499_v28  ;;  %v2609_v24 = vpop.permute.xlu0 %2608  ;;  %v2496_v42 = vsel %vm1289_vm11, %v8892_v11, 0.0 }
 0xf0e   : > { %7860 = vpow2.f32 %v2476_v18  ;;  %2497 = vadd.xlane.f32.xlu1 %v2496_v42  ;;  %7140 = vmatprep.subr.bf16.mxu0 %v2609_v24 }
 0xf0f   : > { %v8898_v20 = vpop.eup %7858  ;;  %7141 = vmatpush3.bf16.msra.mxu0 %v2609_v24  ;;  %7862 = vpow2.f32 %v2472_v17 }
 0xf10   : > { %v2490_v45 = vsel %vm1289_vm11, %v8898_v20, 0.0 }
 0xf11   : > { %v2733_v37 = vpop.permute.xlu0 %2732 }
 0xf12   : > { %2491 = vadd.xlane.f32.xlu1 %v2490_v45 }
 0xf18   : > { %v8902_v7 = vpop.eup %7860 }
 0xf19   : > { %v2511_v8 = vsel %vm1296_vm10, %v8902_v7, 0.0  ;;  %v8906_v16 = vpop.eup %7862 }
 0xf1a   : > { %2512 = vadd.xlane.f32.xlu0 %v2511_v8  ;;  %v2505_v54 = vsel %vm1289_vm11, %v8906_v16, 0.0 }
 0xf1e   : > { %2506 = vadd.xlane.f32.xlu0 %v2505_v54 }
 0xf34   : > { %2734 = vrot.lane.b32.xlu0 %v8751_v56, %s9847_s28 }
 0xf39   : > { %v2438_v9 = vpop.xlane.xlu1 %2437 }
 0xf3a   : > { %v2452_v23 = vsub.f32 %v8846_v30, %v2438_v9 }
 0xf3c   : > { %v2474_v62 = vmul.f32 1.442695, %v2452_v23 }
 0xf3d   : > { %v2611_v32 = vpop.permute.xlu1 %2610 }
 0xf3e   : > { %7864 = vpow2.f32 %v2474_v62  ;;  %7565 = vmatprep.subr.msk.bf16.mxu0 %vm618_vm0, %v2611_v32  ;;  %v2620_v34 = vsel %vm618_vm0, %v2611_v32, 0 }
 0xf3f   : > { %7143 = vmatpush3.bf16.msra.mxu0 %v2620_v34 }
 0xf40   : > { %7156 = vmatprep.subr.bf16.mxu0 %v2733_v37 }
 0xf41   : > { %v2671_v51 = vpop.permute.xlu1 %2670 }
 0xf42   : > { %7148 = vmatprep.subr.bf16.mxu1 %v2671_v51  ;;  %v2483_v30 = vpop.xlane.xlu0 %2482 }
 0xf48   : > { %v8915_v50 = vpop.eup %7864 }
 0xf49   : > { %v2508_v56 = vsel %vm1289_vm11, %v8915_v50, 0.0 }
 0xf4a   : > { %2509 = vadd.xlane.f32.xlu1 %v2508_v56 }
 0xf5b   : > { %2672 = vrot.lane.b32.xlu1 %v8747_v2, %s9847_s28 }
 0xf72   : > { %v2486_v52 = vpop.xlane.xlu1 %2485 }
 0xf73   : > { %7866 = vrcp.f32 %v2486_v52 }
 0xf74   : > { %7868 = vrcp.f32 %v2483_v30 }
 0xf76   : > { %v2480_v14 = vpop.xlane.xlu1 %2479 }
 0xf77   : > { %7870 = vrcp.f32 %v2480_v14 }
 0xf7d   : > { %v7867_v29 = vpop.eup %7866 }
 0xf7e   : > { %v7869_v57 = vpop.eup %7868  ;;  %v2528_v47 = vmul.f32 %v7867_v29, %v8860_v36 }
 0xf7f   : > { %v2527_v61 = vmul.f32 %v7869_v57, %v8850_v31 }
 0xf80   : > { %v2539_v44 = vpack.c.bf16 %v2528_v47, %v2528_v47 }
 0xf81   : > { %v7871_v39 = vpop.eup %7870 }
 0xf82   : > { %v2526_v43 = vmul.f32 %v7871_v39, %v8864_v13  ;;  %v7727_v39 = vld [vmem:[%s9811_s10 + $0xa8] sm:$0xff]  }
 0xf84   : > { %v2538_v6 = vpack.c.bf16 %v2527_v61, %v2526_v43 }
 0xf86   : > { %7136 = vmatprep.mubr.msk.bf16.mxu1 %vm1289_vm11, %v2538_v6 }
 0xf87   : > { %7137 = vmatmul.mubr.msk.bf16.vlgmr.msra.gmra.mrb[44].mxu1 %vm1289_vm11, %v2539_v44 }
 0xf88   : > { %7149 = vmatpush3.bf16.msra.mxu1 %v2671_v51 }
 0xf92   : > { %v2495_v2 = vpop.xlane.xlu0 %2494 }
 0xf96   : > { %v2489_v46 = vpop.xlane.xlu0 %2488 }
 0xf97   : > { %v2504_v58 = vpop.xlane.xlu1 %2503 }
 0xf9a   : > { %v2501_v60 = vpop.xlane.xlu0 %2500 }
 0xf9b   : > { %7872 = vrcp.f32 %v2501_v60  ;;  %v2498_v55 = vpop.xlane.xlu1 %2497 }
 0xf9c   : > { %7874 = vrcp.f32 %v2498_v55 }
 0xf9d   : > { %7876 = vrcp.f32 %v2495_v2 }
 0xf9e   : > { %7878 = vrcp.f32 %v2489_v46 }
 0xf9f   : > { %v2492_v36 = vpop.xlane.xlu1 %2491 }
 0xfa0   : > { %7880 = vrcp.f32 %v2492_v36 }
 0xfa1   : > { %7882 = vrcp.f32 %v2504_v58 }
 0xfa5   : > { %v7873_v13 = vpop.eup %7872 }
 0xfa6   : > { %v7875_v31 = vpop.eup %7874  ;;  %v2533_v48 = vmul.f32 %v7873_v13, %v8890_v22 }
 0xfa7   : > { %v7877_v33 = vpop.eup %7876  ;;  %v2513_v5 = vpop.xlane.xlu0 %2512  ;;  %v2532_v26 = vmul.f32 %v7875_v31, %v8892_v11 }
 0xfa8   : > { %v7879_v25 = vpop.eup %7878  ;;  %v2531_v15 = vmul.f32 %v7877_v33, %v8874_v0  ;;  %7884 = vrcp.f32 %v2513_v5 }
 0xfa9   : > { %v2542_v63 = vpack.c.bf16 %v2533_v48, %v2532_v26  ;;  %v2529_v21 = vmul.f32 %v7879_v25, %v8878_v35 }
 0xfaa   : > { %v7881_v3 = vpop.eup %7880  ;;  %v2541_v12 = vpack.c.bf16 %v2531_v15, %v2531_v15 }
 0xfab   : > { %7152 = vmatprep.mubr.msk.bf16.mxu1 %vm1289_vm11, %v2542_v63  ;;  %v2507_v10 = vpop.xlane.xlu0 %2506  ;;  %v2530_v19 = vmul.f32 %v7881_v3, %v8898_v20  ;;  %v7883_v0 = vpop.eup %7882 }
 0xfac   : > { %7886 = vrcp.f32 %v2507_v10  ;;  %v2534_v17 = vmul.f32 %v7883_v0, %v8880_v59 }
 0xfad   : > { %v2540_v27 = vpack.c.bf16 %v2530_v19, %v2529_v21 }
 0xfae   : > { %v2543_v24 = vpack.c.bf16 %v2534_v17, %v2534_v17 }
 0xfaf   : > { %7144 = vmatprep.mubr.msk.bf16.mxu0 %vm1289_vm11, %v2540_v27  ;;  %v2735_v22 = vpop.permute.xlu0 %2734 }
 0xfb0   : > { %7145 = vmatmul.mubr.msk.bf16.vlgmr.msra.gmra.mrb[40].mxu0 %vm1289_vm11, %v2541_v12  ;;  %v2744_v11 = vsel %vm618_vm0, %v2735_v22, 0 }
 0xfb1   : > { %7157 = vmatpush3.bf16.msra.mxu0 %v2733_v37 }
 0xfb2   : > { %7567 = vmatprep.subr.msk.bf16.mxu0 %vm618_vm0, %v2735_v22  ;;  %v7885_v42 = vpop.eup %7884 }
 0xfb3   : > { %v2537_v8 = vmul.f32 %v7885_v42, %v8902_v7 }
 0xfb5   : > { %7159 = vmatpush3.bf16.msra.mxu0 %v2744_v11  ;;  %v2545_v59 = vpack.c.bf16 %v2537_v8, %v2537_v8 }
 0xfb6   : > { %v7887_v20 = vpop.eup %7886 }
 0xfb7   : > { %v2535_v54 = vmul.f32 %v7887_v20, %v8906_v16  ;;  %v7726_v16 = vld [vmem:[%s9811_s10 + $0xa0] sm:$0xff]  }
 0xfd7   : > { %v2510_v35 = vpop.xlane.xlu1 %2509 }
 0xfd8   : > { %7888 = vrcp.f32 %v2510_v35 }
 0xfdb   : > { %v2673_v18 = vpop.permute.xlu1 %2672 }
 0xfdc   : > { %7566 = vmatprep.subr.msk.bf16.mxu1 %vm618_vm0, %v2673_v18  ;;  %v2682_v28 = vsel %vm618_vm0, %v2673_v18, 0 }
 0xfdd   : > { %7151 = vmatpush3.bf16.msra.mxu1 %v2682_v28 }
 0xfde   : > { %7164 = vmatprep.subr.bf16.mxu1 %v7726_v16 }
 0xfe0   : > { %7153 = vmatmul.mubr.msk.bf16.vlgmr.msra.gmra.mrb[48].mxu1 %vm1289_vm11, %v2543_v24 }
 0xfe1   : > { %7165 = vmatpush3.bf16.msra.mxu1 %v7726_v16 }
 0xfe2   : > { %v7889_v45 = vpop.eup %7888  ;;  %7166 = vmatprep.subr.bf16.mxu1 %v7727_v39 }
 0xfe3   : > { %v2536_v9 = vmul.f32 %v7889_v45, %v8915_v50 }
 0xfe5   : > { %v2544_v23 = vpack.c.bf16 %v2536_v9, %v2535_v54  ;;  %7167 = vmatpush3.bf16.msra.mxu1 %v7727_v39 }
 0xfe7   : > { %7160 = vmatprep.mubr.msk.bf16.mxu0 %vm1289_vm11, %v2544_v23  ;;  %v7729_v23 = vld [vmem:[%s9811_s10 + $0xb8] sm:$0xff]  }
 0xfe8   : > { %7161 = vmatmul.mubr.msk.bf16.vlgmr.msra.gmra.mrb[44].mxu0 %vm1289_vm11, %v2545_v59  ;;  %v7732_v59 = vld [vmem:[%s9811_s10 + $0xc0] sm:$0xff]  }
 0xfe9   : > { %7180 = vmatprep.subr.bf16.mxu1 %v7732_v59 }
0x105a   : > { %v7138_v62 = vpop.f32.mrb[44].mxu1 }
0x105b   : > { %v2594_v32 = vpop.f32.mrb[45].mxu1 }
0x105c   : > { %v7139_v34 = vpop.f32.mrb[46].mxu1 }
0x105d   : > { %v2597_v37 = vpop.f32.mrb[47].mxu1 }
0x1083   : > { %v7146_v51 = vpop.f32.mrb[40].mxu0 }
0x1084   : > { %2801 = vrot.lane.b32.xlu0 %v7146_v51, %s9848_s19  ;;  %v2656_v56 = vpop.f32.mrb[41].mxu0 }
0x1085   : > { %v7147_v30 = vpop.f32.mrb[42].mxu0 }
0x1086   : > { %v2659_v7 = vpop.f32.mrb[43].mxu0 }
0x1087   : > { %v7663_v52 = vpack.i.bf16 %v2659_v7, %v2656_v56 }
0x1089   : > { %7664 = vrot.lane.b32.xlu1 %v7663_v52, %s9848_s19 }
0x10b3   : > { %v7154_v50 = vpop.f32.mrb[48].mxu1 }
0x10b4   : > { %2813 = vrot.lane.b32.xlu0 %v7154_v50, %s9849_s30  ;;  %v2718_v14 = vpop.f32.mrb[49].mxu1 }
0x10b5   : > { %v7155_v29 = vpop.f32.mrb[50].mxu1 }
0x10b6   : > { %v2721_v57 = vpop.f32.mrb[51].mxu1 }
0x10b7   : > { %v7668_v47 = vpack.i.bf16 %v2721_v57, %v2718_v14  ;;  %v6591_v57 = vld [vmem:[%s9812_s11 + $0x9] ss:$0 sm:$0xff] }
0x10b9   : > { %7669 = vrot.lane.b32.xlu1 %v7668_v47, %s9849_s30 }
0x10bb   : > { %v7162_v43 = vpop.f32.mrb[44].mxu0 }
0x10bc   : > { %v2780_v61 = vpop.f32.mrb[45].mxu0  ;;  %2825 = vrot.lane.b32.xlu0 %v7162_v43, %s9850_s20 }
0x10bd   : > { %v7163_v6 = vpop.f32.mrb[46].mxu0 }
0x10be   : > { %v2783_v44 = vpop.f32.mrb[47].mxu0 }
0x10bf   : > { %v7673_v2 = vpack.i.bf16 %v2783_v44, %v2780_v61 }
0x10c1   : > { %7674 = vrot.lane.b32.xlu1 %v7673_v2, %s9850_s20 }
0x10f6   : > { %v2802_v46 = vpop.permute.xlu0 %2801 }
0x10f7   : > { %v2832_v5 = vsel %vm1030_vm9, %v7138_v62, %v2802_v46  ;;  %v7733_v62 = vld [vmem:[%s9811_s10 + $0xc8] sm:$0xff]   ;;  %v7730_v46 = vld [vmem:[%s9811_s10 + $0xe0] sm:$0xff]  }
0x10fb   : > { %v7665_v58 = vpop.permute.xlu1 %7664 }
0x10fc   : > { %v7667_v36 = vunpack.i.h.bf16 %v7665_v58  ;;  %v7666_v13 = vunpack.i.l.bf16 %v7665_v58 }
0x10fe   : > { %v2831_v26 = vsel %vm1030_vm9, %v2597_v37, %v7667_v36  ;;  %v2830_v63 = vsel %vm1030_vm9, %v2594_v32, %v7666_v13  ;;  %v7734_v13 = vld [vmem:[%s9811_s10 + $0xd0] sm:$0xff]  }
0x1126   : > { %v2814_v60 = vpop.permute.xlu0 %2813 }
0x1127   : > { %v2835_v3 = vsel %vm1718_vm12, %v2832_v5, %v2814_v60  ;;  %v7731_v60 = vld [vmem:[%s9811_s10 + $0xe8] sm:$0xff]  }
0x112b   : > { %v7670_v55 = vpop.permute.xlu1 %7669 }
0x112c   : > { %v7672_v31 = vunpack.i.h.bf16 %v7670_v55  ;;  %v7671_v48 = vunpack.i.l.bf16 %v7670_v55  ;;  %v9019_v55 = vld [vmem:[%s518_s18] sm:$0xff]  ;;  %s9851_s18 = smov 112  }
0x112d   : > { %v3156_v36 = vpack.c.bf16 %v9019_v55, %v9019_v55 }
0x112e   : > { %v2826_v33 = vpop.permute.xlu0 %2825  ;;  %v2833_v21 = vsel %vm1718_vm12, %v2830_v63, %v7671_v48  ;;  %v2834_v19 = vsel %vm1718_vm12, %v2831_v26, %v7672_v31  ;;  %v7735_v31 = vld [vmem:[%s9811_s10 + $0xd8] sm:$0xff]  }
0x112f   : > { %v2838_v27 = vsel %vm1722_vm13, %v2835_v3, %v2826_v33 }
0x1130   : > { %v2840_v0 = vpack.c.bf16 %v2838_v27, %v2838_v27 }
0x1133   : > { %v7675_v25 = vpop.permute.xlu1 %7674 }
0x1134   : > { %v7677_v15 = vunpack.i.h.bf16 %v7675_v25  ;;  %v7676_v10 = vunpack.i.l.bf16 %v7675_v25 }
0x1136   : > { %v2836_v12 = vsel %vm1722_vm13, %v2833_v21, %v7676_v10  ;;  %v2837_v22 = vsel %vm1722_vm13, %v2834_v19, %v7677_v15  ;;  %v6603_v10 = vld [vmem:[%s9812_s11 + $0xb] ss:$0 sm:$0xff] }
0x1137   : > { %v2839_v11 = vpack.c.bf16 %v2837_v22, %v2836_v12 }
0x1139   : > { %7168 = vmatprep.mubr.msk.bf16.mxu1 %vm527_vm7, %v2839_v11 }
0x113a   : > { %7169 = vmatmul.mubr.msk.bf16.vlgmr.msra.gmra.mrb[52].mxu1 %vm527_vm7, %v2840_v0 }
0x113b   : > { %7181 = vmatpush3.bf16.msra.mxu1 %v7732_v59 }
0x113c   : > { %7182 = vmatprep.subr.bf16.mxu1 %v7733_v62 }
0x113f   : > { %7183 = vmatpush3.bf16.msra.mxu1 %v7733_v62 }
0x1140   : > { %7184 = vmatprep.subr.bf16.mxu1 %v7734_v13 }
0x1143   : > { %7185 = vmatpush3.bf16.msra.mxu1 %v7734_v13 }
0x1144   : > { %7186 = vmatprep.subr.bf16.mxu1 %v7735_v31 }
0x1147   : > { %7187 = vmatpush3.bf16.msra.mxu1 %v7735_v31 }
0x1148   : > { %7206 = vmatprep.subr.bf16.mxu1 %v8042_v1 }
0x120d   : > { %v7170_v35 = vpop.f32.mrb[52].mxu1 }
0x120e   : > { %v2897_v17 = vpop.f32.mrb[53].mxu1  ;;  %v8972_v42 = vadd.f32 %v7170_v35, %v8684_v4 }
0x120f   : > { %v8969_v18 = vadd.f32 %v2897_v17, %v8687_v49  ;;  %v7171_v28 = vpop.f32.mrb[54].mxu1 }
0x1210   : > { %v2900_v24 = vpop.f32.mrb[55].mxu1  ;;  %v2917_v9 = vmul.f32 %v8972_v42, %v8972_v42 }
0x1211   : > { %v8975_v20 = vadd.f32 %v2900_v24, %v8690_v53  ;;  %v2915_v45 = vmul.f32 %v8969_v18, %v8969_v18  ;;  %v7728_v53 = vld [vmem:[%s9811_s10 + $0xb0] sm:$0xff]  }
0x1212   : > { %v2924_v4 = vsel %vm891_vm8, %v2917_v9, 0.0  ;;  %7172 = vmatprep.subr.bf16.mxu0 %v7728_v53 }
0x1213   : > { %v2918_v8 = vsel %vm527_vm7, %v2915_v45, 0.0  ;;  %v2916_v54 = vmul.f32 %v8975_v20, %v8975_v20  ;;  %7173 = vmatpush3.bf16.msra.mxu0 %v7728_v53 }
0x1214   : > { %2919 = vadd.xlane.f32.xlu1 %v2918_v8  ;;  %7174 = vmatprep.subr.bf16.mxu0 %v7729_v23 }
0x1215   : > { %v2921_v49 = vsel %vm527_vm7, %v2916_v54, 0.0 }
0x1216   : > { %2922 = vadd.xlane.f32.xlu0 %v2921_v49 }
0x1217   : > { %7175 = vmatpush3.bf16.msra.mxu0 %v7729_v23 }
0x1218   : > { %7192 = vmatprep.subr.bf16.mxu0 %v8042_v1 }
0x121a   : > { %2925 = vadd.xlane.f32.xlu0 %v2924_v4 }
0x12a1   : > { %v2920_v32 = vpop.xlane.xlu1 %2919 }
0x12a2   : > { %v2927_v34 = vmul.f32 0.03125, %v2920_v32 }
0x12a3   : > { %v2923_v37 = vpop.xlane.xlu0 %2922 }
0x12a4   : > { %v2930_v51 = vadd.f32 1e-06, %v2927_v34  ;;  %v2928_v56 = vmul.f32 0.03125, %v2923_v37 }
0x12a6   : > { %7890 = vrsqrt.f32 %v2930_v51  ;;  %v2931_v30 = vadd.f32 1e-06, %v2928_v56  ;;  %v3145_v56 = vld [vmem:[%s524_s27] sm:$0x1] }
0x12a7   : > { %v2926_v7 = vpop.xlane.xlu0 %2925 }
0x12a8   : > { %7892 = vrsqrt.f32 %v2931_v30  ;;  %v2929_v52 = vmul.f32 0.03125, %v2926_v7  ;;  %v3146_v30 = vsub.f32 1.0, %v3145_v56 }
0x12aa   : > { %v2932_v16 = vadd.f32 1e-06, %v2929_v52  ;;  %v3147_v7 = vmul.f32 -1e+09, %v3146_v30 }
0x12ac   : > { %7894 = vrsqrt.f32 %v2932_v16  ;;  %v3152_v52 = vrot.slane %v3147_v7, %v866_v40  ;;  %v3144_v16 = vld [vmem:[%s9810_s9] sm:$0xff] }
0x12b0   : > { %v7891_v50 = vpop.eup %7890 }
0x12b1   : > { %v2936_v14 = vmul.f32 %v7891_v50, %v8969_v18  ;;  %v9096_v50 = vadd.f32 %v3152_v52, %v3144_v16 }
0x12b2   : > { %v7893_v29 = vpop.eup %7892 }
0x12b3   : > { %v2937_v39 = vmul.f32 %v7893_v29, %v8975_v20  ;;  %v2943_v47 = vmul.f32 %v6591_v57, %v2936_v14 }
0x12b5   : > { %v2944_v43 = vmul.f32 %v6591_v57, %v2937_v39 }
0x12b6   : > { %v7895_v61 = vpop.eup %7894 }
0x12b7   : > { %v2938_v6 = vmul.f32 %v7895_v61, %v8972_v42  ;;  %v2946_v44 = vpack.c.bf16 %v2944_v43, %v2943_v47 }
0x12b9   : > { %7176 = vmatprep.mubr.msk.bf16.mxu0 %vm527_vm7, %v2946_v44  ;;  %v2945_v2 = vmul.f32 %v6591_v57, %v2938_v6 }
0x12bb   : > { %v2947_v58 = vpack.c.bf16 %v2945_v2, %v2945_v2 }
0x12bd   : > { %7177 = vmatmul.mubr.msk.bf16.vlgmr.msra.gmra.mrb[48].mxu0 %vm527_vm7, %v2947_v58 }
0x12be   : > { %7193 = vmatpush3.bf16.msra.mxu0 %v7730_v46  ;;  %7196 = vmatprep.mubr.msk.bf16.mxu0 %vm8043_vm1, %v8042_v1 }
0x12bf   : > { %7194 = vmatprep.subr.bf16.mxu0 %v8042_v1 }
0x12c2   : > { %7195 = vmatpush3.bf16.msra.mxu0 %v7731_v60 }
0x12c3   : > { %7200 = vmatprep.subr.bf16.mxu0 %v8042_v1 }
0x12c5   : > { %7197 = vmatmul.mubr.msk.bf16.vlgmr.msra.gmra.mrb[52].mxu0 %vm527_vm7, %v3156_v36 }
0x12c6   : > { %7202 = vmatprep.mubr.msk.bf16.mxu0 %vm8043_vm1, %v8042_v1 }
0x1390   : > { %v7178_v48 = vpop.f32.mrb[48].mxu0 }
0x1391   : > { %v3004_v33 = vpop.f32.mrb[49].mxu0  ;;  %v3020_v26 = vmax.f32 %v7178_v48, 0.0 }
0x1392   : > { %v7179_v5 = vpop.f32.mrb[50].mxu0  ;;  %v3018_v63 = vmax.f32 %v3004_v33, 0.0 }
0x1393   : > { %v3007_v25 = vpop.f32.mrb[51].mxu0  ;;  %v3022_v21 = vpack.c.bf16 %v3020_v26, %v3020_v26 }
0x1394   : > { %v3019_v3 = vmax.f32 %v3007_v25, 0.0 }
0x1396   : > { %v3021_v15 = vpack.c.bf16 %v3019_v3, %v3018_v63 }
0x1398   : > { %7188 = vmatprep.mubr.msk.bf16.mxu1 %vm1942_vm14, %v3021_v15  ;;  %v3215_v19 = vpop.f32.mrb[52].mxu0 }
0x1399   : > { %v3216_v27 = vadd.f32 %v6603_v10, %v3215_v19  ;;  %7189 = vmatmul.mubr.msk.bf16.vlgmr.msra.gmra.mrb[56].mxu1 %vm1942_vm14, %v3022_v21  ;;  %v7198_v12 = vpop.f32.mrb[53].mxu0 }
0x139a   : > { %v3218_v22 = vpop.f32.mrb[54].mxu0  ;;  %7208 = vmatprep.mubr.msk.bf16.mxu1 %vm8043_vm1, %v8042_v1 }
0x139b   : > { %3225 = vrot.lane.b32.xlu1 %v3216_v27, %s9851_s18  ;;  %3222 = vrot.lane.b32.xlu0 %v3216_v27, %s9852_s17  ;;  %v7199_v11 = vpop.f32.mrb[55].mxu0  ;;  %v3231_v0 = vpack.c.bf16 %v3216_v27, %v3216_v27 }
0x139f   : > { %3228 = vrot.lane.b32.xlu1 %v3216_v27, %s9853_s0 }
0x13a3   : > { %3236 = vrot.lane.b32.xlu1 %v3231_v0, %s9846_s1 }
0x140d   : > { %v3226_v35 = vpop.permute.xlu1 %3225  ;;  %v3223_v17 = vpop.permute.xlu0 %3222 }
0x140e   : > { %v9046_v28 = vpack.c.bf16 %v3226_v35, %v3226_v35  ;;  %v9048_v24 = vpack.c.bf16 %v3223_v17, %v3223_v17 }
0x1410   : > { %3285 = vrot.lane.b32.xlu0 %v9048_v24, %s9846_s1  ;;  %3334 = vrot.lane.b32.xlu1 %v9046_v28, %s9846_s1 }
0x1411   : > { %v3229_v45 = vpop.permute.xlu1 %3228 }
0x1412   : > { %v9054_v8 = vpack.c.bf16 %v3229_v45, %v3229_v45 }
0x1414   : > { %3383 = vrot.lane.b32.xlu0 %v9054_v8, %s9846_s1 }
0x1415   : > { %v3237_v54 = vpop.permute.xlu1 %3236 }
0x1416   : > { %v3242_v49 = vsel %vm1030_vm9, %v3237_v54, 0 }
0x1417   : > { %7201 = vmatpush3.bf16.xpose.msra.mxu0 %v3242_v49 }
0x1418   : > { %7212 = vmatprep.subr.bf16.mxu0 %v8042_v1 }
0x141e   : > { %7203 = vmatmul.mubr.msk.bf16.vlgmr.msra.gmra.mrb[56].mxu0 %vm1030_vm9, %v3231_v0 }
0x141f   : > { %7214 = vmatprep.mubr.msk.bf16.mxu0 %vm8043_vm1, %v8042_v1 }
0x146c   : > { %v9063_v9 = vpop.f32.mrb[56].mxu1 }
0x146d   : > { %v9065_v4 = vpop.f32.mrb[57].mxu1 }
0x146e   : > { %v7191_v53 = vpop.f32.mrb[58].mxu1 }
0x146f   : > { %v9067_v23 = vpop.f32.mrb[59].mxu1 }
0x1482   : > { %v3286_v59 = vpop.permute.xlu0 %3285  ;;  %v3335_v62 = vpop.permute.xlu1 %3334 }
0x1483   : > { %v3291_v32 = vsel %vm1030_vm9, %v3286_v59, 0  ;;  %v3340_v34 = vsel %vm1030_vm9, %v3335_v62, 0 }
0x1484   : > { %7207 = vmatpush3.bf16.xpose.msra.mxu1 %v3291_v32  ;;  %7213 = vmatpush3.bf16.xpose.msra.mxu0 %v3340_v34 }
0x1485   : > { %7218 = vmatprep.subr.bf16.mxu1 %v8042_v1  ;;  %7224 = vmatprep.subr.bf16.mxu0 %v8042_v1 }
0x1486   : > { %v3384_v37 = vpop.permute.xlu0 %3383 }
0x1487   : > { %v3389_v51 = vsel %vm1030_vm9, %v3384_v37, 0 }
0x148b   : > { %7209 = vmatmul.mubr.msk.bf16.vlgmr.msra.gmra.mrb[60].mxu1 %vm1030_vm9, %v9048_v24  ;;  %7215 = vmatmul.mubr.msk.bf16.vlgmr.msra.gmra.mrb[60].mxu0 %vm1030_vm9, %v9046_v28 }
0x148c   : > { %7219 = vmatpush3.bf16.xpose.msra.mxu1 %v3389_v51  ;;  %7220 = vmatprep.mubr.msk.bf16.mxu1 %vm8043_vm1, %v8042_v1 }
0x148d   : > { %7226 = vmatprep.mubr.msk.bf16.mxu0 %vm8043_vm1, %v8042_v1  ;;  %7230 = vmatprep.subr.bf16.mxu1 %v8042_v1 }
0x1493   : > { %7221 = vmatmul.mubr.msk.bf16.vlgmr.msra.gmra.mrb[64].mxu1 %vm1030_vm9, %v9054_v8 }
0x1494   : > { %7232 = vmatprep.mubr.msk.bf16.mxu1 %vm8043_vm1, %v8042_v1 }
0x14f1   : > { %v3278_v14 = vpop.f32.mrb[56].mxu0 }
0x14f2   : > { %v3431_v29 = vmul.f32 0.35355338, %v3278_v14  ;;  %v7204_v57 = vpop.f32.mrb[57].mxu0 }
0x14f3   : > { %v3281_v39 = vpop.f32.mrb[58].mxu0 }
0x14f4   : > { %v3435_v47 = vadd.f32 %v3431_v29, %v9096_v50  ;;  %v7205_v43 = vpop.f32.mrb[59].mxu0 }
0x14f6   : > { %v3439_v61 = vsel %vm1030_vm9, %v3435_v47, -inf }
0x14f7   : > { %3440 = vmax.xlane.f32.xlu1 %v3439_v61 }
0x1508   : > { %3487 = vrot.lane.b32.xlu1 %v3231_v0, %s9847_s28 }
0x155e   : > { %v3327_v38 = vpop.f32.mrb[60].mxu1  ;;  %v3376_v40 = vpop.f32.mrb[60].mxu0 }
0x155f   : > { %v3432_v6 = vmul.f32 0.35355338, %v3327_v38  ;;  %v3433_v44 = vmul.f32 0.35355338, %v3376_v40  ;;  %v7210_v2 = vpop.f32.mrb[61].mxu1  ;;  %v7216_v46 = vpop.f32.mrb[61].mxu0 }
0x1560   : > { %v3330_v58 = vpop.f32.mrb[62].mxu1  ;;  %v3379_v60 = vpop.f32.mrb[62].mxu0 }
0x1561   : > { %v3436_v36 = vadd.f32 %v3432_v6, %v9096_v50  ;;  %v7211_v13 = vpop.f32.mrb[63].mxu1  ;;  %v7217_v31 = vpop.f32.mrb[63].mxu0  ;;  %v3437_v48 = vadd.f32 %v3433_v44, %v9096_v50 }
0x1563   : > { %v3442_v33 = vsel %vm1030_vm9, %v3436_v36, -inf  ;;  %v3445_v63 = vsel %vm1030_vm9, %v3437_v48, -inf }
0x1564   : > { %3443 = vmax.xlane.f32.xlu0 %v3442_v33 }
0x1566   : > { %v3425_v5 = vpop.f32.mrb[64].mxu1 }
0x1567   : > { %v3434_v26 = vmul.f32 0.35355338, %v3425_v5  ;;  %v7222_v25 = vpop.f32.mrb[65].mxu1 }
0x1568   : > { %3446 = vmax.xlane.f32.xlu0 %v3445_v63  ;;  %v3428_v3 = vpop.f32.mrb[66].mxu1  ;;  %v7736_v25 = vld [vmem:[%s9811_s10 + $0xf0] sm:$0xff]   ;;  %v7737_v63 = vld [vmem:[%s9811_s10 + $0xf8] sm:$0xff]  }
0x1569   : > { %v3438_v15 = vadd.f32 %v3434_v26, %v9096_v50  ;;  %v7223_v10 = vpop.f32.mrb[67].mxu1 }
0x156b   : > { %v3448_v21 = vsel %vm1030_vm9, %v3438_v15, -inf }
0x156c   : > { %3449 = vmax.xlane.f32.xlu0 %v3448_v21 }
0x1584   : > { %v3441_v19 = vpop.xlane.xlu1 %3440 }
0x1585   : > { %v3451_v27 = vsub.f32 %v3435_v47, %v3441_v19 }
0x1587   : > { %v3455_v12 = vmul.f32 1.442695, %v3451_v27 }
0x1588   : > { %v3488_v22 = vpop.permute.xlu1 %3487 }
0x1589   : > { %7896 = vpow2.f32 %v3455_v12  ;;  %v3493_v11 = vsel %vm563_vm2, %v3488_v22, 0 }
0x158a   : > { %7225 = vmatpush3.bf16.msra.mxu0 %v3493_v11 }
0x158b   : > { %7236 = vmatprep.subr.bf16.mxu0 %v8042_v1 }
0x1593   : > { %v7897_v0 = vpop.eup %7896 }
0x1594   : > { %v3463_v35 = vsel %vm1030_vm9, %v7897_v0, 0.0 }
0x1595   : > { %3464 = vadd.xlane.f32.xlu1 %v3463_v35 }
0x15f1   : > { %v3444_v17 = vpop.xlane.xlu0 %3443 }
0x15f2   : > { %v3452_v45 = vsub.f32 %v3436_v36, %v3444_v17 }
0x15f4   : > { %v3457_v54 = vmul.f32 1.442695, %v3452_v45  ;;  %v3109_v45 = vadd.f32 %v9065_v4, %v8969_v18  ;;  %v6618_v18 = vld [vmem:[%s9812_s11 + $0xc] ss:$0 sm:$0xff]  ;;  %v3110_v4 = vadd.f32 %v9067_v23, %v8975_v20  ;;  %v7738_v20 = vld [vmem:[%s9811_s10 + $0x110] sm:$0xff]  }
0x15f5   : > { %v3447_v49 = vpop.xlane.xlu0 %3446 }
0x15f6   : > { %7898 = vpow2.f32 %v3457_v54  ;;  %v3453_v53 = vsub.f32 %v3437_v48, %v3447_v49  ;;  %v3113_v54 = vmul.f32 %v3109_v45, %v3109_v45 }
0x15f8   : > { %v3459_v59 = vmul.f32 1.442695, %v3453_v53  ;;  %v3116_v49 = vsel %vm527_vm7, %v3113_v54, 0.0 }
0x15f9   : > { %v3450_v62 = vpop.xlane.xlu0 %3449 }
0x15fa   : > { %7900 = vpow2.f32 %v3459_v59  ;;  %v3454_v32 = vsub.f32 %v3438_v15, %v3450_v62 }
0x15fc   : > { %v3461_v34 = vmul.f32 1.442695, %v3454_v32 }
0x15fe   : > { %7902 = vpow2.f32 %v3461_v34 }
0x1600   : > { %v7899_v37 = vpop.eup %7898 }
0x1601   : > { %v3466_v51 = vsel %vm1030_vm9, %v7899_v37, 0.0 }
0x1602   : > { %3467 = vadd.xlane.f32.xlu0 %v3466_v51 }
0x1604   : > { %v7901_v56 = vpop.eup %7900 }
0x1605   : > { %v3469_v30 = vsel %vm1030_vm9, %v7901_v56, 0.0 }
0x1606   : > { %3470 = vadd.xlane.f32.xlu1 %v3469_v30 }
0x1608   : > { %v7903_v7 = vpop.eup %7902 }
0x1609   : > { %v3472_v52 = vsel %vm1030_vm9, %v7903_v7, 0.0 }
0x160a   : > { %3473 = vadd.xlane.f32.xlu0 %v3472_v52 }
0x1617   : > { %3583 = vrot.lane.b32.xlu1 %v9046_v28, %s9847_s28 }
0x161b   : > { %3631 = vrot.lane.b32.xlu1 %v9054_v8, %s9847_s28 }
0x1620   : > { %3535 = vrot.lane.b32.xlu0 %v9048_v24, %s9847_s28 }
0x1622   : > { %v3465_v16 = vpop.xlane.xlu1 %3464 }
0x1623   : > { %7904 = vrcp.f32 %v3465_v16 }
0x162d   : > { %v7905_v14 = vpop.eup %7904 }
0x162e   : > { %v3479_v29 = vmul.f32 %v7905_v14, %v7897_v0 }
0x1630   : > { %v3483_v57 = vpack.c.bf16 %v3479_v29, %v3479_v29  ;;  %v3111_v29 = vadd.f32 %v9063_v9, %v8972_v42  ;;  %v7739_v42 = vld [vmem:[%s9811_s10 + $0x118] sm:$0xff]  }
0x1632   : > { %7227 = vmatmul.mubr.msk.bf16.vlgmr.msra.gmra.mrb[64].mxu0 %vm1030_vm9, %v3483_v57  ;;  %v3114_v57 = vmul.f32 %v3110_v4, %v3110_v4 }
0x1633   : > { %7238 = vmatprep.mubr.msk.bf16.mxu0 %vm8043_vm1, %v8042_v1 }
0x168f   : > { %v3468_v39 = vpop.xlane.xlu0 %3467 }
0x1690   : > { %7906 = vrcp.f32 %v3468_v39 }
0x1693   : > { %v3471_v47 = vpop.xlane.xlu1 %3470 }
0x1694   : > { %7908 = vrcp.f32 %v3471_v47  ;;  %v3115_v47 = vmul.f32 %v3111_v29, %v3111_v29 }
0x1697   : > { %v3584_v28 = vpop.permute.xlu1 %3583  ;;  %v3474_v43 = vpop.xlane.xlu0 %3473 }
0x1698   : > { %v3589_v8 = vsel %vm563_vm2, %v3584_v28, 0  ;;  %7910 = vrcp.f32 %v3474_v43  ;;  %v3119_v28 = vsel %vm527_vm7, %v3114_v57, 0.0  ;;  %v3122_v43 = vsel %vm891_vm8, %v3115_v47, 0.0 }
0x1699   : > { %7237 = vmatpush3.bf16.msra.mxu0 %v3589_v8 }
0x169a   : > { %v7907_v24 = vpop.eup %7906  ;;  %7248 = vmatprep.subr.bf16.mxu0 %v8042_v1 }
0x169b   : > { %v3536_v61 = vpop.permute.xlu0 %3535  ;;  %v3480_v38 = vmul.f32 %v7907_v24, %v7899_v37  ;;  %v3632_v6 = vpop.permute.xlu1 %3631 }
0x169c   : > { %v3541_v40 = vsel %vm563_vm2, %v3536_v61, 0  ;;  %v3637_v58 = vsel %vm563_vm2, %v3632_v6, 0 }
0x169d   : > { %7231 = vmatpush3.bf16.msra.mxu1 %v3541_v40  ;;  %v3484_v44 = vpack.c.bf16 %v3480_v38, %v3480_v38 }
0x169e   : > { %v7909_v2 = vpop.eup %7908  ;;  %7242 = vmatprep.subr.bf16.mxu1 %v8042_v1 }
0x169f   : > { %v3481_v46 = vmul.f32 %v7909_v2, %v7901_v56 }
0x16a0   : > { %7233 = vmatmul.mubr.msk.bf16.vlgmr.msra.gmra.mrb[68].mxu1 %vm1030_vm9, %v3484_v44 }
0x16a1   : > { %7243 = vmatpush3.bf16.msra.mxu1 %v3637_v58  ;;  %v3485_v60 = vpack.c.bf16 %v3481_v46, %v3481_v46  ;;  %7244 = vmatprep.mubr.msk.bf16.mxu1 %vm8043_vm1, %v8042_v1 }
0x16a2   : > { %v7911_v36 = vpop.eup %7910  ;;  %7256 = vmatprep.subr.bf16.mxu1 %v8042_v1 }
0x16a3   : > { %7239 = vmatmul.mubr.msk.bf16.vlgmr.msra.gmra.mrb[68].mxu0 %vm1030_vm9, %v3485_v60  ;;  %v3482_v13 = vmul.f32 %v7911_v36, %v7903_v7 }
0x16a4   : > { %7252 = vmatprep.mubr.msk.bf16.mxu0 %vm8043_vm1, %v8042_v1  ;;  %7249 = vmatpush3.bf16.msra.mxu0 %v7736_v25 }
0x16a5   : > { %v3486_v31 = vpack.c.bf16 %v3482_v13, %v3482_v13  ;;  %7250 = vmatprep.subr.bf16.mxu0 %v8042_v1 }
0x16a8   : > { %7245 = vmatmul.mubr.msk.bf16.vlgmr.msra.gmra.mrb[72].mxu1 %vm1030_vm9, %v3486_v31  ;;  %7251 = vmatpush3.bf16.msra.mxu0 %v7737_v63 }
0x16a9   : > { %7260 = vmatprep.mubr.msk.bf16.mxu1 %vm8043_vm1, %v8042_v1  ;;  %7264 = vmatprep.subr.bf16.mxu0 %v7738_v20 }
0x1705   : > { %v3529_v48 = vpop.f32.mrb[64].mxu0 }
0x1706   : > { %v7228_v33 = vpop.f32.mrb[65].mxu0 }
0x1707   : > { %v3532_v5 = vpop.f32.mrb[66].mxu0 }
0x1708   : > { %v7229_v26 = vpop.f32.mrb[67].mxu0 }
0x1773   : > { %v3577_v3 = vpop.f32.mrb[68].mxu1 }
0x1774   : > { %3680 = vrot.lane.b32.xlu1 %v3577_v3, %s9848_s19  ;;  %v7234_v15 = vpop.f32.mrb[69].mxu1 }
0x1775   : > { %v3580_v10 = vpop.f32.mrb[70].mxu1 }
0x1776   : > { %v7235_v21 = vpop.f32.mrb[71].mxu1  ;;  %v3625_v19 = vpop.f32.mrb[68].mxu0 }
0x1777   : > { %v7240_v27 = vpop.f32.mrb[69].mxu0  ;;  %3684 = vrot.lane.b32.xlu0 %v3625_v19, %s9849_s30  ;;  %v7740_v21 = vld [vmem:[%s9811_s10 + $0x100] sm:$0xff]   ;;  %v7741_v19 = vld [vmem:[%s9811_s10 + $0x108] sm:$0xff]  }
0x1778   : > { %v3628_v12 = vpop.f32.mrb[70].mxu0  ;;  %7257 = vmatpush3.bf16.msra.mxu1 %v7740_v21 }
0x1779   : > { %v7241_v22 = vpop.f32.mrb[71].mxu0  ;;  %7258 = vmatprep.subr.bf16.mxu1 %v8042_v1 }
0x177b   : > { %v3673_v11 = vpop.f32.mrb[72].mxu1 }
0x177c   : > { %3688 = vrot.lane.b32.xlu1 %v3673_v11, %s9850_s20  ;;  %v7246_v0 = vpop.f32.mrb[73].mxu1  ;;  %7259 = vmatpush3.bf16.msra.mxu1 %v7741_v19 }
0x177d   : > { %v3676_v35 = vpop.f32.mrb[74].mxu1  ;;  %7272 = vmatprep.subr.bf16.mxu1 %v8042_v1  ;;  %v6619_v0 = vld [vmem:[%s9812_s11 + $0xd] ss:$0 sm:$0xff] }
0x177e   : > { %v7247_v17 = vpop.f32.mrb[75].mxu1 }
0x177f   : > { %v6620_v17 = vld [vmem:[%s9812_s11 + $0xe] ss:$0 sm:$0xff] }
0x17a0   : > { %3117 = vadd.xlane.f32.xlu1 %v3116_v49 }
0x17e6   : > { %v3681_v53 = vpop.permute.xlu1 %3680 }
0x17e7   : > { %v3691_v62 = vsel %vm1030_vm9, %v3529_v48, %v3681_v53  ;;  %v6602_v48 = vld [vmem:[%s9812_s11 + $0xa] ss:$0 sm:$0xff]  ;;  %v6625_v53 = vld [vmem:[%s9812_s11 + $0x10] ss:$0 sm:$0xff] }
0x17e9   : > { %v3685_v59 = vpop.permute.xlu0 %3684 }
0x17ea   : > { %v3692_v32 = vsel %vm1718_vm12, %v3691_v62, %v3685_v59 }
0x17ee   : > { %v3689_v34 = vpop.permute.xlu1 %3688 }
0x17ef   : > { %v3693_v37 = vsel %vm1722_vm13, %v3692_v32, %v3689_v34 }
0x17f0   : > { %v3694_v51 = vpack.c.bf16 %v3693_v37, %v3693_v37 }
0x17f2   : > { %7253 = vmatmul.mubr.msk.bf16.vlgmr.msra.gmra.mrb[72].mxu0 %vm527_vm7, %v3694_v51 }
0x17f3   : > { %7265 = vmatpush3.bf16.msra.mxu0 %v7738_v20 }
0x17f4   : > { %7266 = vmatprep.subr.bf16.mxu0 %v7739_v42 }
0x17f7   : > { %7267 = vmatpush3.bf16.msra.mxu0 %v7739_v42 }
0x17f8   : > { %7280 = vmatprep.subr.bf16.mxu0 %v8042_v1 }
0x18c5   : > { %v3748_v56 = vpop.f32.mrb[72].mxu0 }
0x18c6   : > { %v3754_v30 = vadd.f32 %v3748_v56, %v9019_v55  ;;  %v7254_v7 = vpop.f32.mrb[73].mxu0  ;;  %v3118_v55 = vpop.xlane.xlu1 %3117 }
0x18c7   : > { %v3751_v52 = vpop.f32.mrb[74].mxu0  ;;  %v3125_v9 = vmul.f32 0.03125, %v3118_v55 }
0x18c8   : > { %v3760_v16 = vadd.f32 %v6618_v18, %v3754_v30  ;;  %v7255_v14 = vpop.f32.mrb[75].mxu0 }
0x18c9   : > { %v3128_v8 = vadd.f32 1e-06, %v3125_v9  ;;  %v6621_v9 = vld [vmem:[%s9812_s11 + $0xf] ss:$0 sm:$0xff] }
0x18ca   : > { %v3763_v39 = vsel %vm527_vm7, %v3760_v16, 0.0 }
0x18cb   : > { %3764 = vadd.xlane.f32.xlu0 %v3763_v39  ;;  %7912 = vrsqrt.f32 %v3128_v8 }
0x18cf   : > { %3120 = vadd.xlane.f32.xlu0 %v3119_v28 }
0x18d3   : > { %3123 = vadd.xlane.f32.xlu0 %v3122_v43 }
0x18d5   : > { %v7913_v36 = vpop.eup %7912 }
0x18d6   : > { %v3134_v13 = vmul.f32 %v7913_v36, %v3109_v45 }
0x18d8   : > { %v3141_v5 = vmul.f32 %v6602_v48, %v3134_v13 }
0x1958   : > { %v3765_v23 = vpop.xlane.xlu0 %3764 }
0x1959   : > { %v3766_v24 = vmul.f32 0.03125, %v3765_v23 }
0x195b   : > { %v3767_v61 = vsub.f32 %v3760_v16, %v3766_v24 }
0x195c   : > { %v3121_v38 = vpop.xlane.xlu0 %3120 }
0x195d   : > { %v3126_v40 = vmul.f32 0.03125, %v3121_v38  ;;  %v3768_v6 = vmul.f32 %v3767_v61, %v3767_v61 }
0x195f   : > { %v3129_v44 = vadd.f32 1e-06, %v3126_v40  ;;  %v3769_v2 = vsel %vm527_vm7, %v3768_v6, 0.0 }
0x1960   : > { %3770 = vadd.xlane.f32.xlu0 %v3769_v2  ;;  %v3124_v46 = vpop.xlane.xlu0 %3123 }
0x1961   : > { %7914 = vrsqrt.f32 %v3129_v44  ;;  %v3127_v58 = vmul.f32 0.03125, %v3124_v46 }
0x1963   : > { %v3130_v60 = vadd.f32 1e-06, %v3127_v58 }
0x1965   : > { %7916 = vrsqrt.f32 %v3130_v60 }
0x196b   : > { %v7915_v31 = vpop.eup %7914 }
0x196c   : > { %v3135_v33 = vmul.f32 %v7915_v31, %v3110_v4 }
0x196e   : > { %v3142_v26 = vmul.f32 %v6602_v48, %v3135_v33 }
0x196f   : > { %v7917_v25 = vpop.eup %7916 }
0x1970   : > { %v3136_v63 = vmul.f32 %v7917_v25, %v3111_v29  ;;  %v9176_v3 = vpack.c.bf16 %v3142_v26, %v3141_v5 }
0x1972   : > { %7268 = vmatprep.mubr.msk.bf16.mxu0 %vm527_vm7, %v9176_v3  ;;  %v3143_v15 = vmul.f32 %v6602_v48, %v3136_v63 }
0x1974   : > { %v9180_v10 = vpack.c.bf16 %v3143_v15, %v3143_v15 }
0x1976   : > { %7269 = vmatmul.mubr.msk.bf16.vlgmr.msra.gmra.mrb[76].mxu0 %vm527_vm7, %v9180_v10 }
0x1977   : > { %7284 = vmatprep.mubr.msk.bf16.mxu0 %vm8043_vm1, %v8042_v1 }
0x19ed   : > { %v3771_v27 = vpop.xlane.xlu0 %3770 }
0x19ee   : > { %v3772_v12 = vmul.f32 0.03125, %v3771_v27 }
0x19f0   : > { %v3773_v22 = vadd.f32 1e-05, %v3772_v12 }
0x19f2   : > { %7918 = vrsqrt.f32 %v3773_v22 }
0x19fc   : > { %v7919_v11 = vpop.eup %7918 }
0x19fd   : > { %v3775_v35 = vmul.f32 %v7919_v11, %v3767_v61 }
0x19ff   : > { %v3780_v45 = vmul.f32 %v6619_v0, %v3775_v35 }
0x1a01   : > { %v9200_v54 = vadd.f32 %v6620_v17, %v3780_v45 }
0x1a03   : > { %v3786_v49 = vpack.c.bf16 %v9200_v54, %v9200_v54 }
0x1a05   : > { %7261 = vmatmul.mubr.msk.bf16.vlgmr.msra.gmra.mrb[76].mxu1 %vm527_vm7, %v3786_v49 }
0x1a06   : > { %7276 = vmatprep.mubr.msk.bf16.mxu1 %vm8043_vm1, %v8042_v1 }
0x1a49   : > { %v7270_v59 = vpop.f32.mrb[76].mxu0 }
0x1a4a   : > { %v3923_v62 = vadd.f32 %v7270_v59, %v6625_v53  ;;  %v3914_v32 = vpop.f32.mrb[77].mxu0 }
0x1a4b   : > { %v7271_v34 = vpop.f32.mrb[78].mxu0  ;;  %v3915_v51 = vadd.f32 %v6625_v53, %v3914_v32 }
0x1a4c   : > { %3949 = vrot.lane.b32.xlu0 %v3923_v62, %s9852_s17  ;;  %v3917_v37 = vpop.f32.mrb[79].mxu0  ;;  %v9219_v7 = vpack.c.bf16 %v3923_v62, %v3923_v62 }
0x1a4d   : > { %v3918_v56 = vadd.f32 %v6625_v53, %v3917_v37 }
0x1a4e   : > { %v3987_v52 = vsel %vm1030_vm9, %v9219_v7, 0 }
0x1a4f   : > { %v7678_v18 = vpack.i.bf16 %v3918_v56, %v3915_v51  ;;  %v9211_v4 = vpack.c.bf16 %v3918_v56, %v3915_v51 }
0x1a50   : > { %3958 = vrot.lane.b32.xlu0 %v3923_v62, %s9851_s18 }
0x1a51   : > { %7679 = vrot.lane.b32.xlu1 %v7678_v18, %s9852_s17  ;;  %v3984_v30 = vsel %vm1030_vm9, %v9211_v4, 0 }
0x1a52   : > { %7273 = vmatpush3.bf16.xpose.msra.mxu1 %v3984_v30 }
0x1a53   : > { %7274 = vmatprep.subr.bf16.mxu1 %v8042_v1 }
0x1a55   : > { %7684 = vrot.lane.b32.xlu1 %v7678_v18, %s9851_s18 }
0x1a59   : > { %7689 = vrot.lane.b32.xlu1 %v7678_v18, %s9853_s0 }
0x1a5a   : > { %7275 = vmatpush3.bf16.xpose.msra.mxu1 %v3987_v52 }
0x1a5b   : > { %7288 = vmatprep.subr.bf16.mxu1 %v8042_v1 }
0x1abe   : > { %v3950_v47 = vpop.permute.xlu0 %3949 }
0x1abf   : > { %v9230_v28 = vpack.c.bf16 %v3950_v47, %v3950_v47 }
0x1ac1   : > { %v4036_v43 = vsel %vm1030_vm9, %v9230_v28, 0 }
0x1ac2   : > { %v3959_v2 = vpop.permute.xlu0 %3958 }
0x1ac3   : > { %v7680_v16 = vpop.permute.xlu1 %7679  ;;  %v9249_v46 = vpack.c.bf16 %v3959_v2, %v3959_v2 }
0x1ac4   : > { %v7682_v14 = vunpack.i.h.bf16 %v7680_v16  ;;  %v7681_v29 = vunpack.i.l.bf16 %v7680_v16 }
0x1ac5   : > { %v4085_v58 = vsel %vm1030_vm9, %v9249_v46, 0 }
0x1ac6   : > { %v9225_v57 = vpack.c.bf16 %v7682_v14, %v7681_v29 }
0x1ac7   : > { %v7685_v20 = vpop.permute.xlu1 %7684 }
0x1ac8   : > { %v4033_v39 = vsel %vm1030_vm9, %v9225_v57, 0  ;;  %v7687_v42 = vunpack.i.h.bf16 %v7685_v20  ;;  %v7686_v55 = vunpack.i.l.bf16 %v7685_v20 }
0x1ac9   : > { %7281 = vmatpush3.bf16.xpose.msra.mxu0 %v4033_v39 }
0x1aca   : > { %7282 = vmatprep.subr.bf16.mxu0 %v8042_v1  ;;  %v9238_v8 = vpack.c.bf16 %v7687_v42, %v7686_v55 }
0x1acb   : > { %v7690_v60 = vpop.permute.xlu1 %7689 }
0x1acc   : > { %v4082_v44 = vsel %vm1030_vm9, %v9238_v8, 0  ;;  %v7692_v36 = vunpack.i.h.bf16 %v7690_v60  ;;  %v7691_v13 = vunpack.i.l.bf16 %v7690_v60 }
0x1ace   : > { %v3978_v31 = vpack.c.bf16 %v7692_v36, %v7691_v13 }
0x1ad0   : > { %v4131_v25 = vsel %vm1030_vm9, %v3978_v31, 0 }
0x1ad1   : > { %7283 = vmatpush3.bf16.xpose.msra.mxu0 %v4036_v43 }
0x1ad2   : > { %7296 = vmatprep.subr.bf16.mxu0 %v8042_v1 }
0x1ad8   : > { %v3845_v23 = vpop.f32.mrb[76].mxu1 }
0x1ad9   : > { %v3846_v24 = vadd.f32 %v6621_v9, %v3845_v23  ;;  %v7262_v61 = vpop.f32.mrb[77].mxu1 }
0x1ada   : > { %v3848_v38 = vpop.f32.mrb[78].mxu1 }
0x1adb   : > { %v3938_v40 = vpack.c.bf16 %v3846_v24, %v3846_v24  ;;  %3932 = vrot.lane.b32.xlu0 %v3846_v24, %s9851_s18  ;;  %3929 = vrot.lane.b32.xlu1 %v3846_v24, %s9852_s17  ;;  %v7263_v6 = vpop.f32.mrb[79].mxu1 }
0x1add   : > { %7277 = vmatmul.mubr.msk.bf16.vlgmr.msra.gmra.mrb[80].mxu1 %vm1030_vm9, %v3938_v40 }
0x1ade   : > { %7289 = vmatpush3.bf16.xpose.msra.mxu1 %v4082_v44  ;;  %7292 = vmatprep.mubr.msk.bf16.mxu1 %vm8043_vm1, %v8042_v1 }
0x1adf   : > { %3967 = vrot.lane.b32.xlu1 %v3923_v62, %s9853_s0  ;;  %7290 = vmatprep.subr.bf16.mxu1 %v8042_v1 }
0x1ae3   : > { %3935 = vrot.lane.b32.xlu1 %v3846_v24, %s9853_s0 }
0x1ae6   : > { %7291 = vmatpush3.bf16.xpose.msra.mxu1 %v4085_v58 }
0x1ae7   : > { %7304 = vmatprep.subr.bf16.mxu1 %v8042_v1 }
0x1b4d   : > { %v3930_v48 = vpop.permute.xlu1 %3929  ;;  %v3933_v33 = vpop.permute.xlu0 %3932 }
0x1b4e   : > { %v3939_v5 = vpack.c.bf16 %v3930_v48, %v3930_v48  ;;  %v3940_v26 = vpack.c.bf16 %v3933_v33, %v3933_v33 }
0x1b50   : > { %7285 = vmatmul.mubr.msk.bf16.vlgmr.msra.gmra.mrb[80].mxu0 %vm1030_vm9, %v3939_v5  ;;  %7293 = vmatmul.mubr.msk.bf16.vlgmr.msra.gmra.mrb[84].mxu1 %vm1030_vm9, %v3940_v26 }
0x1b51   : > { %7297 = vmatpush3.bf16.xpose.msra.mxu0 %v4131_v25  ;;  %v3968_v63 = vpop.permute.xlu1 %3967  ;;  %7300 = vmatprep.mubr.msk.bf16.mxu0 %vm8043_vm1, %v8042_v1 }
0x1b52   : > { %7298 = vmatprep.subr.bf16.mxu0 %v8042_v1  ;;  %7308 = vmatprep.mubr.msk.bf16.mxu1 %vm8043_vm1, %v8042_v1  ;;  %v9263_v15 = vpack.c.bf16 %v3968_v63, %v3968_v63 }
0x1b54   : > { %v4134_v21 = vsel %vm1030_vm9, %v9263_v15, 0 }
0x1b55   : > { %v3936_v19 = vpop.permute.xlu1 %3935 }
0x1b56   : > { %v3941_v27 = vpack.c.bf16 %v3936_v19, %v3936_v19 }
0x1b59   : > { %7299 = vmatpush3.bf16.xpose.msra.mxu0 %v4134_v21 }
0x1b5a   : > { %7312 = vmatprep.subr.bf16.mxu0 %v8042_v1 }
0x1b60   : > { %7301 = vmatmul.mubr.msk.bf16.vlgmr.msra.gmra.mrb[84].mxu0 %vm1030_vm9, %v3941_v27 }
0x1b61   : > { %7316 = vmatprep.mubr.msk.bf16.mxu0 %vm8043_vm1, %v8042_v1 }
0x1bb0   : > { %v4023_v12 = vpop.f32.mrb[80].mxu1 }
0x1bb1   : > { %v4176_v22 = vmul.f32 0.35355338, %v4023_v12  ;;  %v7278_v11 = vpop.f32.mrb[81].mxu1 }
0x1bb2   : > { %v4026_v0 = vpop.f32.mrb[82].mxu1 }
0x1bb3   : > { %v4180_v35 = vadd.f32 %v4176_v22, %v8376_v41  ;;  %v7279_v17 = vpop.f32.mrb[83].mxu1 }
0x1bb5   : > { %v4184_v45 = vsel %vm1289_vm11, %v4180_v35, -inf }
0x1bb6   : > { %4185 = vmax.xlane.f32.xlu0 %v4184_v45 }
0x1c23   : > { %v4072_v49 = vpop.f32.mrb[80].mxu0  ;;  %v4121_v53 = vpop.f32.mrb[84].mxu1 }
0x1c24   : > { %v4177_v59 = vmul.f32 0.35355338, %v4072_v49  ;;  %v4178_v62 = vmul.f32 0.35355338, %v4121_v53  ;;  %v7286_v32 = vpop.f32.mrb[81].mxu0  ;;  %v7294_v34 = vpop.f32.mrb[85].mxu1 }
0x1c25   : > { %v4075_v37 = vpop.f32.mrb[82].mxu0  ;;  %v4124_v51 = vpop.f32.mrb[86].mxu1 }
0x1c26   : > { %v4181_v56 = vadd.f32 %v4177_v59, %v8376_v41  ;;  %v4182_v18 = vadd.f32 %v4178_v62, %v8376_v41  ;;  %v7287_v30 = vpop.f32.mrb[83].mxu0  ;;  %v7295_v52 = vpop.f32.mrb[87].mxu1 }
0x1c28   : > { %v4187_v16 = vsel %vm1289_vm11, %v4181_v56, -inf  ;;  %v4190_v14 = vsel %vm1289_vm11, %v4182_v18, -inf }
0x1c29   : > { %4188 = vmax.xlane.f32.xlu1 %v4187_v16  ;;  %4191 = vmax.xlane.f32.xlu0 %v4190_v14 }
0x1c33   : > { %v4170_v29 = vpop.f32.mrb[84].mxu0 }
0x1c34   : > { %v4179_v39 = vmul.f32 0.35355338, %v4170_v29  ;;  %v7302_v47 = vpop.f32.mrb[85].mxu0 }
0x1c35   : > { %v4173_v43 = vpop.f32.mrb[86].mxu0 }
0x1c36   : > { %v4183_v20 = vadd.f32 %v4179_v39, %v8376_v41  ;;  %v7303_v42 = vpop.f32.mrb[87].mxu0  ;;  %v7742_v39 = vld [vmem:[%s9811_s10 + $0x120] sm:$0xff]  }
0x1c38   : > { %v4193_v55 = vsel %vm1289_vm11, %v4183_v20, -inf }
0x1c39   : > { %4194 = vmax.xlane.f32.xlu0 %v4193_v55 }
0x1c3a   : > { %4287 = vrot.lane.b32.xlu1 %v9225_v57, %s9846_s1 }
0x1c3e   : > { %4236 = vrot.lane.b32.xlu1 %v9219_v7, %s9846_s1 }
0x1c42   : > { %4289 = vrot.lane.b32.xlu1 %v9230_v28, %s9846_s1 }
0x1c43   : > { %v4186_v9 = vpop.xlane.xlu0 %4185 }
0x1c44   : > { %v4196_v23 = vsub.f32 %v4180_v35, %v4186_v9 }
0x1c46   : > { %4393 = vrot.lane.b32.xlu1 %v3978_v31, %s9846_s1  ;;  %v4200_v24 = vmul.f32 1.442695, %v4196_v23 }
0x1c48   : > { %7920 = vpow2.f32 %v4200_v24  ;;  %v7743_v24 = vld [vmem:[%s9811_s10 + $0x128] sm:$0xff]  }
0x1c4f   : > { %4234 = vrot.lane.b32.xlu0 %v9211_v4, %s9846_s1 }
0x1c52   : > { %v7921_v61 = vpop.eup %7920 }
0x1c53   : > { %4340 = vrot.lane.b32.xlu0 %v9238_v8, %s9846_s1  ;;  %v4208_v57 = vsel %vm1289_vm11, %v7921_v61, 0.0 }
0x1c72   : > { %4209 = vadd.xlane.f32.xlu0 %v4208_v57 }
0x1cb6   : > { %v4189_v7 = vpop.xlane.xlu1 %4188  ;;  %v4192_v38 = vpop.xlane.xlu0 %4191 }
0x1cb7   : > { %v4197_v40 = vsub.f32 %v4181_v56, %v4189_v7  ;;  %v4198_v28 = vsub.f32 %v4182_v18, %v4192_v38 }
0x1cb9   : > { %v4202_v6 = vmul.f32 1.442695, %v4197_v40  ;;  %v4204_v44 = vmul.f32 1.442695, %v4198_v28 }
0x1cba   : > { %v4288_v2 = vpop.permute.xlu1 %4287 }
0x1cbb   : > { %7922 = vpow2.f32 %v4202_v6  ;;  %7313 = vmatpush3.bf16.msra.mxu0 %v4288_v2 }
0x1cbc   : > { %7924 = vpow2.f32 %v4204_v44  ;;  %7314 = vmatprep.subr.bf16.mxu0 %v8042_v1 }
0x1cbe   : > { %v4237_v4 = vpop.permute.xlu1 %4236 }
0x1cbf   : > { %v4243_v25 = vsel %vm618_vm0, %v4237_v4, 0 }
0x1cc2   : > { %v4290_v8 = vpop.permute.xlu1 %4289 }
0x1cc3   : > { %v4296_v58 = vsel %vm618_vm0, %v4290_v8, 0 }
0x1cc4   : > { %7315 = vmatpush3.bf16.msra.mxu0 %v4296_v58 }
0x1cc5   : > { %v7923_v60 = vpop.eup %7922  ;;  %7328 = vmatprep.subr.bf16.mxu0 %v8042_v1 }
0x1cc6   : > { %v7925_v36 = vpop.eup %7924  ;;  %v4195_v13 = vpop.xlane.xlu0 %4194  ;;  %v4211_v31 = vsel %vm1289_vm11, %v7923_v60, 0.0 }
0x1cc7   : > { %v4199_v48 = vsub.f32 %v4183_v20, %v4195_v13  ;;  %4212 = vadd.xlane.f32.xlu1 %v4211_v31  ;;  %v4214_v33 = vsel %vm1289_vm11, %v7925_v36, 0.0  ;;  %v4394_v0 = vpop.permute.xlu1 %4393 }
0x1cc8   : > { %4215 = vadd.xlane.f32.xlu0 %v4214_v33 }
0x1cc9   : > { %v4206_v5 = vmul.f32 1.442695, %v4199_v48 }
0x1cca   : > { %v4235_v26 = vpop.permute.xlu0 %4234 }
0x1ccb   : > { %7926 = vpow2.f32 %v4206_v5  ;;  %7305 = vmatpush3.bf16.msra.mxu1 %v4235_v26 }
0x1ccc   : > { %7306 = vmatprep.subr.bf16.mxu1 %v8042_v1 }
0x1cce   : > { %v4341_v19 = vpop.permute.xlu0 %4340 }
0x1ccf   : > { %7307 = vmatpush3.bf16.msra.mxu1 %v4243_v25 }
0x1cd0   : > { %7320 = vmatprep.subr.bf16.mxu1 %v8042_v1 }
0x1cd5   : > { %v7927_v63 = vpop.eup %7926 }
0x1cd6   : > { %v4217_v21 = vsel %vm1289_vm11, %v7927_v63, 0.0 }
0x1cd7   : > { %4218 = vadd.xlane.f32.xlu1 %v4217_v21 }
0x1cde   : > { %4342 = vrot.lane.b32.xlu0 %v9249_v46, %s9846_s1 }
0x1ce8   : > { %4395 = vrot.lane.b32.xlu1 %v9263_v15, %s9846_s1 }
0x1cff   : > { %v4210_v27 = vpop.xlane.xlu0 %4209 }
0x1d00   : > { %7928 = vrcp.f32 %v4210_v27 }
0x1d0a   : > { %v7929_v12 = vpop.eup %7928 }
0x1d0b   : > { %v4224_v22 = vmul.f32 %v7929_v12, %v7921_v61  ;;  %v7744_v12 = vld [vmem:[%s9811_s10 + $0x130] sm:$0xff]  }
0x1d0d   : > { %v4228_v11 = vpack.c.bf16 %v4224_v22, %v4224_v22  ;;  %v7746_v22 = vld [vmem:[%s9811_s10 + $0x140] sm:$0xff]  }
0x1d0f   : > { %7309 = vmatmul.mubr.msk.bf16.vlgmr.msra.gmra.mrb[88].mxu1 %vm1289_vm11, %v4228_v11  ;;  %v7747_v11 = vld [vmem:[%s9811_s10 + $0x148] sm:$0xff]  }
0x1d10   : > { %7321 = vmatpush3.bf16.msra.mxu1 %v4341_v19  ;;  %7324 = vmatprep.mubr.msk.bf16.mxu1 %vm8043_vm1, %v8042_v1 }
0x1d11   : > { %7322 = vmatprep.subr.bf16.mxu1 %v8042_v1 }
0x1d54   : > { %v4213_v35 = vpop.xlane.xlu1 %4212 }
0x1d55   : > { %7930 = vrcp.f32 %v4213_v35  ;;  %v4216_v46 = vpop.xlane.xlu0 %4215 }
0x1d56   : > { %7932 = vrcp.f32 %v4216_v46 }
0x1d59   : > { %v4343_v15 = vpop.permute.xlu0 %4342 }
0x1d5a   : > { %v4349_v17 = vsel %vm618_vm0, %v4343_v15, 0 }
0x1d5b   : > { %7323 = vmatpush3.bf16.msra.mxu1 %v4349_v17  ;;  %v6642_v17 = vld [vmem:[%s9812_s11 + $0x12] ss:$0 sm:$0xff] }
0x1d5c   : > { %7336 = vmatprep.subr.bf16.mxu1 %v8042_v1 }
0x1d5f   : > { %v7931_v45 = vpop.eup %7930 }
0x1d60   : > { %v7933_v49 = vpop.eup %7932  ;;  %v4225_v53 = vmul.f32 %v7931_v45, %v7923_v60 }
0x1d61   : > { %v4226_v59 = vmul.f32 %v7933_v49, %v7925_v36  ;;  %v6641_v36 = vld [vmem:[%s9812_s11 + $0x11] ss:$0 sm:$0xff]  ;;  %v6643_v49 = vld [vmem:[%s9812_s11 + $0x13] ss:$0 sm:$0xff] }
0x1d62   : > { %v4229_v62 = vpack.c.bf16 %v4225_v53, %v4225_v53 }
0x1d63   : > { %v4230_v32 = vpack.c.bf16 %v4226_v59, %v4226_v59 }
0x1d64   : > { %v4219_v34 = vpop.xlane.xlu1 %4218  ;;  %7317 = vmatmul.mubr.msk.bf16.vlgmr.msra.gmra.mrb[88].mxu0 %vm1289_vm11, %v4229_v62 }
0x1d65   : > { %7934 = vrcp.f32 %v4219_v34  ;;  %7325 = vmatmul.mubr.msk.bf16.vlgmr.msra.gmra.mrb[92].mxu1 %vm1289_vm11, %v4230_v32  ;;  %7329 = vmatpush3.bf16.msra.mxu0 %v4394_v0  ;;  %v7748_v32 = vld [vmem:[%s9811_s10 + $0x150] sm:$0xff]   ;;  %v7749_v34 = vld [vmem:[%s9811_s10 + $0x158] sm:$0xff]  }
0x1d66   : > { %7330 = vmatprep.subr.bf16.mxu0 %v8042_v1  ;;  %7332 = vmatprep.mubr.msk.bf16.mxu0 %vm8043_vm1, %v8042_v1 }
0x1d67   : > { %7340 = vmatprep.mubr.msk.bf16.mxu1 %vm8043_vm1, %v8042_v1  ;;  %7337 = vmatpush3.bf16.msra.mxu1 %v7742_v39  ;;  %v6653_v39 = vld [vmem:[%s9812_s11 + $0x15] ss:$0 sm:$0xff] }
0x1d68   : > { %v4396_v37 = vpop.permute.xlu1 %4395  ;;  %7338 = vmatprep.subr.bf16.mxu1 %v8042_v1 }
0x1d69   : > { %v4402_v51 = vsel %vm618_vm0, %v4396_v37, 0  ;;  %v6644_v37 = vld [vmem:[%s9812_s11 + $0x14] ss:$0 sm:$0xff] }
0x1d6a   : > { %7331 = vmatpush3.bf16.msra.mxu0 %v4402_v51 }
0x1d6b   : > { %7344 = vmatprep.subr.bf16.mxu0 %v8042_v1  ;;  %7339 = vmatpush3.bf16.msra.mxu1 %v7743_v24 }
0x1d6c   : > { %7352 = vmatprep.subr.bf16.mxu1 %v8042_v1 }
0x1d6f   : > { %v7935_v56 = vpop.eup %7934 }
0x1d70   : > { %v4227_v18 = vmul.f32 %v7935_v56, %v7927_v63 }
0x1d72   : > { %v4231_v30 = vpack.c.bf16 %v4227_v18, %v4227_v18 }
0x1d74   : > { %7333 = vmatmul.mubr.msk.bf16.vlgmr.msra.gmra.mrb[92].mxu0 %vm1289_vm11, %v4231_v30 }
0x1d75   : > { %7348 = vmatprep.mubr.msk.bf16.mxu0 %vm8043_vm1, %v8042_v1  ;;  %7345 = vmatpush3.bf16.msra.mxu0 %v7744_v12 }
0x1d76   : > { %7346 = vmatprep.subr.bf16.mxu0 %v8042_v1 }
0x1de2   : > { %v4279_v52 = vpop.f32.mrb[88].mxu1 }
0x1de3   : > { %v7310_v16 = vpop.f32.mrb[89].mxu1 }
0x1de4   : > { %v4282_v14 = vpop.f32.mrb[90].mxu1 }
0x1de5   : > { %v7311_v29 = vpop.f32.mrb[91].mxu1 }
0x1e37   : > { %v4332_v47 = vpop.f32.mrb[88].mxu0 }
0x1e38   : > { %v4385_v43 = vpop.f32.mrb[92].mxu1  ;;  %v7318_v20 = vpop.f32.mrb[89].mxu0  ;;  %4445 = vrot.lane.b32.xlu0 %v4332_v47, %s9848_s19 }
0x1e39   : > { %4449 = vrot.lane.b32.xlu1 %v4385_v43, %s9849_s30  ;;  %v7326_v42 = vpop.f32.mrb[93].mxu1  ;;  %v4335_v55 = vpop.f32.mrb[90].mxu0 }
0x1e3a   : > { %v4388_v9 = vpop.f32.mrb[94].mxu1  ;;  %v7319_v23 = vpop.f32.mrb[91].mxu0 }
0x1e3b   : > { %v7327_v61 = vpop.f32.mrb[95].mxu1 }
0x1e47   : > { %v4438_v57 = vpop.f32.mrb[92].mxu0 }
0x1e48   : > { %4453 = vrot.lane.b32.xlu0 %v4438_v57, %s9850_s20  ;;  %v7334_v7 = vpop.f32.mrb[93].mxu0 }
0x1e49   : > { %v4441_v38 = vpop.f32.mrb[94].mxu0 }
0x1e4a   : > { %v7335_v40 = vpop.f32.mrb[95].mxu0  ;;  %v7750_v38 = vld [vmem:[%s9811_s10 + $0x160] sm:$0xff]  }
0x1e4b   : > { %v7751_v40 = vld [vmem:[%s9811_s10 + $0x168] sm:$0xff]  }
0x1eaa   : > { %v4446_v28 = vpop.permute.xlu0 %4445 }
0x1eab   : > { %v4450_v6 = vpop.permute.xlu1 %4449  ;;  %v4456_v44 = vsel %vm1030_vm9, %v4279_v52, %v4446_v28 }
0x1eac   : > { %v4457_v2 = vsel %vm1718_vm12, %v4456_v44, %v4450_v6 }
0x1eba   : > { %v4454_v4 = vpop.permute.xlu0 %4453 }
0x1ebb   : > { %v4458_v8 = vsel %vm1722_vm13, %v4457_v2, %v4454_v4  ;;  %v6654_v4 = vld [vmem:[%s9812_s11 + $0x16] ss:$0 sm:$0xff] }
0x1ebc   : > { %v4459_v58 = vpack.c.bf16 %v4458_v8, %v4458_v8 }
0x1ebe   : > { %7341 = vmatmul.mubr.msk.bf16.vlgmr.msra.gmra.mrb[96].mxu1 %vm527_vm7, %v4459_v58  ;;  %v6655_v58 = vld [vmem:[%s9812_s11 + $0x17] ss:$0 sm:$0xff] }
0x1ebf   : > { %7360 = vmatprep.mubr.msk.bf16.mxu1 %vm8043_vm1, %v8042_v1  ;;  %7353 = vmatpush3.bf16.msra.mxu1 %v7746_v22 }
0x1ec0   : > { %7354 = vmatprep.subr.bf16.mxu1 %v8042_v1 }
0x1ec3   : > { %7355 = vmatpush3.bf16.msra.mxu1 %v7747_v11 }
0x1ec4   : > { %7356 = vmatprep.subr.bf16.mxu1 %v8042_v1 }
0x1ec7   : > { %7357 = vmatpush3.bf16.msra.mxu1 %v7748_v32 }
0x1ec8   : > { %7358 = vmatprep.subr.bf16.mxu1 %v8042_v1 }
0x1ecb   : > { %7359 = vmatpush3.bf16.msra.mxu1 %v7749_v34 }
0x1ecc   : > { %7378 = vmatprep.subr.bf16.mxu1 %v8042_v1 }
0x1f91   : > { %v4513_v60 = vpop.f32.mrb[96].mxu1 }
0x1f92   : > { %v4519_v13 = vadd.f32 %v4513_v60, %v9200_v54  ;;  %v7342_v31 = vpop.f32.mrb[97].mxu1  ;;  %v7745_v54 = vld [vmem:[%s9811_s10 + $0x138] sm:$0xff]  }
0x1f93   : > { %v4516_v48 = vpop.f32.mrb[98].mxu1  ;;  %7347 = vmatpush3.bf16.msra.mxu0 %v7745_v54  ;;  %v6656_v31 = vld [vmem:[%s9812_s11 + $0x18] ss:$0 sm:$0xff] }
0x1f94   : > { %v4525_v33 = vadd.f32 %v6641_v36, %v4519_v13  ;;  %v7343_v5 = vpop.f32.mrb[99].mxu1  ;;  %7364 = vmatprep.subr.bf16.mxu0 %v8042_v1 }
0x1f96   : > { %v4528_v26 = vsel %vm527_vm7, %v4525_v33, 0.0 }
0x1f97   : > { %4529 = vadd.xlane.f32.xlu1 %v4528_v26 }
0x2024   : > { %v4530_v25 = vpop.xlane.xlu1 %4529 }
0x2025   : > { %v4531_v63 = vmul.f32 0.03125, %v4530_v25 }
0x2027   : > { %v4532_v21 = vsub.f32 %v4525_v33, %v4531_v63 }
0x2029   : > { %v4533_v19 = vmul.f32 %v4532_v21, %v4532_v21 }
0x202b   : > { %v4534_v27 = vsel %vm527_vm7, %v4533_v19, 0.0 }
0x202c   : > { %4535 = vadd.xlane.f32.xlu0 %v4534_v27 }
0x20b9   : > { %v4536_v0 = vpop.xlane.xlu0 %4535 }
0x20ba   : > { %v4537_v35 = vmul.f32 0.03125, %v4536_v0 }
0x20bc   : > { %v4538_v46 = vadd.f32 1e-05, %v4537_v35 }
0x20be   : > { %7936 = vrsqrt.f32 %v4538_v46 }
0x20c8   : > { %v7937_v15 = vpop.eup %7936 }
0x20c9   : > { %v4540_v45 = vmul.f32 %v7937_v15, %v4532_v21 }
0x20cb   : > { %v4545_v53 = vmul.f32 %v6642_v17, %v4540_v45 }
0x20cd   : > { %v4550_v59 = vadd.f32 %v6643_v49, %v4545_v53 }
0x20cf   : > { %v4551_v62 = vpack.c.bf16 %v4550_v59, %v4550_v59 }
0x20d1   : > { %7349 = vmatmul.mubr.msk.bf16.vlgmr.msra.gmra.mrb[96].mxu0 %vm527_vm7, %v4551_v62 }
0x20d2   : > { %7368 = vmatprep.mubr.msk.bf16.mxu0 %vm8043_vm1, %v8042_v1  ;;  %7365 = vmatpush3.bf16.msra.mxu0 %v7750_v38 }
0x20d3   : > { %7366 = vmatprep.subr.bf16.mxu0 %v8042_v1 }
0x20d6   : > { %7367 = vmatpush3.bf16.msra.mxu0 %v7751_v40 }
0x20d7   : > { %7372 = vmatprep.subr.bf16.mxu0 %v8042_v1 }
0x21a4   : > { %v4610_v51 = vpop.f32.mrb[96].mxu0 }
0x21a5   : > { %v4611_v56 = vadd.f32 %v6644_v37, %v4610_v51  ;;  %v7350_v18 = vpop.f32.mrb[97].mxu0 }
0x21a6   : > { %v4613_v30 = vpop.f32.mrb[98].mxu0 }
0x21a7   : > { %v4616_v52 = vmax.f32 %v4611_v56, 0.0  ;;  %v7351_v16 = vpop.f32.mrb[99].mxu0 }
0x21a9   : > { %v4617_v14 = vpack.c.bf16 %v4616_v52, %v4616_v52 }
0x21ab   : > { %7361 = vmatmul.mubr.msk.bf16.vlgmr.msra.gmra.mrb[100].mxu1 %vm1942_vm14, %v4617_v14 }
0x21ac   : > { %7380 = vmatprep.mubr.msk.bf16.mxu1 %vm8043_vm1, %v8042_v1 }
0x227e   : > { %v4687_v29 = vpop.f32.mrb[100].mxu1 }
0x227f   : > { %v4693_v47 = vadd.f32 %v4687_v29, %v4550_v59  ;;  %v7362_v43 = vpop.f32.mrb[101].mxu1 }
0x2280   : > { %v4690_v20 = vpop.f32.mrb[102].mxu1 }
0x2281   : > { %v4699_v42 = vadd.f32 %v6653_v39, %v4693_v47  ;;  %v7363_v55 = vpop.f32.mrb[103].mxu1 }
0x2283   : > { %v4702_v9 = vsel %vm527_vm7, %v4699_v42, 0.0 }
0x2284   : > { %4703 = vadd.xlane.f32.xlu0 %v4702_v9 }
0x2311   : > { %v4704_v23 = vpop.xlane.xlu0 %4703 }
0x2312   : > { %v4705_v24 = vmul.f32 0.03125, %v4704_v23 }
0x2314   : > { %v4706_v61 = vsub.f32 %v4699_v42, %v4705_v24 }
0x2316   : > { %v4707_v57 = vmul.f32 %v4706_v61, %v4706_v61 }
0x2318   : > { %v4708_v7 = vsel %vm527_vm7, %v4707_v57, 0.0 }
0x2319   : > { %4709 = vadd.xlane.f32.xlu0 %v4708_v7 }
0x23a6   : > { %v4710_v28 = vpop.xlane.xlu0 %4709 }
0x23a7   : > { %v4711_v6 = vmul.f32 0.03125, %v4710_v28 }
0x23a9   : > { %v4712_v44 = vadd.f32 1e-05, %v4711_v6 }
0x23ab   : > { %7938 = vrsqrt.f32 %v4712_v44 }
0x23b5   : > { %v7939_v2 = vpop.eup %7938 }
0x23b6   : > { %v4714_v8 = vmul.f32 %v7939_v2, %v4706_v61 }
0x23b8   : > { %v4719_v60 = vmul.f32 %v6654_v4, %v4714_v8 }
0x23ba   : > { %v9403_v36 = vadd.f32 %v6655_v58, %v4719_v60 }
0x23bc   : > { %v4725_v13 = vpack.c.bf16 %v9403_v36, %v9403_v36 }
0x23be   : > { %7369 = vmatmul.mubr.msk.bf16.vlgmr.msra.gmra.mrb[100].mxu0 %vm527_vm7, %v4725_v13 }
0x23bf   : > { %7374 = vmatprep.mubr.msk.bf16.mxu0 %vm8043_vm1, %v8042_v1 }
0x2491   : > { %v4784_v48 = vpop.f32.mrb[100].mxu0 }
0x2492   : > { %v4785_v33 = vadd.f32 %v6656_v31, %v4784_v48  ;;  %v7370_v5 = vpop.f32.mrb[101].mxu0 }
0x2493   : > { %v4787_v26 = vpop.f32.mrb[102].mxu0 }
0x2494   : > { %4794 = vrot.lane.b32.xlu0 %v4785_v33, %s9851_s18  ;;  %4791 = vrot.lane.b32.xlu1 %v4785_v33, %s9852_s17  ;;  %v7371_v25 = vpop.f32.mrb[103].mxu0  ;;  %v9416_v63 = vpack.c.bf16 %v4785_v33, %v4785_v33 }
0x2498   : > { %4797 = vrot.lane.b32.xlu1 %v4785_v33, %s9853_s0 }
0x249c   : > { %4805 = vrot.lane.b32.xlu1 %v9416_v63, %s9846_s1 }
0x2506   : > { %v4795_v21 = vpop.permute.xlu0 %4794  ;;  %v4792_v19 = vpop.permute.xlu1 %4791 }
0x2507   : > { %v9420_v27 = vpack.c.bf16 %v4795_v21, %v4795_v21  ;;  %v9422_v12 = vpack.c.bf16 %v4792_v19, %v4792_v19 }
0x2509   : > { %4903 = vrot.lane.b32.xlu0 %v9420_v27, %s9846_s1  ;;  %4854 = vrot.lane.b32.xlu1 %v9422_v12, %s9846_s1 }
0x250a   : > { %v4798_v54 = vpop.permute.xlu1 %4797 }
0x250b   : > { %v9428_v22 = vpack.c.bf16 %v4798_v54, %v4798_v54 }
0x250d   : > { %4952 = vrot.lane.b32.xlu1 %v9428_v22, %s9846_s1 }
0x250e   : > { %v4806_v11 = vpop.permute.xlu1 %4805 }
0x250f   : > { %v4811_v0 = vsel %vm1030_vm9, %v4806_v11, 0 }
0x2510   : > { %7373 = vmatpush3.bf16.xpose.msra.mxu0 %v4811_v0 }
0x2511   : > { %7384 = vmatprep.subr.bf16.mxu0 %v8042_v1 }
0x2517   : > { %7375 = vmatmul.mubr.msk.bf16.vlgmr.msra.gmra.mrb[104].mxu0 %vm1030_vm9, %v9416_v63 }
0x2518   : > { %7386 = vmatprep.mubr.msk.bf16.mxu0 %vm8043_vm1, %v8042_v1 }
0x257b   : > { %v4904_v35 = vpop.permute.xlu0 %4903  ;;  %v4855_v46 = vpop.permute.xlu1 %4854 }
0x257c   : > { %v4909_v15 = vsel %vm1030_vm9, %v4904_v35, 0  ;;  %v4860_v17 = vsel %vm1030_vm9, %v4855_v46, 0 }
0x257d   : > { %7379 = vmatpush3.bf16.xpose.msra.mxu1 %v4860_v17  ;;  %7385 = vmatpush3.bf16.xpose.msra.mxu0 %v4909_v15 }
0x257e   : > { %7390 = vmatprep.subr.bf16.mxu1 %v8042_v1  ;;  %7396 = vmatprep.subr.bf16.mxu0 %v8042_v1 }
0x257f   : > { %v4953_v45 = vpop.permute.xlu1 %4952 }
0x2580   : > { %v4958_v49 = vsel %vm1030_vm9, %v4953_v45, 0 }
0x2584   : > { %7381 = vmatmul.mubr.msk.bf16.vlgmr.msra.gmra.mrb[104].mxu1 %vm1030_vm9, %v9422_v12  ;;  %7387 = vmatmul.mubr.msk.bf16.vlgmr.msra.gmra.mrb[108].mxu0 %vm1030_vm9, %v9420_v27 }
0x2585   : > { %7391 = vmatpush3.bf16.xpose.msra.mxu1 %v4958_v49  ;;  %7392 = vmatprep.mubr.msk.bf16.mxu1 %vm8043_vm1, %v8042_v1 }
0x2586   : > { %7402 = vmatprep.subr.bf16.mxu1 %v8042_v1  ;;  %7398 = vmatprep.mubr.msk.bf16.mxu0 %vm8043_vm1, %v8042_v1 }
0x258c   : > { %7393 = vmatmul.mubr.msk.bf16.vlgmr.msra.gmra.mrb[108].mxu1 %vm1030_vm9, %v9428_v22 }
0x258d   : > { %7404 = vmatprep.mubr.msk.bf16.mxu1 %vm8043_vm1, %v8042_v1 }
0x25ea   : > { %v4847_v53 = vpop.f32.mrb[104].mxu0 }
0x25eb   : > { %v5000_v59 = vmul.f32 0.35355338, %v4847_v53  ;;  %v7376_v62 = vpop.f32.mrb[105].mxu0 }
0x25ec   : > { %v4850_v32 = vpop.f32.mrb[106].mxu0 }
0x25ed   : > { %v5004_v34 = vadd.f32 %v5000_v59, %v9096_v50  ;;  %v7377_v37 = vpop.f32.mrb[107].mxu0 }
0x25ef   : > { %v5008_v51 = vsel %vm1030_vm9, %v5004_v34, -inf }
0x25f0   : > { %5009 = vmax.xlane.f32.xlu0 %v5008_v51 }
0x2657   : > { %v4896_v56 = vpop.f32.mrb[104].mxu1  ;;  %v4945_v18 = vpop.f32.mrb[108].mxu0 }
0x2658   : > { %v5001_v30 = vmul.f32 0.35355338, %v4896_v56  ;;  %v5002_v52 = vmul.f32 0.35355338, %v4945_v18  ;;  %v7382_v16 = vpop.f32.mrb[105].mxu1  ;;  %v7388_v14 = vpop.f32.mrb[109].mxu0 }
0x2659   : > { %v4899_v29 = vpop.f32.mrb[106].mxu1  ;;  %v4948_v39 = vpop.f32.mrb[110].mxu0 }
0x265a   : > { %v5005_v47 = vadd.f32 %v5001_v30, %v9096_v50  ;;  %v5006_v43 = vadd.f32 %v5002_v52, %v9096_v50  ;;  %v7383_v20 = vpop.f32.mrb[107].mxu1  ;;  %v7389_v42 = vpop.f32.mrb[111].mxu0  ;;  %v7752_v29 = vld [vmem:[%s9811_s10 + $0x170] sm:$0xff]  }
0x265c   : > { %v5014_v55 = vsel %vm1030_vm9, %v5006_v43, -inf  ;;  %v5011_v9 = vsel %vm1030_vm9, %v5005_v47, -inf }
0x265d   : > { %5015 = vmax.xlane.f32.xlu0 %v5014_v55  ;;  %5012 = vmax.xlane.f32.xlu1 %v5011_v9 }
0x265f   : > { %v4994_v23 = vpop.f32.mrb[108].mxu1 }
0x2660   : > { %v5003_v24 = vmul.f32 0.35355338, %v4994_v23  ;;  %v7394_v61 = vpop.f32.mrb[109].mxu1 }
0x2661   : > { %v4997_v57 = vpop.f32.mrb[110].mxu1 }
0x2662   : > { %v5007_v7 = vadd.f32 %v5003_v24, %v9096_v50  ;;  %v7395_v38 = vpop.f32.mrb[111].mxu1 }
0x2663   : > { %v7753_v38 = vld [vmem:[%s9811_s10 + $0x178] sm:$0xff]  }
0x2664   : > { %v5017_v40 = vsel %vm1030_vm9, %v5007_v7, -inf }
0x2665   : > { %5018 = vmax.xlane.f32.xlu0 %v5017_v40  ;;  %v7754_v40 = vld [vmem:[%s9811_s10 + $0x190] sm:$0xff]  }
0x267d   : > { %v5010_v28 = vpop.xlane.xlu0 %5009 }
0x267e   : > { %v5020_v6 = vsub.f32 %v5004_v34, %v5010_v28 }
0x2680   : > { %v5024_v44 = vmul.f32 1.442695, %v5020_v6 }
0x2682   : > { %7940 = vpow2.f32 %v5024_v44 }
0x268c   : > { %v7941_v2 = vpop.eup %7940 }
0x268d   : > { %v5032_v4 = vsel %vm1030_vm9, %v7941_v2, 0.0 }
0x268e   : > { %5033 = vadd.xlane.f32.xlu0 %v5032_v4 }
0x26ea   : > { %v5016_v8 = vpop.xlane.xlu0 %5015  ;;  %v5013_v58 = vpop.xlane.xlu1 %5012 }
0x26eb   : > { %v5022_v60 = vsub.f32 %v5006_v43, %v5016_v8  ;;  %v5021_v13 = vsub.f32 %v5005_v47, %v5013_v58 }
0x26ed   : > { %v5028_v31 = vmul.f32 1.442695, %v5022_v60  ;;  %v5026_v48 = vmul.f32 1.442695, %v5021_v13 }
0x26ef   : > { %7942 = vpow2.f32 %v5028_v31 }
0x26f0   : > { %7944 = vpow2.f32 %v5026_v48 }
0x26f2   : > { %v5019_v25 = vpop.xlane.xlu0 %5018 }
0x26f3   : > { %v5023_v21 = vsub.f32 %v5007_v7, %v5019_v25 }
0x26f5   : > { %v5030_v19 = vmul.f32 1.442695, %v5023_v21 }
0x26f7   : > { %7946 = vpow2.f32 %v5030_v19 }
0x26f9   : > { %v7943_v50 = vpop.eup %7942 }
0x26fa   : > { %v7945_v33 = vpop.eup %7944  ;;  %v5038_v5 = vsel %vm1030_vm9, %v7943_v50, 0.0 }
0x26fb   : > { %v5035_v26 = vsel %vm1030_vm9, %v7945_v33, 0.0  ;;  %5039 = vadd.xlane.f32.xlu0 %v5038_v5  ;;  %v6671_v5 = vld [vmem:[%s9812_s11 + $0x19] ss:$0 sm:$0xff] }
0x26fc   : > { %5036 = vadd.xlane.f32.xlu1 %v5035_v26 }
0x2701   : > { %v7947_v54 = vpop.eup %7946 }
0x2702   : > { %v5041_v11 = vsel %vm1030_vm9, %v7947_v54, 0.0 }
0x270d   : > { %5104 = vrot.lane.b32.xlu1 %v9422_v12, %s9847_s28 }
0x2711   : > { %5152 = vrot.lane.b32.xlu1 %v9420_v27, %s9847_s28  ;;  %5056 = vrot.lane.b32.xlu0 %v9416_v63, %s9847_s28 }
0x271b   : > { %v5034_v0 = vpop.xlane.xlu0 %5033 }
0x271c   : > { %7948 = vrcp.f32 %v5034_v0 }
0x2726   : > { %v7949_v12 = vpop.eup %7948 }
0x2727   : > { %v5048_v27 = vmul.f32 %v7949_v12, %v7941_v2 }
0x2729   : > { %v5052_v49 = vpack.c.bf16 %v5048_v27, %v5048_v27 }
0x2735   : > { %5042 = vadd.xlane.f32.xlu1 %v5041_v11 }
0x2746   : > { %5200 = vrot.lane.b32.xlu1 %v9428_v22, %s9847_s28 }
0x2788   : > { %v5040_v35 = vpop.xlane.xlu0 %5039 }
0x2789   : > { %v5037_v46 = vpop.xlane.xlu1 %5036  ;;  %7950 = vrcp.f32 %v5040_v35 }
0x278a   : > { %7952 = vrcp.f32 %v5037_v46 }
0x278c   : > { %v5057_v63 = vpop.permute.xlu0 %5056 }
0x278d   : > { %v5105_v15 = vpop.permute.xlu1 %5104  ;;  %v5062_v17 = vsel %vm563_vm2, %v5057_v63, 0 }
0x278e   : > { %v5110_v45 = vsel %vm563_vm2, %v5105_v15, 0  ;;  %7397 = vmatpush3.bf16.msra.mxu0 %v5062_v17 }
0x278f   : > { %7403 = vmatpush3.bf16.msra.mxu1 %v5110_v45  ;;  %7408 = vmatprep.subr.bf16.mxu0 %v8042_v1 }
0x2790   : > { %7414 = vmatprep.subr.bf16.mxu1 %v8042_v1 }
0x2791   : > { %v5153_v22 = vpop.permute.xlu1 %5152  ;;  %7399 = vmatmul.mubr.msk.bf16.vlgmr.msra.gmra.mrb[112].mxu0 %vm1030_vm9, %v5052_v49 }
0x2792   : > { %v5158_v53 = vsel %vm563_vm2, %v5153_v22, 0  ;;  %7410 = vmatprep.mubr.msk.bf16.mxu0 %vm8043_vm1, %v8042_v1 }
0x2793   : > { %v7951_v59 = vpop.eup %7950  ;;  %7409 = vmatpush3.bf16.msra.mxu0 %v5158_v53 }
0x2794   : > { %v7953_v62 = vpop.eup %7952  ;;  %v5050_v32 = vmul.f32 %v7951_v59, %v7943_v50  ;;  %7420 = vmatprep.subr.bf16.mxu0 %v8042_v1  ;;  %v7755_v50 = vld [vmem:[%s9811_s10 + $0x198] sm:$0xff]   ;;  %v7756_v59 = vld [vmem:[%s9811_s10 + $0x180] sm:$0xff]  }
0x2795   : > { %v5049_v34 = vmul.f32 %v7953_v62, %v7945_v33  ;;  %v7757_v62 = vld [vmem:[%s9811_s10 + $0x188] sm:$0xff]  }
0x2796   : > { %v5054_v37 = vpack.c.bf16 %v5050_v32, %v5050_v32 }
0x2797   : > { %v5053_v51 = vpack.c.bf16 %v5049_v34, %v5049_v34 }
0x2799   : > { %7405 = vmatmul.mubr.msk.bf16.vlgmr.msra.gmra.mrb[112].mxu1 %vm1030_vm9, %v5053_v51  ;;  %7411 = vmatmul.mubr.msk.bf16.vlgmr.msra.gmra.mrb[116].mxu0 %vm1030_vm9, %v5054_v37 }
0x279a   : > { %7416 = vmatprep.mubr.msk.bf16.mxu1 %vm8043_vm1, %v8042_v1  ;;  %7424 = vmatprep.mubr.msk.bf16.mxu0 %vm8043_vm1, %v8042_v1 }
0x279b   : > { %7421 = vmatpush3.bf16.msra.mxu0 %v7752_v29 }
0x279c   : > { %7422 = vmatprep.subr.bf16.mxu0 %v8042_v1 }
0x279f   : > { %7423 = vmatpush3.bf16.msra.mxu0 %v7753_v38 }
0x27a0   : > { %7436 = vmatprep.subr.bf16.mxu0 %v7754_v40 }
0x27c2   : > { %v5043_v56 = vpop.xlane.xlu1 %5042 }
0x27c3   : > { %7954 = vrcp.f32 %v5043_v56 }
0x27c6   : > { %v5201_v18 = vpop.permute.xlu1 %5200 }
0x27c7   : > { %v5206_v30 = vsel %vm563_vm2, %v5201_v18, 0 }
0x27c8   : > { %7415 = vmatpush3.bf16.msra.mxu1 %v5206_v30 }
0x27c9   : > { %7428 = vmatprep.subr.bf16.mxu1 %v8042_v1 }
0x27cd   : > { %v7955_v52 = vpop.eup %7954 }
0x27ce   : > { %v5051_v16 = vmul.f32 %v7955_v52, %v7947_v54 }
0x27d0   : > { %v5055_v14 = vpack.c.bf16 %v5051_v16, %v5051_v16 }
0x27d2   : > { %7417 = vmatmul.mubr.msk.bf16.vlgmr.msra.gmra.mrb[116].mxu1 %vm1030_vm9, %v5055_v14 }
0x27d3   : > { %7432 = vmatprep.mubr.msk.bf16.mxu1 %vm8043_vm1, %v8042_v1  ;;  %7429 = vmatpush3.bf16.msra.mxu1 %v7756_v59 }
0x27d4   : > { %7430 = vmatprep.subr.bf16.mxu1 %v8042_v1 }
0x27d7   : > { %7431 = vmatpush3.bf16.msra.mxu1 %v7757_v62 }
0x27d8   : > { %7444 = vmatprep.subr.bf16.mxu1 %v8042_v1 }
0x2864   : > { %v5098_v39 = vpop.f32.mrb[112].mxu0 }
0x2865   : > { %v7400_v47 = vpop.f32.mrb[113].mxu0 }
0x2866   : > { %v5101_v43 = vpop.f32.mrb[114].mxu0 }
0x2867   : > { %v7401_v20 = vpop.f32.mrb[115].mxu0 }
0x2868   : > { %v6673_v20 = vld [vmem:[%s9812_s11 + $0x1b] ss:$0 sm:$0xff] }
0x286c   : > { %v5146_v42 = vpop.f32.mrb[112].mxu1  ;;  %v5194_v55 = vpop.f32.mrb[116].mxu0 }
0x286d   : > { %5249 = vrot.lane.b32.xlu0 %v5146_v42, %s9848_s19  ;;  %v7406_v9 = vpop.f32.mrb[113].mxu1  ;;  %5253 = vrot.lane.b32.xlu1 %v5194_v55, %s9849_s30  ;;  %v7412_v23 = vpop.f32.mrb[117].mxu0 }
0x286e   : > { %v5149_v24 = vpop.f32.mrb[114].mxu1  ;;  %v5197_v61 = vpop.f32.mrb[118].mxu0 }
0x286f   : > { %v7407_v57 = vpop.f32.mrb[115].mxu1  ;;  %v7413_v7 = vpop.f32.mrb[119].mxu0 }
0x28a5   : > { %v5242_v28 = vpop.f32.mrb[116].mxu1 }
0x28a6   : > { %5257 = vrot.lane.b32.xlu0 %v5242_v28, %s9850_s20  ;;  %v7418_v6 = vpop.f32.mrb[117].mxu1 }
0x28a7   : > { %v5245_v44 = vpop.f32.mrb[118].mxu1 }
0x28a8   : > { %v7419_v2 = vpop.f32.mrb[119].mxu1 }
0x28df   : > { %v5250_v4 = vpop.permute.xlu0 %5249  ;;  %v5254_v58 = vpop.permute.xlu1 %5253 }
0x28e0   : > { %v5260_v8 = vsel %vm1030_vm9, %v5098_v39, %v5250_v4  ;;  %v6672_v39 = vld [vmem:[%s9812_s11 + $0x1a] ss:$0 sm:$0xff] }
0x28e1   : > { %v5261_v60 = vsel %vm1718_vm12, %v5260_v8, %v5254_v58 }
0x2918   : > { %v5258_v13 = vpop.permute.xlu0 %5257 }
0x2919   : > { %v5262_v31 = vsel %vm1722_vm13, %v5261_v60, %v5258_v13 }
0x291a   : > { %v5263_v48 = vpack.c.bf16 %v5262_v31, %v5262_v31 }
0x291c   : > { %7425 = vmatmul.mubr.msk.bf16.vlgmr.msra.gmra.mrb[120].mxu0 %vm527_vm7, %v5263_v48 }
0x291d   : > { %7437 = vmatpush3.bf16.msra.mxu0 %v7754_v40  ;;  %7440 = vmatprep.mubr.msk.bf16.mxu0 %vm527_vm7, %v9176_v3  ;;  %v6674_v40 = vld [vmem:[%s9812_s11 + $0x1c] ss:$0 sm:$0xff] }
0x291e   : > { %7438 = vmatprep.subr.bf16.mxu0 %v7755_v50 }
0x2921   : > { %7439 = vmatpush3.bf16.msra.mxu0 %v7755_v50 }
0x2922   : > { %7452 = vmatprep.subr.bf16.mxu0 %v8042_v1 }
0x2924   : > { %7441 = vmatmul.mubr.msk.bf16.vlgmr.msra.gmra.mrb[124].mxu0 %vm527_vm7, %v9180_v10  ;;  %v6678_v10 = vld [vmem:[%s9812_s11 + $0x1d] ss:$0 sm:$0xff] }
0x2925   : > { %7456 = vmatprep.mubr.msk.bf16.mxu0 %vm8043_vm1, %v8042_v1 }
0x29ef   : > { %v5317_v33 = vpop.f32.mrb[120].mxu0 }
0x29f0   : > { %v5323_v26 = vadd.f32 %v5317_v33, %v9403_v36  ;;  %v7426_v25 = vpop.f32.mrb[121].mxu0 }
0x29f1   : > { %v5320_v21 = vpop.f32.mrb[122].mxu0 }
0x29f2   : > { %v5329_v3 = vadd.f32 %v6671_v5, %v5323_v26  ;;  %v7427_v19 = vpop.f32.mrb[123].mxu0 }
0x29f4   : > { %v5332_v54 = vsel %vm527_vm7, %v5329_v3, 0.0 }
0x29f5   : > { %5333 = vadd.xlane.f32.xlu1 %v5332_v54 }
0x29f7   : > { %v7442_v11 = vpop.f32.mrb[124].mxu0 }
0x29f8   : > { %v5475_v0 = vpop.f32.mrb[125].mxu0  ;;  %v9533_v36 = vadd.f32 %v7442_v11, %v6678_v10 }
0x29f9   : > { %v7443_v12 = vpop.f32.mrb[126].mxu0  ;;  %v5476_v46 = vadd.f32 %v6678_v10, %v5475_v0 }
0x29fa   : > { %v5478_v35 = vpop.f32.mrb[127].mxu0  ;;  %v9579_v24 = vpack.c.bf16 %v9533_v36, %v9533_v36 }
0x29fb   : > { %v5479_v27 = vadd.f32 %v6678_v10, %v5478_v35 }
0x29fc   : > { %v5548_v61 = vsel %vm1030_vm9, %v9579_v24, 0 }
0x29fd   : > { %v7698_v63 = vpack.i.bf16 %v5479_v27, %v5476_v46  ;;  %v9531_v15 = vpack.c.bf16 %v5479_v27, %v5476_v46 }
0x29ff   : > { %v5545_v23 = vsel %vm1030_vm9, %v9531_v15, 0 }
0x2a06   : > { %5510 = vrot.lane.b32.xlu1 %v9533_v36, %s9852_s17 }
0x2a0a   : > { %7699 = vrot.lane.b32.xlu1 %v7698_v63, %s9851_s18 }
0x2a82   : > { %v5334_v17 = vpop.xlane.xlu1 %5333 }
0x2a83   : > { %v5335_v45 = vmul.f32 0.03125, %v5334_v17 }
0x2a85   : > { %v5336_v49 = vsub.f32 %v5329_v3, %v5335_v45 }
0x2a86   : > { %v5511_v16 = vpop.permute.xlu1 %5510 }
0x2a87   : > { %v5337_v22 = vmul.f32 %v5336_v49, %v5336_v49  ;;  %v9556_v14 = vpack.c.bf16 %v5511_v16, %v5511_v16 }
0x2a89   : > { %v5338_v53 = vsel %vm527_vm7, %v5337_v22, 0.0  ;;  %v5597_v43 = vsel %vm1030_vm9, %v9556_v14, 0 }
0x2a8a   : > { %5339 = vadd.xlane.f32.xlu0 %v5338_v53  ;;  %v7700_v57 = vpop.permute.xlu1 %7699 }
0x2a8b   : > { %v7702_v7 = vunpack.i.h.bf16 %v7700_v57  ;;  %v7701_v38 = vunpack.i.l.bf16 %v7700_v57 }
0x2a8d   : > { %v9587_v44 = vpack.c.bf16 %v7702_v7, %v7701_v38 }
0x2a8f   : > { %v5643_v13 = vsel %vm1030_vm9, %v9587_v44, 0 }
0x2aa0   : > { %7694 = vrot.lane.b32.xlu0 %v7698_v63, %s9852_s17 }
0x2aa4   : > { %7704 = vrot.lane.b32.xlu0 %v7698_v63, %s9853_s0 }
0x2aa8   : > { %5519 = vrot.lane.b32.xlu0 %v9533_v36, %s9851_s18 }
0x2b17   : > { %v5340_v32 = vpop.xlane.xlu0 %5339 }
0x2b18   : > { %v5341_v34 = vmul.f32 0.03125, %v5340_v32 }
0x2b1a   : > { %v5342_v37 = vadd.f32 1e-05, %v5341_v34 }
0x2b1b   : > { %v7695_v51 = vpop.permute.xlu0 %7694 }
0x2b1c   : > { %7956 = vrsqrt.f32 %v5342_v37  ;;  %v7697_v56 = vunpack.i.h.bf16 %v7695_v51  ;;  %v7696_v18 = vunpack.i.l.bf16 %v7695_v51 }
0x2b1e   : > { %v9551_v30 = vpack.c.bf16 %v7697_v56, %v7696_v18 }
0x2b1f   : > { %v7705_v28 = vpop.permute.xlu0 %7704 }
0x2b20   : > { %v5594_v52 = vsel %vm1030_vm9, %v9551_v30, 0  ;;  %v7707_v33 = vunpack.i.h.bf16 %v7705_v28  ;;  %v7706_v5 = vunpack.i.l.bf16 %v7705_v28 }
0x2b21   : > { %7453 = vmatpush3.bf16.xpose.msra.mxu0 %v5594_v52 }
0x2b22   : > { %7454 = vmatprep.subr.bf16.mxu0 %v8042_v1  ;;  %v5539_v26 = vpack.c.bf16 %v7707_v33, %v7706_v5 }
0x2b23   : > { %v5520_v31 = vpop.permute.xlu0 %5519 }
0x2b24   : > { %v9599_v48 = vpack.c.bf16 %v5520_v31, %v5520_v31  ;;  %v5692_v54 = vsel %vm1030_vm9, %v5539_v26, 0 }
0x2b26   : > { %v7957_v29 = vpop.eup %7956  ;;  %v5646_v50 = vsel %vm1030_vm9, %v9599_v48, 0 }
0x2b27   : > { %v5344_v47 = vmul.f32 %v7957_v29, %v5336_v49 }
0x2b29   : > { %v5349_v42 = vmul.f32 %v6672_v39, %v5344_v47  ;;  %7455 = vmatpush3.bf16.xpose.msra.mxu0 %v5597_v43 }
0x2b2a   : > { %7468 = vmatprep.subr.bf16.mxu0 %v8042_v1 }
0x2b2b   : > { %v9567_v55 = vadd.f32 %v6673_v20, %v5349_v42 }
0x2b2d   : > { %v5355_v9 = vpack.c.bf16 %v9567_v55, %v9567_v55 }
0x2b2f   : > { %7433 = vmatmul.mubr.msk.bf16.vlgmr.msra.gmra.mrb[120].mxu1 %vm527_vm7, %v5355_v9 }
0x2b30   : > { %7445 = vmatpush3.bf16.xpose.msra.mxu1 %v5545_v23  ;;  %7448 = vmatprep.mubr.msk.bf16.mxu1 %vm8043_vm1, %v8042_v1 }
0x2b31   : > { %7446 = vmatprep.subr.bf16.mxu1 %v8042_v1 }
0x2b38   : > { %7447 = vmatpush3.bf16.xpose.msra.mxu1 %v5548_v61 }
0x2b39   : > { %7460 = vmatprep.subr.bf16.mxu1 %v8042_v1 }
0x2c02   : > { %v5414_v6 = vpop.f32.mrb[120].mxu1 }
0x2c03   : > { %v5415_v2 = vadd.f32 %v6674_v40, %v5414_v6  ;;  %v7434_v4 = vpop.f32.mrb[121].mxu1 }
0x2c04   : > { %v5417_v8 = vpop.f32.mrb[122].mxu1 }
0x2c05   : > { %v5499_v58 = vpack.c.bf16 %v5415_v2, %v5415_v2  ;;  %5493 = vrot.lane.b32.xlu0 %v5415_v2, %s9851_s18  ;;  %5490 = vrot.lane.b32.xlu1 %v5415_v2, %s9852_s17  ;;  %v7435_v60 = vpop.f32.mrb[123].mxu1  ;;  %s491_s17 = sand.u32 1, %s8032_s22  }
0x2c07   : > { %7449 = vmatmul.mubr.msk.bf16.vlgmr.msra.gmra.mrb[124].mxu1 %vm1030_vm9, %v5499_v58 }
0x2c08   : > { %7461 = vmatpush3.bf16.xpose.msra.mxu1 %v5643_v13  ;;  %7464 = vmatprep.mubr.msk.bf16.mxu1 %vm8043_vm1, %v8042_v1 }
0x2c09   : > { %5528 = vrot.lane.b32.xlu1 %v9533_v36, %s9853_s0  ;;  %7462 = vmatprep.subr.bf16.mxu1 %v8042_v1 }
0x2c0d   : > { %5496 = vrot.lane.b32.xlu1 %v5415_v2, %s9853_s0  ;;  %s6507_s0 = sshll.u32 %s491_s17, 3 }
0x2c0e   : > { %s493_s2 = scalar_lea.vmem [#allocation3], %s6507_s0 }
0x2c0f   : > { %s6366_s27 = sshll.u32 %s493_s2, 4  ;;  %s9760_s27 = int_to_ptr.vmem [resolvable:$true] %s6366_s27 }
0x2c10   : > { %7463 = vmatpush3.bf16.xpose.msra.mxu1 %v5646_v50  ;;  %s7978_s28 = scalar_lea.vmem %s9760_s27, 128  ;;  %p7985_p0 = scmp.lt.s32.totalorder %s9760_s27, %s7983_s23 }
0x2c11   : > { %7476 = vmatprep.subr.bf16.mxu1 %v8042_v1  ;;  %p7979_p11 = scmp.ne.s32.totalorder %s9760_s27, %s7978_s28  ;;  %p7986_p1 = scmp.lt.s32.totalorder %s7984_s15, %s7978_s28 }
0x2c13   : > { %p7980_p12 = pnand %p7979_p11, %p8156_p5  ;;  %p7987_p2 = por %p7986_p1, %p7985_p0 }
0x2c15   : > { %p7981_p13 = pneg %p7980_p12 }
0x2c17   : > { %p7988_p3 = pnand %p7987_p2, %p7981_p13 }
0x2c77   : > { %v5494_v25 = vpop.permute.xlu0 %5493  ;;  %v5491_v21 = vpop.permute.xlu1 %5490 }
0x2c78   : > { %v5501_v3 = vpack.c.bf16 %v5494_v25, %v5494_v25  ;;  %v5500_v19 = vpack.c.bf16 %v5491_v21, %v5491_v21 }
0x2c7a   : > { %7457 = vmatmul.mubr.msk.bf16.vlgmr.msra.gmra.mrb[128].mxu0 %vm1030_vm9, %v5500_v19  ;;  %7465 = vmatmul.mubr.msk.bf16.vlgmr.msra.gmra.mrb[128].mxu1 %vm1030_vm9, %v5501_v3 }
0x2c7b   : > { %7469 = vmatpush3.bf16.xpose.msra.mxu0 %v5692_v54  ;;  %v5529_v11 = vpop.permute.xlu1 %5528  ;;  %7472 = vmatprep.mubr.msk.bf16.mxu0 %vm8043_vm1, %v8042_v1 }
0x2c7c   : > { %7470 = vmatprep.subr.bf16.mxu0 %v8042_v1  ;;  %7480 = vmatprep.mubr.msk.bf16.mxu1 %vm8043_vm1, %v8042_v1  ;;  %v9613_v10 = vpack.c.bf16 %v5529_v11, %v5529_v11 }
0x2c7e   : > { %v5695_v0 = vsel %vm1030_vm9, %v9613_v10, 0 }
0x2c7f   : > { %v5497_v12 = vpop.permute.xlu1 %5496 }
0x2c80   : > { %v5502_v35 = vpack.c.bf16 %v5497_v12, %v5497_v12 }
0x2c83   : > { %7471 = vmatpush3.bf16.xpose.msra.mxu0 %v5695_v0 }
0x2c84   : > { %7484 = vmatprep.subr.bf16.mxu0 %v8042_v1 }
0x2c8a   : > { %7473 = vmatmul.mubr.msk.bf16.vlgmr.msra.gmra.mrb[132].mxu0 %vm1030_vm9, %v5502_v35 }
0x2c8b   : > { %7488 = vmatprep.mubr.msk.bf16.mxu0 %vm8043_vm1, %v8042_v1 }
0x2cda   : > { %v5584_v46 = vpop.f32.mrb[124].mxu1 }
0x2cdb   : > { %v5737_v27 = vmul.f32 0.35355338, %v5584_v46  ;;  %v7450_v63 = vpop.f32.mrb[125].mxu1 }
0x2cdc   : > { %v5587_v36 = vpop.f32.mrb[126].mxu1 }
0x2cdd   : > { %v5741_v17 = vadd.f32 %v5737_v27, %v8376_v41  ;;  %v7451_v45 = vpop.f32.mrb[127].mxu1 }
0x2cdf   : > { %v5745_v49 = vsel %vm1289_vm11, %v5741_v17, -inf }
0x2ce0   : > { %5746 = vmax.xlane.f32.xlu0 %v5745_v49 }
0x2d4d   : > { %v5633_v22 = vpop.f32.mrb[128].mxu0  ;;  %v5682_v53 = vpop.f32.mrb[128].mxu1 }
0x2d4e   : > { %v5738_v59 = vmul.f32 0.35355338, %v5633_v22  ;;  %v5739_v62 = vmul.f32 0.35355338, %v5682_v53  ;;  %v7458_v32 = vpop.f32.mrb[129].mxu0  ;;  %v7466_v34 = vpop.f32.mrb[129].mxu1 }
0x2d4f   : > { %v5636_v37 = vpop.f32.mrb[130].mxu0  ;;  %v5685_v51 = vpop.f32.mrb[130].mxu1 }
0x2d50   : > { %v5742_v56 = vadd.f32 %v5738_v59, %v8376_v41  ;;  %v5743_v18 = vadd.f32 %v5739_v62, %v8376_v41  ;;  %v7459_v52 = vpop.f32.mrb[131].mxu0  ;;  %v7467_v16 = vpop.f32.mrb[131].mxu1 }
0x2d51   : > { %v7758_v16 = vld [vmem:[%s9811_s10 + $0x1a0] sm:$0xff]  }
0x2d52   : > { %v5748_v29 = vsel %vm1289_vm11, %v5742_v56, -inf  ;;  %v5751_v39 = vsel %vm1289_vm11, %v5743_v18, -inf }
0x2d53   : > { %5749 = vmax.xlane.f32.xlu1 %v5748_v29  ;;  %5752 = vmax.xlane.f32.xlu0 %v5751_v39 }
0x2d5d   : > { %v5731_v47 = vpop.f32.mrb[132].mxu0 }
0x2d5e   : > { %v5740_v43 = vmul.f32 0.35355338, %v5731_v47  ;;  %v7474_v20 = vpop.f32.mrb[133].mxu0 }
0x2d5f   : > { %v5734_v42 = vpop.f32.mrb[134].mxu0 }
0x2d60   : > { %v5744_v9 = vadd.f32 %v5740_v43, %v8376_v41  ;;  %v7475_v23 = vpop.f32.mrb[135].mxu0 }
0x2d61   : > { %v7759_v23 = vld [vmem:[%s9811_s10 + $0x1a8] sm:$0xff]  }
0x2d62   : > { %v5754_v61 = vsel %vm1289_vm11, %v5744_v9, -inf }
0x2d63   : > { %5755 = vmax.xlane.f32.xlu0 %v5754_v61 }
0x2d64   : > { %5848 = vrot.lane.b32.xlu1 %v9551_v30, %s9846_s1 }
0x2d68   : > { %5797 = vrot.lane.b32.xlu1 %v9579_v24, %s9846_s1 }
0x2d6c   : > { %5850 = vrot.lane.b32.xlu1 %v9556_v14, %s9846_s1 }
0x2d6d   : > { %v5747_v41 = vpop.xlane.xlu0 %5746 }
0x2d6e   : > { %v5757_v57 = vsub.f32 %v5741_v17, %v5747_v41 }
0x2d70   : > { %5954 = vrot.lane.b32.xlu1 %v5539_v26, %s9846_s1  ;;  %v5761_v7 = vmul.f32 1.442695, %v5757_v57 }
0x2d72   : > { %7958 = vpow2.f32 %v5761_v7 }
0x2d79   : > { %5795 = vrot.lane.b32.xlu0 %v9531_v15, %s9846_s1 }
0x2d7c   : > { %v7959_v38 = vpop.eup %7958 }
0x2d7d   : > { %5901 = vrot.lane.b32.xlu0 %v9587_v44, %s9846_s1  ;;  %v5769_v30 = vsel %vm1289_vm11, %v7959_v38, 0.0 }
0x2d9c   : > { %5770 = vadd.xlane.f32.xlu0 %v5769_v30 }
0x2de0   : > { %v5750_v24 = vpop.xlane.xlu1 %5749  ;;  %v5753_v40 = vpop.xlane.xlu0 %5752 }
0x2de1   : > { %v5758_v28 = vsub.f32 %v5742_v56, %v5750_v24  ;;  %v5759_v14 = vsub.f32 %v5743_v18, %v5753_v40 }
0x2de3   : > { %v5763_v6 = vmul.f32 1.442695, %v5758_v28  ;;  %v5765_v2 = vmul.f32 1.442695, %v5759_v14 }
0x2de4   : > { %v5849_v4 = vpop.permute.xlu1 %5848 }
0x2de5   : > { %7960 = vpow2.f32 %v5763_v6  ;;  %7485 = vmatpush3.bf16.msra.mxu0 %v5849_v4 }
0x2de6   : > { %7962 = vpow2.f32 %v5765_v2  ;;  %7486 = vmatprep.subr.bf16.mxu0 %v8042_v1 }
0x2de8   : > { %v5798_v15 = vpop.permute.xlu1 %5797 }
0x2de9   : > { %v5804_v25 = vsel %vm618_vm0, %v5798_v15, 0  ;;  %v6694_v15 = vld [vmem:[%s9812_s11 + $0x1e] ss:$0 sm:$0xff] }
0x2dec   : > { %v5851_v44 = vpop.permute.xlu1 %5850 }
0x2ded   : > { %v5857_v8 = vsel %vm618_vm0, %v5851_v44, 0 }
0x2dee   : > { %7487 = vmatpush3.bf16.msra.mxu0 %v5857_v8 }
0x2def   : > { %v7961_v58 = vpop.eup %7960  ;;  %7500 = vmatprep.subr.bf16.mxu0 %v8042_v1 }
0x2df0   : > { %v7963_v60 = vpop.eup %7962  ;;  %v5756_v13 = vpop.xlane.xlu0 %5755  ;;  %v5772_v31 = vsel %vm1289_vm11, %v7961_v58, 0.0 }
0x2df1   : > { %v5760_v50 = vsub.f32 %v5744_v9, %v5756_v13  ;;  %5773 = vadd.xlane.f32.xlu1 %v5772_v31  ;;  %v5775_v33 = vsel %vm1289_vm11, %v7963_v60, 0.0  ;;  %v5955_v35 = vpop.permute.xlu1 %5954 }
0x2df2   : > { %5776 = vadd.xlane.f32.xlu0 %v5775_v33 }
0x2df3   : > { %v5767_v5 = vmul.f32 1.442695, %v5760_v50 }
0x2df4   : > { %v5796_v26 = vpop.permute.xlu0 %5795 }
0x2df5   : > { %7964 = vpow2.f32 %v5767_v5  ;;  %7477 = vmatpush3.bf16.msra.mxu1 %v5796_v26 }
0x2df6   : > { %7478 = vmatprep.subr.bf16.mxu1 %v8042_v1 }
0x2df8   : > { %v5902_v19 = vpop.permute.xlu0 %5901 }
0x2df9   : > { %7479 = vmatpush3.bf16.msra.mxu1 %v5804_v25 }
0x2dfa   : > { %7492 = vmatprep.subr.bf16.mxu1 %v8042_v1 }
0x2dff   : > { %v7965_v21 = vpop.eup %7964 }
0x2e00   : > { %v5778_v3 = vsel %vm1289_vm11, %v7965_v21, 0.0 }
0x2e01   : > { %5779 = vadd.xlane.f32.xlu1 %v5778_v3  ;;  %v7762_v3 = vld [vmem:[%s9811_s10 + $0x1c0] sm:$0xff]  }
0x2e08   : > { %5903 = vrot.lane.b32.xlu0 %v9599_v48, %s9846_s1 }
0x2e12   : > { %5956 = vrot.lane.b32.xlu1 %v9613_v10, %s9846_s1 }
0x2e29   : > { %v5771_v54 = vpop.xlane.xlu0 %5770 }
0x2e2a   : > { %7966 = vrcp.f32 %v5771_v54 }
0x2e34   : > { %v7967_v11 = vpop.eup %7966 }
0x2e35   : > { %v5785_v0 = vmul.f32 %v7967_v11, %v7959_v38 }
0x2e37   : > { %v5789_v12 = vpack.c.bf16 %v5785_v0, %v5785_v0 }
0x2e39   : > { %7481 = vmatmul.mubr.msk.bf16.vlgmr.msra.gmra.mrb[132].mxu1 %vm1289_vm11, %v5789_v12 }
0x2e3a   : > { %7493 = vmatpush3.bf16.msra.mxu1 %v5902_v19  ;;  %7496 = vmatprep.mubr.msk.bf16.mxu1 %vm8043_vm1, %v8042_v1  ;;  %v7763_v19 = vld [vmem:[%s9811_s10 + $0x1c8] sm:$0xff]  }
0x2e3b   : > { %7494 = vmatprep.subr.bf16.mxu1 %v8042_v1 }
0x2e7e   : > { %v5774_v46 = vpop.xlane.xlu1 %5773 }
0x2e7f   : > { %7968 = vrcp.f32 %v5774_v46  ;;  %v5777_v48 = vpop.xlane.xlu0 %5776 }
0x2e80   : > { %7970 = vrcp.f32 %v5777_v48  ;;  %v6696_v48 = vld [vmem:[%s9812_s11 + $0x20] ss:$0 sm:$0xff] }
0x2e83   : > { %v5904_v10 = vpop.permute.xlu0 %5903 }
0x2e84   : > { %v5910_v27 = vsel %vm618_vm0, %v5904_v10, 0 }
0x2e85   : > { %7495 = vmatpush3.bf16.msra.mxu1 %v5910_v27 }
0x2e86   : > { %7508 = vmatprep.subr.bf16.mxu1 %v8042_v1 }
0x2e89   : > { %v7969_v63 = vpop.eup %7968 }
0x2e8a   : > { %v7971_v36 = vpop.eup %7970  ;;  %v5786_v17 = vmul.f32 %v7969_v63, %v7961_v58 }
0x2e8b   : > { %v5787_v45 = vmul.f32 %v7971_v36, %v7963_v60  ;;  %v7764_v36 = vld [vmem:[%s9811_s10 + $0x1d0] sm:$0xff]  }
0x2e8c   : > { %v5790_v49 = vpack.c.bf16 %v5786_v17, %v5786_v17  ;;  %v7765_v17 = vld [vmem:[%s9811_s10 + $0x1d8] sm:$0xff]  }
0x2e8d   : > { %v5791_v22 = vpack.c.bf16 %v5787_v45, %v5787_v45  ;;  %v6697_v45 = vld [vmem:[%s9812_s11 + $0x21] ss:$0 sm:$0xff] }
0x2e8e   : > { %v5780_v53 = vpop.xlane.xlu1 %5779  ;;  %7489 = vmatmul.mubr.msk.bf16.vlgmr.msra.gmra.mrb[136].mxu0 %vm1289_vm11, %v5790_v49 }
0x2e8f   : > { %7972 = vrcp.f32 %v5780_v53  ;;  %7497 = vmatmul.mubr.msk.bf16.vlgmr.msra.gmra.mrb[136].mxu1 %vm1289_vm11, %v5791_v22  ;;  %7501 = vmatpush3.bf16.msra.mxu0 %v5955_v35  ;;  %v6695_v35 = vld [vmem:[%s9812_s11 + $0x1f] ss:$0 sm:$0xff] }
0x2e90   : > { %7502 = vmatprep.subr.bf16.mxu0 %v8042_v1  ;;  %7504 = vmatprep.mubr.msk.bf16.mxu0 %vm8043_vm1, %v8042_v1 }
0x2e91   : > { %7512 = vmatprep.mubr.msk.bf16.mxu1 %vm8043_vm1, %v8042_v1  ;;  %7509 = vmatpush3.bf16.msra.mxu1 %v7758_v16 }
0x2e92   : > { %v5957_v59 = vpop.permute.xlu1 %5956  ;;  %7510 = vmatprep.subr.bf16.mxu1 %v8042_v1 }
0x2e93   : > { %v5963_v62 = vsel %vm618_vm0, %v5957_v59, 0 }
0x2e94   : > { %7503 = vmatpush3.bf16.msra.mxu0 %v5963_v62 }
0x2e95   : > { %7516 = vmatprep.subr.bf16.mxu0 %v8042_v1  ;;  %7511 = vmatpush3.bf16.msra.mxu1 %v7759_v23  ;;  %v7766_v23 = vld [vmem:[%s9811_s10 + $0x1e0] sm:$0xff]  }
0x2e96   : > { %7524 = vmatprep.subr.bf16.mxu1 %v8042_v1 }
0x2e99   : > { %v7973_v32 = vpop.eup %7972 }
0x2e9a   : > { %v5788_v34 = vmul.f32 %v7973_v32, %v7965_v21  ;;  %v7760_v21 = vld [vmem:[%s9811_s10 + $0x1b0] sm:$0xff]  }
0x2e9c   : > { %v5792_v37 = vpack.c.bf16 %v5788_v34, %v5788_v34 }
0x2e9e   : > { %7505 = vmatmul.mubr.msk.bf16.vlgmr.msra.gmra.mrb[140].mxu0 %vm1289_vm11, %v5792_v37 }
0x2e9f   : > { %7520 = vmatprep.mubr.msk.bf16.mxu0 %vm8043_vm1, %v8042_v1  ;;  %7517 = vmatpush3.bf16.msra.mxu0 %v7760_v21 }
0x2ea0   : > { %7518 = vmatprep.subr.bf16.mxu0 %v8042_v1 }
0x2f0c   : > { %v5840_v51 = vpop.f32.mrb[132].mxu1 }
0x2f0d   : > { %v7482_v56 = vpop.f32.mrb[133].mxu1 }
0x2f0e   : > { %v5843_v18 = vpop.f32.mrb[134].mxu1 }
0x2f0f   : > { %v7483_v52 = vpop.f32.mrb[135].mxu1 }
0x2f61   : > { %v5893_v29 = vpop.f32.mrb[136].mxu0 }
0x2f62   : > { %v5946_v39 = vpop.f32.mrb[136].mxu1  ;;  %v7490_v47 = vpop.f32.mrb[137].mxu0  ;;  %6006 = vrot.lane.b32.xlu0 %v5893_v29, %s9848_s19 }
0x2f63   : > { %6010 = vrot.lane.b32.xlu1 %v5946_v39, %s9849_s30  ;;  %v7498_v43 = vpop.f32.mrb[137].mxu1  ;;  %v5896_v20 = vpop.f32.mrb[138].mxu0 }
0x2f64   : > { %v5949_v42 = vpop.f32.mrb[138].mxu1  ;;  %v7491_v9 = vpop.f32.mrb[139].mxu0 }
0x2f65   : > { %v7499_v61 = vpop.f32.mrb[139].mxu1 }
0x2f66   : > { %v7767_v61 = vld [vmem:[%s9811_s10 + $0x1e8] sm:$0xff]  }
0x2f71   : > { %v5999_v41 = vpop.f32.mrb[140].mxu0 }
0x2f72   : > { %6014 = vrot.lane.b32.xlu0 %v5999_v41, %s9850_s20  ;;  %v7506_v57 = vpop.f32.mrb[141].mxu0  ;;  %s6714_s20 = sshll.u32 %s8139_s25, 7  ;;  %s6353_s25 = scalar_lea.sflag [#allocation4], %s491_s17 }
0x2f73   : > { %v6002_v7 = vpop.f32.mrb[142].mxu0  ;;  %s9758_s16 = scalar_lea.hbm %s9813_s12, %s6714_s20 }
0x2f74   : > { %v7507_v38 = vpop.f32.mrb[143].mxu0 }
0x2fd4   : > { %v6007_v30 = vpop.permute.xlu0 %6006 }
0x2fd5   : > { %v6017_v24 = vsel %vm1030_vm9, %v5840_v51, %v6007_v30  ;;  %v6011_v40 = vpop.permute.xlu1 %6010  ;;  %v6706_v51 = vld [vmem:[%s9812_s11 + $0x22] ss:$0 sm:$0xff]  ;;  %v6707_v30 = vld [vmem:[%s9812_s11 + $0x23] ss:$0 sm:$0xff] }
0x2fd6   : > { %v6018_v28 = vsel %vm1718_vm12, %v6017_v24, %v6011_v40  ;;  %v6708_v40 = vld [vmem:[%s9812_s11 + $0x24] ss:$0 sm:$0xff] }
0x2fe4   : > { %v6015_v14 = vpop.permute.xlu0 %6014 }
0x2fe5   : > { %v6019_v6 = vsel %vm1722_vm13, %v6018_v28, %v6015_v14 }
0x2fe6   : > { %v6020_v2 = vpack.c.bf16 %v6019_v6, %v6019_v6 }
0x2fe8   : > { %7513 = vmatmul.mubr.msk.bf16.vlgmr.msra.gmra.mrb[140].mxu1 %vm527_vm7, %v6020_v2 }
0x2fe9   : > { %7532 = vmatprep.mubr.msk.bf16.mxu1 %vm8043_vm1, %v8042_v1  ;;  %7525 = vmatpush3.bf16.msra.mxu1 %v7762_v3 }
0x2fea   : > { %7526 = vmatprep.subr.bf16.mxu1 %v8042_v1 }
0x2fed   : > { %7527 = vmatpush3.bf16.msra.mxu1 %v7763_v19 }
0x2fee   : > { %7528 = vmatprep.subr.bf16.mxu1 %v8042_v1 }
0x2ff1   : > { %7529 = vmatpush3.bf16.msra.mxu1 %v7764_v36 }
0x2ff2   : > { %7530 = vmatprep.subr.bf16.mxu1 %v8042_v1 }
0x2ff5   : > { %7531 = vmatpush3.bf16.msra.mxu1 %v7765_v17 }
0x30bb   : > { %v6074_v4 = vpop.f32.mrb[140].mxu1 }
0x30bc   : > { %v6080_v44 = vadd.f32 %v6074_v4, %v9567_v55  ;;  %v7514_v8 = vpop.f32.mrb[141].mxu1  ;;  %v7761_v55 = vld [vmem:[%s9811_s10 + $0x1b8] sm:$0xff]  }
0x30bd   : > { %v6077_v58 = vpop.f32.mrb[142].mxu1  ;;  %7519 = vmatpush3.bf16.msra.mxu0 %v7761_v55 }
0x30be   : > { %v6086_v60 = vadd.f32 %v6694_v15, %v6080_v44  ;;  %v7515_v13 = vpop.f32.mrb[143].mxu1  ;;  %7536 = vmatprep.subr.bf16.mxu0 %v8042_v1 }
0x30c0   : > { %v6089_v31 = vsel %vm527_vm7, %v6086_v60, 0.0 }
0x30c1   : > { %6090 = vadd.xlane.f32.xlu1 %v6089_v31 }
0x314e   : > { %v6091_v50 = vpop.xlane.xlu1 %6090 }
0x314f   : > { %v6092_v33 = vmul.f32 0.03125, %v6091_v50 }
0x3151   : > { %v6093_v5 = vsub.f32 %v6086_v60, %v6092_v33 }
0x3153   : > { %v6094_v26 = vmul.f32 %v6093_v5, %v6093_v5 }
0x3155   : > { %v6095_v25 = vsel %vm527_vm7, %v6094_v26, 0.0 }
0x3156   : > { %6096 = vadd.xlane.f32.xlu0 %v6095_v25 }
0x31e3   : > { %v6097_v54 = vpop.xlane.xlu0 %6096 }
0x31e4   : > { %v6098_v11 = vmul.f32 0.03125, %v6097_v54 }
0x31e6   : > { %v6099_v0 = vadd.f32 1e-05, %v6098_v11 }
0x31e8   : > { %7974 = vrsqrt.f32 %v6099_v0 }
0x31f2   : > { %v7975_v12 = vpop.eup %7974 }
0x31f3   : > { %v6101_v46 = vmul.f32 %v7975_v12, %v6093_v5 }
0x31f5   : > { %v6106_v10 = vmul.f32 %v6695_v35, %v6101_v46 }
0x31f7   : > { %v6111_v27 = vadd.f32 %v6696_v48, %v6106_v10 }
0x31f9   : > { %v6112_v63 = vpack.c.bf16 %v6111_v27, %v6111_v27 }
0x31fb   : > { %7521 = vmatmul.mubr.msk.bf16.vlgmr.msra.gmra.mrb[144].mxu0 %vm527_vm7, %v6112_v63 }
0x31fc   : > { %7540 = vmatprep.mubr.msk.bf16.mxu0 %vm8043_vm1, %v8042_v1  ;;  %7537 = vmatpush3.bf16.msra.mxu0 %v7766_v23 }
0x31fd   : > { %7538 = vmatprep.subr.bf16.mxu0 %v8042_v1  ;;  %v6709_v1 = vld [vmem:[%s9812_s11 + $0x25] ss:$0 sm:$0xff] }
0x3200   : > { %7539 = vmatpush3.bf16.msra.mxu0 %v7767_v61 }
0x32ce   : > { %v6171_v49 = vpop.f32.mrb[144].mxu0 }
0x32cf   : > { %v6172_v22 = vadd.f32 %v6697_v45, %v6171_v49  ;;  %v7522_v53 = vpop.f32.mrb[145].mxu0 }
0x32d0   : > { %v6174_v59 = vpop.f32.mrb[146].mxu0 }
0x32d1   : > { %v6177_v62 = vmax.f32 %v6172_v22, 0.0  ;;  %v7523_v32 = vpop.f32.mrb[147].mxu0 }
0x32d3   : > { %v6178_v34 = vpack.c.bf16 %v6177_v62, %v6177_v62 }
0x32d5   : > { %7533 = vmatmul.mubr.msk.bf16.vlgmr.msra.gmra.mrb[144].mxu1 %vm1942_vm14, %v6178_v34 }
0x33a8   : > { %v6248_v37 = vpop.f32.mrb[144].mxu1 }
0x33a9   : > { %v6254_v56 = vadd.f32 %v6248_v37, %v6111_v27  ;;  %v7534_v18 = vpop.f32.mrb[145].mxu1 }
0x33aa   : > { %v6251_v52 = vpop.f32.mrb[146].mxu1 }
0x33ab   : > { %v6260_v16 = vadd.f32 %v6706_v51, %v6254_v56  ;;  %v7535_v29 = vpop.f32.mrb[147].mxu1 }
0x33ad   : > { %v6263_v39 = vsel %vm527_vm7, %v6260_v16, 0.0 }
0x33ae   : > { %6264 = vadd.xlane.f32.xlu0 %v6263_v39 }
0x343b   : > { %v6265_v47 = vpop.xlane.xlu0 %6264 }
0x343c   : > { %v6266_v43 = vmul.f32 0.03125, %v6265_v47 }
0x343e   : > { %v6267_v20 = vsub.f32 %v6260_v16, %v6266_v43 }
0x3440   : > { %v6268_v42 = vmul.f32 %v6267_v20, %v6267_v20 }
0x3442   : > { %v6269_v9 = vsel %vm527_vm7, %v6268_v42, 0.0 }
0x3443   : > { %6270 = vadd.xlane.f32.xlu0 %v6269_v9 }
0x34d0   : > { %v6271_v41 = vpop.xlane.xlu0 %6270 }
0x34d1   : > { %v6272_v57 = vmul.f32 0.03125, %v6271_v41 }
0x34d3   : > { %v6273_v7 = vadd.f32 1e-05, %v6272_v57 }
0x34d5   : > { %7976 = vrsqrt.f32 %v6273_v7 }
0x34df   : > { %v7977_v38 = vpop.eup %7976 }
0x34e0   : > { %v6275_v24 = vmul.f32 %v7977_v38, %v6267_v20 }
0x34e2   : > { %v6280_v28 = vmul.f32 %v6707_v30, %v6275_v24 }
0x34e4   : > { %v6285_v14 = vadd.f32 %v6708_v40, %v6280_v28 }
0x34e6   : > { %v6286_v6 = vpack.c.bf16 %v6285_v14, %v6285_v14 }
0x34e8   : > { %7541 = vmatmul.mubr.msk.bf16.vlgmr.msra.gmra.mrb[148].mxu0 %vm527_vm7, %v6286_v6 }
0x35bb   : > { %v6345_v2 = vpop.f32.mrb[148].mxu0 }
0x35bc   : > { %v6346_v4 = vadd.f32 %v6709_v1, %v6345_v2  ;;  %v7542_v15 = vpop.f32.mrb[149].mxu0 }
0x35bd   : > { %v6348_v44 = vpop.f32.mrb[150].mxu0 }
0x35be   : > { %v7543_v8 = vpop.f32.mrb[151].mxu0  ;;  %6351 = vst.msk [vmem:[%s493_s2] sm:$0xff] %vm1942_vm14, %v6346_v4 }
0x35bf   : > { %7991 = shalt.err (!%p7988_p3)
}
0x35c0   : > { %s7992_s1 = scalar_lea.hbm %s9758_s16, 128  ;;  %s7996_s0 = scalar_lea.hbm %s9813_s12, 256 }
0x35c1   : > { %p7993_p4 = scmp.ne.s32.totalorder %s9758_s16, %s7992_s1  ;;  %p7997_p9 = scmp.lt.u32.totalorder %s9758_s16, %s9813_s12 }
0x35c2   : > { %p7998_p10 = scmp.lt.u32.totalorder %s7996_s0, %s7992_s1  ;;  %p8000_p12 = scmp.lt.u32.totalorder %s7992_s1, %s9758_s16 }
0x35c3   : > { %p7994_p7 = pnand %p7993_p4, %p8156_p5 }
0x35c4   : > { %p7999_p11 = por %p7998_p10, %p7997_p9 }
0x35c5   : > { %p7995_p8 = pneg %p7994_p7 }
0x35c6   : > { %p8001_p13 = por %p8000_p12, %p7999_p11 }
0x35c8   : > { %p8002_p0 = pnand %p8001_p13, %p7995_p8 }
0x35ca   : > { %8005 = shalt.err (!%p8002_p0)
}
0x35cb   : > { %7569 = dma.vmem_to_hbm [thread:$0]  (%p8156_p5), %s9760_s27, 128, %s9758_s16, %s6353_s25  }
0x35cc PF: > { %p7575_p1 = scmp.ge.s32.totalorder %s8040_s24, 2  ;;  %s6378_s20 = sand.u32 1, %s8028_s21  }
0x35cd   : > { %s6379_s2 = scalar_lea.sflag [#allocation4], %s6378_s20 }
0x35ce   : > { %p7572_p2 = pnand %p7575_p1, %p8160_p6 }
0x35d0   : > { %8023 = dma.done.wait (!%p7572_p2), %s6379_s2, 128  }
0x35d1   : > { %8025 = vsyncadd (!%p7572_p2), %s6379_s2, 4294967168  ;;  %s9854_s24 = sld [smem:[#allocation7_spill]]  ;;  %s9855_s29 = sld [smem:[#allocation6_spill]] }
0x35d2   : > { %s9856_s23 = sld [smem:[#allocation8_spill]]  ;;  %s9857_s21 = smov %s8032_s22 }
0x35d7   : > { %p22_p3 = scmp.ge.s32.totalorder %s9854_s24, 4   ;;  %s9858_s22 = smov %s9855_s29 }
0x35d9   :  { %24 = sbr.rel (!%p22_p3) target bundleno = 8 (0x8), region = 124 }
0x35e0   :  { %6384 = vsyncpa [#allocation4], 1 }
0x35e1   :  { %6386 = vsyncpa [#allocation4 + $0x1], 1 }

</bundles_post_ra>
